<compile_context>
chip_gen: v6e
topology: v6e:2x2x1
jax: 0.10.0
libtpu: 0.0.40
codegen_flags: <defaults>
</compile_context>

<pallas_src>
import functools

import jax
import jax.numpy as jnp
from jax import lax
from jax.experimental import pallas as pl
from jax.experimental.pallas import tpu as pltpu

# Full f32 matmul precision so the in-kernel MXU math and the pure-JAX
# reference agree tightly.
jax.config.update("jax_default_matmul_precision", "highest")

FEAT_DIM = 2048  # hard-coded in the torch forward (count = 2048 / len(embed))


# ----------------------------------------------------------------------------
# Single fused kernel.  grid=(2,) "parallel" over score channels c.
# For channel c it computes, for every branch j:
#   f_j    = ReLU( mean_{HW}(x) @ Wb[j] + bb[j] )                  (B, count)
#   G_j    = (f_j[p]-f_j[g])^2 . w_{j,c} + b_{j,c}                 (B, B)
#            (algebraic form q[p]+q[g]-2*(f*w)@f^T -> real MXU matmuls)
#   A_j    = softmax(G_j with -inf diag, axis=1)
#   Aan_j  = (1-alpha) * (I - alpha*A_j)^{-1}   (batched Gauss-Jordan on [M|I])
# then all 16 (j,i) random-walk pairs via two (nb*B,B)@(B,nb*B) matmuls.
# ----------------------------------------------------------------------------
def fused_kernel(x_ref, wb_ref, bb_ref, we_ref, be_ref, sb_ref, sa_ref,
                 *, alpha, n, nb):
    pooled = jnp.mean(x_ref[...], axis=-1)                        # (B, C)

    W_all = we_ref[0]                                              # (nb, count)  channel-c weights
    b_all = be_ref[0]                                              # (1, nb)      channel-c biases

    dims = (((1,), (1,)), ((), ()))                                # contract last dims

    # ---- per-branch pairwise embed scores ----------------------------------
    g_list = []
    for j in range(nb):                                            # static unroll
        f = jnp.dot(pooled, wb_ref[j],
                    preferred_element_type=jnp.float32) + bb_ref[j]   # (B, count)
        f = jnp.maximum(f, 0.0)
        w = W_all[j:j + 1, :]                                      # (1, count)
        fsq = f * f
        fw = f * w
        # q[p] = sum_d f[p,d]^2 * w[d]  (both orientations -> no XLU transpose)
        q_col = lax.dot_general(fsq, w, dims,
                                preferred_element_type=jnp.float32)   # (B, 1)
        q_row = lax.dot_general(w, fsq, dims,
                                preferred_element_type=jnp.float32)   # (1, B)
        cross = lax.dot_general(fw, f, dims,
                                preferred_element_type=jnp.float32)   # (B, B)
        # (f[p]-f[g])^2 . w  =  q[p] + q[g] - 2 * cross[p,g]
        G = q_col + q_row - 2.0 * cross + b_all[:, j:j + 1]        # (B, B)
        g_list.append(G[None])

    P3 = jnp.concatenate(g_list, axis=0)                           # (nb, B, B)

    # ---- row-softmax with the diagonal masked out (batched over branches) --
    row = lax.broadcasted_iota(jnp.int32, (n, n), 0)
    col = lax.broadcasted_iota(jnp.int32, (n, n), 1)
    diag = row == col
    Gm = jnp.where(diag[None], -1e30, P3)
    m = jnp.max(Gm, axis=-1, keepdims=True)
    e = jnp.where(diag[None], 0.0, jnp.exp(Gm - m))
    A3 = e / jnp.sum(e, axis=-1, keepdims=True)                    # (nb, B, B)

    # ---- (1-a)*(I - a*A)^-1 via batched Gauss-Jordan on [M | I] ------------
    # I - alpha*A is strictly diagonally dominant (diag of A is 0, rows sum
    # to 1, alpha < 1) so no pivoting is needed.  Static slices only.
    eye = jnp.where(diag, 1.0, 0.0).astype(jnp.float32)            # (B, B)
    eye3 = jnp.broadcast_to(eye[None], (nb, n, n))
    Maug = jnp.concatenate([eye3 - alpha * A3, eye3], axis=-1)     # (nb, B, 2B)
    ridx = lax.broadcasted_iota(jnp.int32, (nb, n, 1), 1)
    for k in range(n):                                             # static unroll
        piv = Maug[:, k:k + 1, k:k + 1]                            # (nb, 1, 1)
        prow = Maug[:, k:k + 1, :] * (1.0 / piv)                   # (nb, 1, 2B)
        colv = Maug[:, :, k:k + 1]                                 # (nb, B, 1)
        # factor trick: row k gets (piv-1) so it becomes the scaled pivot row
        fac = jnp.where(ridx == k, piv - 1.0, colv)                # (nb, B, 1)
        Maug = Maug - fac * prow
    Aan3 = (1.0 - alpha) * Maug[:, :, n:]                          # (nb, B, B)

    # ---- all (j, i) random-walk pairs at once ------------------------------
    # P @ X^T on the branch-stacked (nb*B, B) slabs: block (j, i) == P_j @ X_i^T.
    P2 = P3.reshape(nb * n, n)
    A2 = A3.reshape(nb * n, n)
    Aan2 = Aan3.reshape(nb * n, n)
    PA = lax.dot_general(P2, A2, dims, preferred_element_type=jnp.float32)
    PAan = lax.dot_general(P2, Aan2, dims, preferred_element_type=jnp.float32)
    Ptile = jnp.concatenate([P2] * nb, axis=1)                     # (nb*B, nb*B)
    sb_ref[0] = alpha * PA + (1.0 - alpha) * Ptile                 # blended walk
    sa_ref[0] = PAan                                               # analysis walk


# ----------------------------------------------------------------------------
# Wrapper network
# ----------------------------------------------------------------------------
class GSDRWLSNetPallas:
    def __init__(self, batch=8, in_channels=4, hw=(16, 16), num_branches=4,
                 alpha=0.1, walkstep="combine"):
        assert FEAT_DIM % num_branches == 0
        assert batch > 1, "masked-diagonal softmax needs batch >= 2"
        if walkstep not in ("combine", "one", "analysis"):
            raise ValueError("expected walk step one/analysis/combine, got "
                             + str(walkstep))
        self.B = batch
        self.C = in_channels
        self.H, self.W = hw
        self.nb = num_branches
        self.alpha = float(alpha)
        self.walkstep = walkstep
        self.count = FEAT_DIM // num_branches

        # ---------------- deterministic synthetic parameters ----------------
        key = jax.random.PRNGKey(0)
        keys = jax.random.split(key, 2 + 2 * num_branches)
        self.w_base = 0.05 * jax.random.normal(keys[0], (self.C, FEAT_DIM), jnp.float32)
        self.b_base = 0.05 * jax.random.normal(keys[1], (1, FEAT_DIM), jnp.float32)
        self.embed_w = [0.01 * jax.random.normal(keys[2 + 2 * j], (self.count, 2), jnp.float32)
                        for j in range(num_branches)]
        self.embed_b = [0.01 * jax.random.normal(keys[3 + 2 * j], (1, 2), jnp.float32)
                        for j in range(num_branches)]

        # Host-side layouts so the kernel only needs full-extent / leading-axis
        # blocks (branch-major base params, channel-major embed params).
        nb, C, d = self.nb, self.C, self.count
        self.w_base_r = self.w_base.reshape(C, nb, d).transpose(1, 0, 2)   # (nb, C, d)
        self.b_base_r = self.b_base.reshape(nb, 1, d)                      # (nb, 1, d)
        self.w_embed_c = jnp.stack(self.embed_w, 0).transpose(2, 0, 1)     # (2, nb, d)
        self.b_embed_c = jnp.stack(self.embed_b, 0)[:, 0, :].T.reshape(2, 1, nb)  # (2, 1, nb)

        # ---------------- build the single pallas_call once ------------------
        B, HW = self.B, self.H * self.W
        self._fused_call = pl.pallas_call(
            functools.partial(fused_kernel, alpha=self.alpha, n=B, nb=nb),
            out_shape=(jax.ShapeDtypeStruct((2, nb * B, nb * B), jnp.float32),) * 2,
            grid_spec=pltpu.PrefetchScalarGridSpec(
                num_scalar_prefetch=0, grid=(2,),
                in_specs=[pl.BlockSpec((B, C, HW), lambda c: (0, 0, 0)),
                          pl.BlockSpec((nb, C, d), lambda c: (0, 0, 0)),
                          pl.BlockSpec((nb, 1, d), lambda c: (0, 0, 0)),
                          pl.BlockSpec((1, nb, d), lambda c: (c, 0, 0)),
                          pl.BlockSpec((1, 1, nb), lambda c: (c, 0, 0))],
                out_specs=[pl.BlockSpec((1, nb * B, nb * B), lambda c: (c, 0, 0)),
                           pl.BlockSpec((1, nb * B, nb * B), lambda c: (c, 0, 0))]),
            compiler_params=pltpu.CompilerParams(dimension_semantics=("parallel",)),
        )

        self._forward = jax.jit(self._forward_impl)

    # --- jitted forward: 1 pallas_call + layout-only XLA glue -----------------
    def _forward_impl(self, x):
        B, nb = self.B, self.nb
        xr = x.reshape(B, self.C, self.H * self.W)
        s_blend, s_an = self._fused_call(xr, self.w_base_r, self.b_base_r,
                                         self.w_embed_c, self.b_embed_c)

        def rearrange(S):                                          # -> torch .view(-1,2) order
            S = S.reshape(2, nb, B, nb, B)                         # (c, j, p, i, g)
            S = jnp.transpose(S, (1, 3, 2, 4, 0))                  # (j, i, p, g, c)
            return S.reshape(nb, nb, B * B, 2)

        if self.walkstep == "combine":
            out = jnp.concatenate([rearrange(s_blend), rearrange(s_an)], axis=2)
            return out.reshape(nb * nb * 2 * B * B, 2)
        elif self.walkstep == "one":
            # TODO(synk): analysis branch is still computed (unused) in this mode.
            return rearrange(s_blend).reshape(nb * nb * B * B, 2)
        else:  # "analysis"
            return rearrange(s_an).reshape(nb * nb * B * B, 2)

    def __call__(self, x):
        return self._forward(x)


# ----------------------------------------------------------------------------
# Pure-JAX reference (faithful transcription of the torch code) for checking.
# ----------------------------------------------------------------------------
def reference_forward(x, w_base, b_base, embed_w, embed_b, alpha, nb, walkstep):
    B = x.shape[0]
    count = FEAT_DIM // nb
    pooled = x.reshape(B, x.shape[1], -1).mean(axis=-1)
    f = jnp.maximum(pooled @ w_base + b_base, 0.0)                 # (B, 2048)
    eye = jnp.eye(B, dtype=jnp.float32)
    diag = jnp.eye(B, dtype=bool)
    scores, As, Aans = [], [], []
    for j in range(nb):
        fj = f[:, j * count:(j + 1) * count]
        d2 = (fj[:, None, :] - fj[None, :, :]) ** 2                # (B, B, count)
        G = jnp.einsum("pgd,dc->pgc", d2, embed_w[j]) + embed_b[j][0]
        scores.append(G)
        A_c, Aan_c = [], []
        for c in range(2):
            Gm = jnp.where(diag, -jnp.inf, G[:, :, c])
            A = jax.nn.softmax(Gm, axis=1)
            A_c.append(A)
            Aan_c.append((1.0 - alpha) * jnp.linalg.inv(eye - alpha * A))
        As.append(A_c)
        Aans.append(Aan_c)
    outs = []
    for j in range(nb):
        P = scores[j]
        for i in range(nb):
            sb = jnp.stack([alpha * P[:, :, c] @ As[i][c].T + (1 - alpha) * P[:, :, c]
                            for c in range(2)], axis=-1).reshape(-1, 2)
            sa = jnp.stack([P[:, :, c] @ Aans[i][c].T for c in range(2)],
                           axis=-1).reshape(-1, 2)
            if walkstep == "combine":
                outs.append(jnp.concatenate([sb, sa], axis=0))
            elif walkstep == "one":
                outs.append(sb)
            else:
                outs.append(sa)
    return jnp.concatenate(outs, axis=0)


if __name__ == "__main__":
    B, C, H, W = 8, 4, 16, 16
    num_branches = 4
    x = jax.random.normal(jax.random.PRNGKey(0), (B, C, H, W), dtype=jnp.float32)

    net = GSDRWLSNetPallas(batch=B, in_channels=C, hw=(H, W),
                           num_branches=num_branches, alpha=0.1, walkstep="combine")
    out = jax.block_until_ready(net(x))

    expected_rows = num_branches * num_branches * 2 * B * B        # combine: 2*B*B per pair
    assert out.shape == (expected_rows, 2), out.shape
    assert bool(jnp.all(jnp.isfinite(out)))

    ref = reference_forward(x, net.w_base, net.b_base, net.embed_w, net.embed_b,
                            net.alpha, num_branches, "combine")
    err = float(jnp.max(jnp.abs(out - ref)))
    assert err < 1e-4, f"max abs error vs reference: {err}"
    print("KERNEL_OK")
</pallas_src>

<mosaic_0001>
module attributes {stable_mosaic.version = 11 : i64} {
  func.func @fused_kernel(%arg0: i32, %arg1: memref<8x4x256xf32, #tpu.memory_space<vmem>>, %arg2: memref<4x4x512xf32, #tpu.memory_space<vmem>>, %arg3: memref<4x1x512xf32, #tpu.memory_space<vmem>>, %arg4: memref<1x4x512xf32, #tpu.memory_space<vmem>>, %arg5: memref<1x1x4xf32, #tpu.memory_space<vmem>>, %arg6: memref<1x32x32xf32, #tpu.memory_space<vmem>>, %arg7: memref<1x32x32xf32, #tpu.memory_space<vmem>>) attributes {dimension_semantics = [#tpu.dimension_semantics<parallel>], iteration_bounds = array<i64: 2>, scalar_prefetch = 0 : i64, scratch_operands = 0 : i64, tpu.core_type = #tpu.core_type<tc>, window_params = [{pipeline_mode = #tpu.pipeline_mode<synchronous>, transform_indices = @transform_0, window_bounds = array<i64: 8, 4, 256>}, {pipeline_mode = #tpu.pipeline_mode<synchronous>, transform_indices = @transform_1, window_bounds = array<i64: 4, 4, 512>}, {pipeline_mode = #tpu.pipeline_mode<synchronous>, transform_indices = @transform_2, window_bounds = array<i64: 4, 1, 512>}, {transform_indices = @transform_3, window_bounds = array<i64: 1, 4, 512>}, {transform_indices = @transform_4, window_bounds = array<i64: 1, 1, 4>}, {transform_indices = @transform_5, window_bounds = array<i64: 1, 32, 32>}, {transform_indices = @transform_6, window_bounds = array<i64: 1, 32, 32>}]} {
    %c0 = arith.constant 0 : index
    %c0_0 = arith.constant 0 : index
    %c0_1 = arith.constant 0 : index
    %0 = vector.load %arg1[%c0, %c0_0, %c0_1] : memref<8x4x256xf32, #tpu.memory_space<vmem>>, vector<8x4x256xf32>
    %cst = arith.constant dense<0.000000e+00> : vector<8x4xf32>
    %1 = vector.multi_reduction <add>, %0, %cst [2] : vector<8x4x256xf32> to vector<8x4xf32>
    %cst_2 = arith.constant 2.560000e+02 : f32
    %2 = vector.broadcast %cst_2 : f32 to vector<8x4xf32>
    %3 = arith.divf %1, %2 : vector<8x4xf32>
    %c0_3 = arith.constant 0 : index
    %c0_4 = arith.constant 0 : index
    %c0_5 = arith.constant 0 : index
    %4 = vector.load %arg4[%c0_3, %c0_4, %c0_5] : memref<1x4x512xf32, #tpu.memory_space<vmem>>, vector<1x4x512xf32>
    %5 = vector.shape_cast %4 : vector<1x4x512xf32> to vector<4x512xf32>
    %c0_6 = arith.constant 0 : index
    %c0_7 = arith.constant 0 : index
    %c0_8 = arith.constant 0 : index
    %6 = vector.load %arg5[%c0_6, %c0_7, %c0_8] : memref<1x1x4xf32, #tpu.memory_space<vmem>>, vector<1x1x4xf32>
    %7 = vector.shape_cast %6 : vector<1x1x4xf32> to vector<1x4xf32>
    %c0_9 = arith.constant 0 : index
    %c0_10 = arith.constant 0 : index
    %c0_11 = arith.constant 0 : index
    %8 = vector.load %arg2[%c0_9, %c0_10, %c0_11] : memref<4x4x512xf32, #tpu.memory_space<vmem>>, vector<1x4x512xf32>
    %9 = vector.shape_cast %8 : vector<1x4x512xf32> to vector<4x512xf32>
    %cst_12 = arith.constant dense<0.000000e+00> : vector<8x512xf32>
    %10 = tpu.matmul %3, %9, %cst_12 {dimension_numbers = #tpu.dot_dimension_numbers<[1], [0], [0], [1], [0, 0, 1, 1], [], []>, precision = #tpu.contract_precision<fp32>} : vector<8x4xf32>, vector<4x512xf32>, vector<8x512xf32> -> vector<8x512xf32>
    %c0_13 = arith.constant 0 : index
    %c0_14 = arith.constant 0 : index
    %c0_15 = arith.constant 0 : index
    %11 = vector.load %arg3[%c0_13, %c0_14, %c0_15] : memref<4x1x512xf32, #tpu.memory_space<vmem>>, vector<1x1x512xf32>
    %12 = vector.shape_cast %11 : vector<1x1x512xf32> to vector<1x512xf32>
    %13 = vector.broadcast %12 : vector<1x512xf32> to vector<8x512xf32>
    %14 = arith.addf %10, %13 : vector<8x512xf32>
    %cst_16 = arith.constant 0.000000e+00 : f32
    %15 = vector.broadcast %cst_16 : f32 to vector<8x512xf32>
    %16 = arith.maximumf %14, %15 : vector<8x512xf32>
    %17 = vector.extract_strided_slice %5 {offsets = [0, 0], sizes = [1, 512], strides = [1, 1]} : vector<4x512xf32> to vector<1x512xf32>
    %18 = arith.mulf %16, %16 : vector<8x512xf32>
    %19 = vector.broadcast %17 : vector<1x512xf32> to vector<8x512xf32>
    %20 = arith.mulf %16, %19 : vector<8x512xf32>
    %cst_17 = arith.constant dense<0.000000e+00> : vector<8x1xf32>
    %21 = tpu.matmul %18, %17, %cst_17 {dimension_numbers = #tpu.dot_dimension_numbers<[1], [1], [0], [0], [0, 0, 1, 0], [], []>, precision = #tpu.contract_precision<fp32>} : vector<8x512xf32>, vector<1x512xf32>, vector<8x1xf32> -> vector<8x1xf32>
    %cst_18 = arith.constant dense<0.000000e+00> : vector<1x8xf32>
    %22 = tpu.matmul %17, %18, %cst_18 {dimension_numbers = #tpu.dot_dimension_numbers<[1], [1], [0], [0], [0, 0, 1, 0], [], []>, precision = #tpu.contract_precision<fp32>} : vector<1x512xf32>, vector<8x512xf32>, vector<1x8xf32> -> vector<1x8xf32>
    %cst_19 = arith.constant dense<0.000000e+00> : vector<8x8xf32>
    %23 = tpu.matmul %20, %16, %cst_19 {dimension_numbers = #tpu.dot_dimension_numbers<[1], [1], [0], [0], [0, 0, 1, 0], [], []>, precision = #tpu.contract_precision<fp32>} : vector<8x512xf32>, vector<8x512xf32>, vector<8x8xf32> -> vector<8x8xf32>
    %24 = vector.broadcast %21 : vector<8x1xf32> to vector<8x8xf32>
    %25 = vector.broadcast %22 : vector<1x8xf32> to vector<8x8xf32>
    %26 = arith.addf %24, %25 : vector<8x8xf32>
    %cst_20 = arith.constant 2.000000e+00 : f32
    %27 = vector.broadcast %cst_20 : f32 to vector<8x8xf32>
    %28 = arith.mulf %27, %23 : vector<8x8xf32>
    %29 = arith.subf %26, %28 : vector<8x8xf32>
    %30 = vector.extract_strided_slice %7 {offsets = [0, 0], sizes = [1, 1], strides = [1, 1]} : vector<1x4xf32> to vector<1x1xf32>
    %31 = vector.broadcast %30 : vector<1x1xf32> to vector<8x8xf32>
    %32 = arith.addf %29, %31 : vector<8x8xf32>
    %33 = vector.shape_cast %32 : vector<8x8xf32> to vector<1x8x8xf32>
    %c1 = arith.constant 1 : index
    %c0_21 = arith.constant 0 : index
    %c0_22 = arith.constant 0 : index
    %34 = vector.load %arg2[%c1, %c0_21, %c0_22] : memref<4x4x512xf32, #tpu.memory_space<vmem>>, vector<1x4x512xf32>
    %35 = vector.shape_cast %34 : vector<1x4x512xf32> to vector<4x512xf32>
    %cst_23 = arith.constant dense<0.000000e+00> : vector<8x512xf32>
    %36 = tpu.matmul %3, %35, %cst_23 {dimension_numbers = #tpu.dot_dimension_numbers<[1], [0], [0], [1], [0, 0, 1, 1], [], []>, precision = #tpu.contract_precision<fp32>} : vector<8x4xf32>, vector<4x512xf32>, vector<8x512xf32> -> vector<8x512xf32>
    %c1_24 = arith.constant 1 : index
    %c0_25 = arith.constant 0 : index
    %c0_26 = arith.constant 0 : index
    %37 = vector.load %arg3[%c1_24, %c0_25, %c0_26] : memref<4x1x512xf32, #tpu.memory_space<vmem>>, vector<1x1x512xf32>
    %38 = vector.shape_cast %37 : vector<1x1x512xf32> to vector<1x512xf32>
    %39 = vector.broadcast %38 : vector<1x512xf32> to vector<8x512xf32>
    %40 = arith.addf %36, %39 : vector<8x512xf32>
    %cst_27 = arith.constant 0.000000e+00 : f32
    %41 = vector.broadcast %cst_27 : f32 to vector<8x512xf32>
    %42 = arith.maximumf %40, %41 : vector<8x512xf32>
    %43 = vector.extract_strided_slice %5 {offsets = [1, 0], sizes = [1, 512], strides = [1, 1]} : vector<4x512xf32> to vector<1x512xf32>
    %44 = arith.mulf %42, %42 : vector<8x512xf32>
    %45 = vector.broadcast %43 : vector<1x512xf32> to vector<8x512xf32>
    %46 = arith.mulf %42, %45 : vector<8x512xf32>
    %cst_28 = arith.constant dense<0.000000e+00> : vector<8x1xf32>
    %47 = tpu.matmul %44, %43, %cst_28 {dimension_numbers = #tpu.dot_dimension_numbers<[1], [1], [0], [0], [0, 0, 1, 0], [], []>, precision = #tpu.contract_precision<fp32>} : vector<8x512xf32>, vector<1x512xf32>, vector<8x1xf32> -> vector<8x1xf32>
    %cst_29 = arith.constant dense<0.000000e+00> : vector<1x8xf32>
    %48 = tpu.matmul %43, %44, %cst_29 {dimension_numbers = #tpu.dot_dimension_numbers<[1], [1], [0], [0], [0, 0, 1, 0], [], []>, precision = #tpu.contract_precision<fp32>} : vector<1x512xf32>, vector<8x512xf32>, vector<1x8xf32> -> vector<1x8xf32>
    %cst_30 = arith.constant dense<0.000000e+00> : vector<8x8xf32>
    %49 = tpu.matmul %46, %42, %cst_30 {dimension_numbers = #tpu.dot_dimension_numbers<[1], [1], [0], [0], [0, 0, 1, 0], [], []>, precision = #tpu.contract_precision<fp32>} : vector<8x512xf32>, vector<8x512xf32>, vector<8x8xf32> -> vector<8x8xf32>
    %50 = vector.broadcast %47 : vector<8x1xf32> to vector<8x8xf32>
    %51 = vector.broadcast %48 : vector<1x8xf32> to vector<8x8xf32>
    %52 = arith.addf %50, %51 : vector<8x8xf32>
    %cst_31 = arith.constant 2.000000e+00 : f32
    %53 = vector.broadcast %cst_31 : f32 to vector<8x8xf32>
    %54 = arith.mulf %53, %49 : vector<8x8xf32>
    %55 = arith.subf %52, %54 : vector<8x8xf32>
    %56 = vector.extract_strided_slice %7 {offsets = [0, 1], sizes = [1, 1], strides = [1, 1]} : vector<1x4xf32> to vector<1x1xf32>
    %57 = vector.broadcast %56 : vector<1x1xf32> to vector<8x8xf32>
    %58 = arith.addf %55, %57 : vector<8x8xf32>
    %59 = vector.shape_cast %58 : vector<8x8xf32> to vector<1x8x8xf32>
    %c2 = arith.constant 2 : index
    %c0_32 = arith.constant 0 : index
    %c0_33 = arith.constant 0 : index
    %60 = vector.load %arg2[%c2, %c0_32, %c0_33] : memref<4x4x512xf32, #tpu.memory_space<vmem>>, vector<1x4x512xf32>
    %61 = vector.shape_cast %60 : vector<1x4x512xf32> to vector<4x512xf32>
    %cst_34 = arith.constant dense<0.000000e+00> : vector<8x512xf32>
    %62 = tpu.matmul %3, %61, %cst_34 {dimension_numbers = #tpu.dot_dimension_numbers<[1], [0], [0], [1], [0, 0, 1, 1], [], []>, precision = #tpu.contract_precision<fp32>} : vector<8x4xf32>, vector<4x512xf32>, vector<8x512xf32> -> vector<8x512xf32>
    %c2_35 = arith.constant 2 : index
    %c0_36 = arith.constant 0 : index
    %c0_37 = arith.constant 0 : index
    %63 = vector.load %arg3[%c2_35, %c0_36, %c0_37] : memref<4x1x512xf32, #tpu.memory_space<vmem>>, vector<1x1x512xf32>
    %64 = vector.shape_cast %63 : vector<1x1x512xf32> to vector<1x512xf32>
    %65 = vector.broadcast %64 : vector<1x512xf32> to vector<8x512xf32>
    %66 = arith.addf %62, %65 : vector<8x512xf32>
    %cst_38 = arith.constant 0.000000e+00 : f32
    %67 = vector.broadcast %cst_38 : f32 to vector<8x512xf32>
    %68 = arith.maximumf %66, %67 : vector<8x512xf32>
    %69 = vector.extract_strided_slice %5 {offsets = [2, 0], sizes = [1, 512], strides = [1, 1]} : vector<4x512xf32> to vector<1x512xf32>
    %70 = arith.mulf %68, %68 : vector<8x512xf32>
    %71 = vector.broadcast %69 : vector<1x512xf32> to vector<8x512xf32>
    %72 = arith.mulf %68, %71 : vector<8x512xf32>
    %cst_39 = arith.constant dense<0.000000e+00> : vector<8x1xf32>
    %73 = tpu.matmul %70, %69, %cst_39 {dimension_numbers = #tpu.dot_dimension_numbers<[1], [1], [0], [0], [0, 0, 1, 0], [], []>, precision = #tpu.contract_precision<fp32>} : vector<8x512xf32>, vector<1x512xf32>, vector<8x1xf32> -> vector<8x1xf32>
    %cst_40 = arith.constant dense<0.000000e+00> : vector<1x8xf32>
    %74 = tpu.matmul %69, %70, %cst_40 {dimension_numbers = #tpu.dot_dimension_numbers<[1], [1], [0], [0], [0, 0, 1, 0], [], []>, precision = #tpu.contract_precision<fp32>} : vector<1x512xf32>, vector<8x512xf32>, vector<1x8xf32> -> vector<1x8xf32>
    %cst_41 = arith.constant dense<0.000000e+00> : vector<8x8xf32>
    %75 = tpu.matmul %72, %68, %cst_41 {dimension_numbers = #tpu.dot_dimension_numbers<[1], [1], [0], [0], [0, 0, 1, 0], [], []>, precision = #tpu.contract_precision<fp32>} : vector<8x512xf32>, vector<8x512xf32>, vector<8x8xf32> -> vector<8x8xf32>
    %76 = vector.broadcast %73 : vector<8x1xf32> to vector<8x8xf32>
    %77 = vector.broadcast %74 : vector<1x8xf32> to vector<8x8xf32>
    %78 = arith.addf %76, %77 : vector<8x8xf32>
    %cst_42 = arith.constant 2.000000e+00 : f32
    %79 = vector.broadcast %cst_42 : f32 to vector<8x8xf32>
    %80 = arith.mulf %79, %75 : vector<8x8xf32>
    %81 = arith.subf %78, %80 : vector<8x8xf32>
    %82 = vector.extract_strided_slice %7 {offsets = [0, 2], sizes = [1, 1], strides = [1, 1]} : vector<1x4xf32> to vector<1x1xf32>
    %83 = vector.broadcast %82 : vector<1x1xf32> to vector<8x8xf32>
    %84 = arith.addf %81, %83 : vector<8x8xf32>
    %85 = vector.shape_cast %84 : vector<8x8xf32> to vector<1x8x8xf32>
    %c3 = arith.constant 3 : index
    %c0_43 = arith.constant 0 : index
    %c0_44 = arith.constant 0 : index
    %86 = vector.load %arg2[%c3, %c0_43, %c0_44] : memref<4x4x512xf32, #tpu.memory_space<vmem>>, vector<1x4x512xf32>
    %87 = vector.shape_cast %86 : vector<1x4x512xf32> to vector<4x512xf32>
    %cst_45 = arith.constant dense<0.000000e+00> : vector<8x512xf32>
    %88 = tpu.matmul %3, %87, %cst_45 {dimension_numbers = #tpu.dot_dimension_numbers<[1], [0], [0], [1], [0, 0, 1, 1], [], []>, precision = #tpu.contract_precision<fp32>} : vector<8x4xf32>, vector<4x512xf32>, vector<8x512xf32> -> vector<8x512xf32>
    %c3_46 = arith.constant 3 : index
    %c0_47 = arith.constant 0 : index
    %c0_48 = arith.constant 0 : index
    %89 = vector.load %arg3[%c3_46, %c0_47, %c0_48] : memref<4x1x512xf32, #tpu.memory_space<vmem>>, vector<1x1x512xf32>
    %90 = vector.shape_cast %89 : vector<1x1x512xf32> to vector<1x512xf32>
    %91 = vector.broadcast %90 : vector<1x512xf32> to vector<8x512xf32>
    %92 = arith.addf %88, %91 : vector<8x512xf32>
    %cst_49 = arith.constant 0.000000e+00 : f32
    %93 = vector.broadcast %cst_49 : f32 to vector<8x512xf32>
    %94 = arith.maximumf %92, %93 : vector<8x512xf32>
    %95 = vector.extract_strided_slice %5 {offsets = [3, 0], sizes = [1, 512], strides = [1, 1]} : vector<4x512xf32> to vector<1x512xf32>
    %96 = arith.mulf %94, %94 : vector<8x512xf32>
    %97 = vector.broadcast %95 : vector<1x512xf32> to vector<8x512xf32>
    %98 = arith.mulf %94, %97 : vector<8x512xf32>
    %cst_50 = arith.constant dense<0.000000e+00> : vector<8x1xf32>
    %99 = tpu.matmul %96, %95, %cst_50 {dimension_numbers = #tpu.dot_dimension_numbers<[1], [1], [0], [0], [0, 0, 1, 0], [], []>, precision = #tpu.contract_precision<fp32>} : vector<8x512xf32>, vector<1x512xf32>, vector<8x1xf32> -> vector<8x1xf32>
    %cst_51 = arith.constant dense<0.000000e+00> : vector<1x8xf32>
    %100 = tpu.matmul %95, %96, %cst_51 {dimension_numbers = #tpu.dot_dimension_numbers<[1], [1], [0], [0], [0, 0, 1, 0], [], []>, precision = #tpu.contract_precision<fp32>} : vector<1x512xf32>, vector<8x512xf32>, vector<1x8xf32> -> vector<1x8xf32>
    %cst_52 = arith.constant dense<0.000000e+00> : vector<8x8xf32>
    %101 = tpu.matmul %98, %94, %cst_52 {dimension_numbers = #tpu.dot_dimension_numbers<[1], [1], [0], [0], [0, 0, 1, 0], [], []>, precision = #tpu.contract_precision<fp32>} : vector<8x512xf32>, vector<8x512xf32>, vector<8x8xf32> -> vector<8x8xf32>
    %102 = vector.broadcast %99 : vector<8x1xf32> to vector<8x8xf32>
    %103 = vector.broadcast %100 : vector<1x8xf32> to vector<8x8xf32>
    %104 = arith.addf %102, %103 : vector<8x8xf32>
    %cst_53 = arith.constant 2.000000e+00 : f32
    %105 = vector.broadcast %cst_53 : f32 to vector<8x8xf32>
    %106 = arith.mulf %105, %101 : vector<8x8xf32>
    %107 = arith.subf %104, %106 : vector<8x8xf32>
    %108 = vector.extract_strided_slice %7 {offsets = [0, 3], sizes = [1, 1], strides = [1, 1]} : vector<1x4xf32> to vector<1x1xf32>
    %109 = vector.broadcast %108 : vector<1x1xf32> to vector<8x8xf32>
    %110 = arith.addf %107, %109 : vector<8x8xf32>
    %111 = vector.shape_cast %110 : vector<8x8xf32> to vector<1x8x8xf32>
    %112 = tpu.concatenate %33, %59, %85, %111 in 0 : vector<1x8x8xf32>, vector<1x8x8xf32>, vector<1x8x8xf32>, vector<1x8x8xf32> -> vector<4x8x8xf32>
    %113 = tpu.iota {dimensions = array<i32: 0>} : vector<8x8xi32>
    %114 = tpu.iota {dimensions = array<i32: 1>} : vector<8x8xi32>
    %115 = arith.cmpi eq, %113, %114 : vector<8x8xi32>
    %116 = vector.shape_cast %115 : vector<8x8xi1> to vector<1x8x8xi1>
    %cst_54 = arith.constant -1.000000e+30 : f32
    %117 = vector.shape_cast %116 : vector<1x8x8xi1> to vector<1x8x8xi1>
    %118 = vector.broadcast %117 : vector<1x8x8xi1> to vector<4x8x8xi1>
    %119 = vector.broadcast %cst_54 : f32 to vector<4x8x8xf32>
    %120 = arith.select %118, %119, %112 : vector<4x8x8xi1>, vector<4x8x8xf32>
    %cst_55 = arith.constant dense<0xFF800000> : vector<4x8xf32>
    %121 = vector.multi_reduction <maximumf>, %120, %cst_55 [2] : vector<4x8x8xf32> to vector<4x8xf32>
    %122 = vector.shape_cast %121 : vector<4x8xf32> to vector<4x8x1xf32>
    %123 = vector.shape_cast %115 : vector<8x8xi1> to vector<1x8x8xi1>
    %124 = vector.broadcast %122 : vector<4x8x1xf32> to vector<4x8x8xf32>
    %125 = arith.subf %120, %124 : vector<4x8x8xf32>
    %126 = math.exp %125 : vector<4x8x8xf32>
    %cst_56 = arith.constant 0.000000e+00 : f32
    %127 = vector.shape_cast %123 : vector<1x8x8xi1> to vector<1x8x8xi1>
    %128 = vector.broadcast %127 : vector<1x8x8xi1> to vector<4x8x8xi1>
    %129 = vector.broadcast %cst_56 : f32 to vector<4x8x8xf32>
    %130 = arith.select %128, %129, %126 : vector<4x8x8xi1>, vector<4x8x8xf32>
    %cst_57 = arith.constant dense<0.000000e+00> : vector<4x8xf32>
    %131 = vector.multi_reduction <add>, %130, %cst_57 [2] : vector<4x8x8xf32> to vector<4x8xf32>
    %132 = vector.shape_cast %131 : vector<4x8xf32> to vector<4x8x1xf32>
    %133 = vector.broadcast %132 : vector<4x8x1xf32> to vector<4x8x8xf32>
    %134 = arith.divf %130, %133 : vector<4x8x8xf32>
    %cst_58 = arith.constant 1.000000e+00 : f32
    %cst_59 = arith.constant 0.000000e+00 : f32
    %135 = vector.broadcast %cst_58 : f32 to vector<8x8xf32>
    %136 = vector.broadcast %cst_59 : f32 to vector<8x8xf32>
    %137 = arith.select %115, %135, %136 : vector<8x8xi1>, vector<8x8xf32>
    %138 = vector.shape_cast %137 : vector<8x8xf32> to vector<1x8x8xf32>
    %139 = vector.shape_cast %138 : vector<1x8x8xf32> to vector<1x8x8xf32>
    %140 = vector.broadcast %139 : vector<1x8x8xf32> to vector<4x8x8xf32>
    %cst_60 = arith.constant 1.000000e-01 : f32
    %141 = vector.broadcast %cst_60 : f32 to vector<4x8x8xf32>
    %142 = arith.mulf %141, %134 : vector<4x8x8xf32>
    %143 = arith.subf %140, %142 : vector<4x8x8xf32>
    %144 = tpu.concatenate %143, %140 in 2 : vector<4x8x8xf32>, vector<4x8x8xf32> -> vector<4x8x16xf32>
    %145 = tpu.iota {dimensions = array<i32: 1>} : vector<4x8x1xi32>
    %146 = vector.extract_strided_slice %144 {offsets = [0, 0, 0], sizes = [4, 1, 1], strides = [1, 1, 1]} : vector<4x8x16xf32> to vector<4x1x1xf32>
    %147 = vector.extract_strided_slice %144 {offsets = [0, 0, 0], sizes = [4, 1, 16], strides = [1, 1, 1]} : vector<4x8x16xf32> to vector<4x1x16xf32>
    %cst_61 = arith.constant 1.000000e+00 : f32
    %148 = vector.broadcast %cst_61 : f32 to vector<4x1x1xf32>
    %149 = arith.divf %148, %146 : vector<4x1x1xf32>
    %150 = vector.broadcast %149 : vector<4x1x1xf32> to vector<4x1x16xf32>
    %151 = arith.mulf %147, %150 : vector<4x1x16xf32>
    %152 = vector.extract_strided_slice %144 {offsets = [0, 0, 0], sizes = [4, 8, 1], strides = [1, 1, 1]} : vector<4x8x16xf32> to vector<4x8x1xf32>
    %c0_i32 = arith.constant 0 : i32
    %153 = vector.broadcast %c0_i32 : i32 to vector<4x8x1xi32>
    %154 = arith.cmpi eq, %145, %153 : vector<4x8x1xi32>
    %cst_62 = arith.constant 1.000000e+00 : f32
    %155 = vector.broadcast %cst_62 : f32 to vector<4x1x1xf32>
    %156 = arith.subf %146, %155 : vector<4x1x1xf32>
    %157 = vector.shape_cast %156 : vector<4x1x1xf32> to vector<4x1x1xf32>
    %158 = vector.broadcast %157 : vector<4x1x1xf32> to vector<4x8x1xf32>
    %159 = arith.select %154, %158, %152 : vector<4x8x1xi1>, vector<4x8x1xf32>
    %160 = vector.broadcast %159 : vector<4x8x1xf32> to vector<4x8x16xf32>
    %161 = vector.broadcast %151 : vector<4x1x16xf32> to vector<4x8x16xf32>
    %162 = arith.mulf %160, %161 : vector<4x8x16xf32>
    %163 = arith.subf %144, %162 : vector<4x8x16xf32>
    %164 = vector.extract_strided_slice %163 {offsets = [0, 1, 1], sizes = [4, 1, 1], strides = [1, 1, 1]} : vector<4x8x16xf32> to vector<4x1x1xf32>
    %165 = vector.extract_strided_slice %163 {offsets = [0, 1, 0], sizes = [4, 1, 16], strides = [1, 1, 1]} : vector<4x8x16xf32> to vector<4x1x16xf32>
    %cst_63 = arith.constant 1.000000e+00 : f32
    %166 = vector.broadcast %cst_63 : f32 to vector<4x1x1xf32>
    %167 = arith.divf %166, %164 : vector<4x1x1xf32>
    %168 = vector.broadcast %167 : vector<4x1x1xf32> to vector<4x1x16xf32>
    %169 = arith.mulf %165, %168 : vector<4x1x16xf32>
    %170 = vector.extract_strided_slice %163 {offsets = [0, 0, 1], sizes = [4, 8, 1], strides = [1, 1, 1]} : vector<4x8x16xf32> to vector<4x8x1xf32>
    %c1_i32 = arith.constant 1 : i32
    %171 = vector.broadcast %c1_i32 : i32 to vector<4x8x1xi32>
    %172 = arith.cmpi eq, %145, %171 : vector<4x8x1xi32>
    %cst_64 = arith.constant 1.000000e+00 : f32
    %173 = vector.broadcast %cst_64 : f32 to vector<4x1x1xf32>
    %174 = arith.subf %164, %173 : vector<4x1x1xf32>
    %175 = vector.shape_cast %174 : vector<4x1x1xf32> to vector<4x1x1xf32>
    %176 = vector.broadcast %175 : vector<4x1x1xf32> to vector<4x8x1xf32>
    %177 = arith.select %172, %176, %170 : vector<4x8x1xi1>, vector<4x8x1xf32>
    %178 = vector.broadcast %177 : vector<4x8x1xf32> to vector<4x8x16xf32>
    %179 = vector.broadcast %169 : vector<4x1x16xf32> to vector<4x8x16xf32>
    %180 = arith.mulf %178, %179 : vector<4x8x16xf32>
    %181 = arith.subf %163, %180 : vector<4x8x16xf32>
    %182 = vector.extract_strided_slice %181 {offsets = [0, 2, 2], sizes = [4, 1, 1], strides = [1, 1, 1]} : vector<4x8x16xf32> to vector<4x1x1xf32>
    %183 = vector.extract_strided_slice %181 {offsets = [0, 2, 0], sizes = [4, 1, 16], strides = [1, 1, 1]} : vector<4x8x16xf32> to vector<4x1x16xf32>
    %cst_65 = arith.constant 1.000000e+00 : f32
    %184 = vector.broadcast %cst_65 : f32 to vector<4x1x1xf32>
    %185 = arith.divf %184, %182 : vector<4x1x1xf32>
    %186 = vector.broadcast %185 : vector<4x1x1xf32> to vector<4x1x16xf32>
    %187 = arith.mulf %183, %186 : vector<4x1x16xf32>
    %188 = vector.extract_strided_slice %181 {offsets = [0, 0, 2], sizes = [4, 8, 1], strides = [1, 1, 1]} : vector<4x8x16xf32> to vector<4x8x1xf32>
    %c2_i32 = arith.constant 2 : i32
    %189 = vector.broadcast %c2_i32 : i32 to vector<4x8x1xi32>
    %190 = arith.cmpi eq, %145, %189 : vector<4x8x1xi32>
    %cst_66 = arith.constant 1.000000e+00 : f32
    %191 = vector.broadcast %cst_66 : f32 to vector<4x1x1xf32>
    %192 = arith.subf %182, %191 : vector<4x1x1xf32>
    %193 = vector.shape_cast %192 : vector<4x1x1xf32> to vector<4x1x1xf32>
    %194 = vector.broadcast %193 : vector<4x1x1xf32> to vector<4x8x1xf32>
    %195 = arith.select %190, %194, %188 : vector<4x8x1xi1>, vector<4x8x1xf32>
    %196 = vector.broadcast %195 : vector<4x8x1xf32> to vector<4x8x16xf32>
    %197 = vector.broadcast %187 : vector<4x1x16xf32> to vector<4x8x16xf32>
    %198 = arith.mulf %196, %197 : vector<4x8x16xf32>
    %199 = arith.subf %181, %198 : vector<4x8x16xf32>
    %200 = vector.extract_strided_slice %199 {offsets = [0, 3, 3], sizes = [4, 1, 1], strides = [1, 1, 1]} : vector<4x8x16xf32> to vector<4x1x1xf32>
    %201 = vector.extract_strided_slice %199 {offsets = [0, 3, 0], sizes = [4, 1, 16], strides = [1, 1, 1]} : vector<4x8x16xf32> to vector<4x1x16xf32>
    %cst_67 = arith.constant 1.000000e+00 : f32
    %202 = vector.broadcast %cst_67 : f32 to vector<4x1x1xf32>
    %203 = arith.divf %202, %200 : vector<4x1x1xf32>
    %204 = vector.broadcast %203 : vector<4x1x1xf32> to vector<4x1x16xf32>
    %205 = arith.mulf %201, %204 : vector<4x1x16xf32>
    %206 = vector.extract_strided_slice %199 {offsets = [0, 0, 3], sizes = [4, 8, 1], strides = [1, 1, 1]} : vector<4x8x16xf32> to vector<4x8x1xf32>
    %c3_i32 = arith.constant 3 : i32
    %207 = vector.broadcast %c3_i32 : i32 to vector<4x8x1xi32>
    %208 = arith.cmpi eq, %145, %207 : vector<4x8x1xi32>
    %cst_68 = arith.constant 1.000000e+00 : f32
    %209 = vector.broadcast %cst_68 : f32 to vector<4x1x1xf32>
    %210 = arith.subf %200, %209 : vector<4x1x1xf32>
    %211 = vector.shape_cast %210 : vector<4x1x1xf32> to vector<4x1x1xf32>
    %212 = vector.broadcast %211 : vector<4x1x1xf32> to vector<4x8x1xf32>
    %213 = arith.select %208, %212, %206 : vector<4x8x1xi1>, vector<4x8x1xf32>
    %214 = vector.broadcast %213 : vector<4x8x1xf32> to vector<4x8x16xf32>
    %215 = vector.broadcast %205 : vector<4x1x16xf32> to vector<4x8x16xf32>
    %216 = arith.mulf %214, %215 : vector<4x8x16xf32>
    %217 = arith.subf %199, %216 : vector<4x8x16xf32>
    %218 = vector.extract_strided_slice %217 {offsets = [0, 4, 4], sizes = [4, 1, 1], strides = [1, 1, 1]} : vector<4x8x16xf32> to vector<4x1x1xf32>
    %219 = vector.extract_strided_slice %217 {offsets = [0, 4, 0], sizes = [4, 1, 16], strides = [1, 1, 1]} : vector<4x8x16xf32> to vector<4x1x16xf32>
    %cst_69 = arith.constant 1.000000e+00 : f32
    %220 = vector.broadcast %cst_69 : f32 to vector<4x1x1xf32>
    %221 = arith.divf %220, %218 : vector<4x1x1xf32>
    %222 = vector.broadcast %221 : vector<4x1x1xf32> to vector<4x1x16xf32>
    %223 = arith.mulf %219, %222 : vector<4x1x16xf32>
    %224 = vector.extract_strided_slice %217 {offsets = [0, 0, 4], sizes = [4, 8, 1], strides = [1, 1, 1]} : vector<4x8x16xf32> to vector<4x8x1xf32>
    %c4_i32 = arith.constant 4 : i32
    %225 = vector.broadcast %c4_i32 : i32 to vector<4x8x1xi32>
    %226 = arith.cmpi eq, %145, %225 : vector<4x8x1xi32>
    %cst_70 = arith.constant 1.000000e+00 : f32
    %227 = vector.broadcast %cst_70 : f32 to vector<4x1x1xf32>
    %228 = arith.subf %218, %227 : vector<4x1x1xf32>
    %229 = vector.shape_cast %228 : vector<4x1x1xf32> to vector<4x1x1xf32>
    %230 = vector.broadcast %229 : vector<4x1x1xf32> to vector<4x8x1xf32>
    %231 = arith.select %226, %230, %224 : vector<4x8x1xi1>, vector<4x8x1xf32>
    %232 = vector.broadcast %231 : vector<4x8x1xf32> to vector<4x8x16xf32>
    %233 = vector.broadcast %223 : vector<4x1x16xf32> to vector<4x8x16xf32>
    %234 = arith.mulf %232, %233 : vector<4x8x16xf32>
    %235 = arith.subf %217, %234 : vector<4x8x16xf32>
    %236 = vector.extract_strided_slice %235 {offsets = [0, 5, 5], sizes = [4, 1, 1], strides = [1, 1, 1]} : vector<4x8x16xf32> to vector<4x1x1xf32>
    %237 = vector.extract_strided_slice %235 {offsets = [0, 5, 0], sizes = [4, 1, 16], strides = [1, 1, 1]} : vector<4x8x16xf32> to vector<4x1x16xf32>
    %cst_71 = arith.constant 1.000000e+00 : f32
    %238 = vector.broadcast %cst_71 : f32 to vector<4x1x1xf32>
    %239 = arith.divf %238, %236 : vector<4x1x1xf32>
    %240 = vector.broadcast %239 : vector<4x1x1xf32> to vector<4x1x16xf32>
    %241 = arith.mulf %237, %240 : vector<4x1x16xf32>
    %242 = vector.extract_strided_slice %235 {offsets = [0, 0, 5], sizes = [4, 8, 1], strides = [1, 1, 1]} : vector<4x8x16xf32> to vector<4x8x1xf32>
    %c5_i32 = arith.constant 5 : i32
    %243 = vector.broadcast %c5_i32 : i32 to vector<4x8x1xi32>
    %244 = arith.cmpi eq, %145, %243 : vector<4x8x1xi32>
    %cst_72 = arith.constant 1.000000e+00 : f32
    %245 = vector.broadcast %cst_72 : f32 to vector<4x1x1xf32>
    %246 = arith.subf %236, %245 : vector<4x1x1xf32>
    %247 = vector.shape_cast %246 : vector<4x1x1xf32> to vector<4x1x1xf32>
    %248 = vector.broadcast %247 : vector<4x1x1xf32> to vector<4x8x1xf32>
    %249 = arith.select %244, %248, %242 : vector<4x8x1xi1>, vector<4x8x1xf32>
    %250 = vector.broadcast %249 : vector<4x8x1xf32> to vector<4x8x16xf32>
    %251 = vector.broadcast %241 : vector<4x1x16xf32> to vector<4x8x16xf32>
    %252 = arith.mulf %250, %251 : vector<4x8x16xf32>
    %253 = arith.subf %235, %252 : vector<4x8x16xf32>
    %254 = vector.extract_strided_slice %253 {offsets = [0, 6, 6], sizes = [4, 1, 1], strides = [1, 1, 1]} : vector<4x8x16xf32> to vector<4x1x1xf32>
    %255 = vector.extract_strided_slice %253 {offsets = [0, 6, 0], sizes = [4, 1, 16], strides = [1, 1, 1]} : vector<4x8x16xf32> to vector<4x1x16xf32>
    %cst_73 = arith.constant 1.000000e+00 : f32
    %256 = vector.broadcast %cst_73 : f32 to vector<4x1x1xf32>
    %257 = arith.divf %256, %254 : vector<4x1x1xf32>
    %258 = vector.broadcast %257 : vector<4x1x1xf32> to vector<4x1x16xf32>
    %259 = arith.mulf %255, %258 : vector<4x1x16xf32>
    %260 = vector.extract_strided_slice %253 {offsets = [0, 0, 6], sizes = [4, 8, 1], strides = [1, 1, 1]} : vector<4x8x16xf32> to vector<4x8x1xf32>
    %c6_i32 = arith.constant 6 : i32
    %261 = vector.broadcast %c6_i32 : i32 to vector<4x8x1xi32>
    %262 = arith.cmpi eq, %145, %261 : vector<4x8x1xi32>
    %cst_74 = arith.constant 1.000000e+00 : f32
    %263 = vector.broadcast %cst_74 : f32 to vector<4x1x1xf32>
    %264 = arith.subf %254, %263 : vector<4x1x1xf32>
    %265 = vector.shape_cast %264 : vector<4x1x1xf32> to vector<4x1x1xf32>
    %266 = vector.broadcast %265 : vector<4x1x1xf32> to vector<4x8x1xf32>
    %267 = arith.select %262, %266, %260 : vector<4x8x1xi1>, vector<4x8x1xf32>
    %268 = vector.broadcast %267 : vector<4x8x1xf32> to vector<4x8x16xf32>
    %269 = vector.broadcast %259 : vector<4x1x16xf32> to vector<4x8x16xf32>
    %270 = arith.mulf %268, %269 : vector<4x8x16xf32>
    %271 = arith.subf %253, %270 : vector<4x8x16xf32>
    %272 = vector.extract_strided_slice %271 {offsets = [0, 7, 7], sizes = [4, 1, 1], strides = [1, 1, 1]} : vector<4x8x16xf32> to vector<4x1x1xf32>
    %273 = vector.extract_strided_slice %271 {offsets = [0, 7, 0], sizes = [4, 1, 16], strides = [1, 1, 1]} : vector<4x8x16xf32> to vector<4x1x16xf32>
    %cst_75 = arith.constant 1.000000e+00 : f32
    %274 = vector.broadcast %cst_75 : f32 to vector<4x1x1xf32>
    %275 = arith.divf %274, %272 : vector<4x1x1xf32>
    %276 = vector.broadcast %275 : vector<4x1x1xf32> to vector<4x1x16xf32>
    %277 = arith.mulf %273, %276 : vector<4x1x16xf32>
    %278 = vector.extract_strided_slice %271 {offsets = [0, 0, 7], sizes = [4, 8, 1], strides = [1, 1, 1]} : vector<4x8x16xf32> to vector<4x8x1xf32>
    %c7_i32 = arith.constant 7 : i32
    %279 = vector.broadcast %c7_i32 : i32 to vector<4x8x1xi32>
    %280 = arith.cmpi eq, %145, %279 : vector<4x8x1xi32>
    %cst_76 = arith.constant 1.000000e+00 : f32
    %281 = vector.broadcast %cst_76 : f32 to vector<4x1x1xf32>
    %282 = arith.subf %272, %281 : vector<4x1x1xf32>
    %283 = vector.shape_cast %282 : vector<4x1x1xf32> to vector<4x1x1xf32>
    %284 = vector.broadcast %283 : vector<4x1x1xf32> to vector<4x8x1xf32>
    %285 = arith.select %280, %284, %278 : vector<4x8x1xi1>, vector<4x8x1xf32>
    %286 = vector.broadcast %285 : vector<4x8x1xf32> to vector<4x8x16xf32>
    %287 = vector.broadcast %277 : vector<4x1x16xf32> to vector<4x8x16xf32>
    %288 = arith.mulf %286, %287 : vector<4x8x16xf32>
    %289 = arith.subf %271, %288 : vector<4x8x16xf32>
    %290 = vector.extract_strided_slice %289 {offsets = [0, 0, 8], sizes = [4, 8, 8], strides = [1, 1, 1]} : vector<4x8x16xf32> to vector<4x8x8xf32>
    %cst_77 = arith.constant 0.899999976 : f32
    %291 = vector.broadcast %cst_77 : f32 to vector<4x8x8xf32>
    %292 = arith.mulf %291, %290 : vector<4x8x8xf32>
    %293 = vector.shape_cast %112 : vector<4x8x8xf32> to vector<32x8xf32>
    %294 = vector.shape_cast %134 : vector<4x8x8xf32> to vector<32x8xf32>
    %295 = vector.shape_cast %292 : vector<4x8x8xf32> to vector<32x8xf32>
    %cst_78 = arith.constant dense<0.000000e+00> : vector<32x32xf32>
    %296 = tpu.matmul %293, %294, %cst_78 {dimension_numbers = #tpu.dot_dimension_numbers<[1], [1], [0], [0], [0, 0, 1, 0], [], []>, precision = #tpu.contract_precision<fp32>} : vector<32x8xf32>, vector<32x8xf32>, vector<32x32xf32> -> vector<32x32xf32>
    %cst_79 = arith.constant dense<0.000000e+00> : vector<32x32xf32>
    %297 = tpu.matmul %293, %295, %cst_79 {dimension_numbers = #tpu.dot_dimension_numbers<[1], [1], [0], [0], [0, 0, 1, 0], [], []>, precision = #tpu.contract_precision<fp32>} : vector<32x8xf32>, vector<32x8xf32>, vector<32x32xf32> -> vector<32x32xf32>
    %298 = tpu.concatenate %293, %293, %293, %293 in 1 : vector<32x8xf32>, vector<32x8xf32>, vector<32x8xf32>, vector<32x8xf32> -> vector<32x32xf32>
    %cst_80 = arith.constant 1.000000e-01 : f32
    %299 = vector.broadcast %cst_80 : f32 to vector<32x32xf32>
    %300 = arith.mulf %299, %296 : vector<32x32xf32>
    %cst_81 = arith.constant 0.899999976 : f32
    %301 = vector.broadcast %cst_81 : f32 to vector<32x32xf32>
    %302 = arith.mulf %301, %298 : vector<32x32xf32>
    %303 = arith.addf %300, %302 : vector<32x32xf32>
    %c0_82 = arith.constant 0 : index
    %c0_83 = arith.constant 0 : index
    %c0_84 = arith.constant 0 : index
    %304 = vector.load %arg6[%c0_82, %c0_83, %c0_84] : memref<1x32x32xf32, #tpu.memory_space<vmem>>, vector<1x32x32xf32>
    %305 = vector.shape_cast %304 : vector<1x32x32xf32> to vector<32x32xf32>
    %306 = vector.shape_cast %303 : vector<32x32xf32> to vector<1x32x32xf32>
    tpu.vector_store %arg6[%c0_82, %c0_83, %c0_84], %306 {strides = array<i32>} : memref<1x32x32xf32, #tpu.memory_space<vmem>>, vector<1x32x32xf32>,
    %c0_85 = arith.constant 0 : index
    %c0_86 = arith.constant 0 : index
    %c0_87 = arith.constant 0 : index
    %307 = vector.load %arg7[%c0_85, %c0_86, %c0_87] : memref<1x32x32xf32, #tpu.memory_space<vmem>>, vector<1x32x32xf32>
    %308 = vector.shape_cast %307 : vector<1x32x32xf32> to vector<32x32xf32>
    %309 = vector.shape_cast %297 : vector<32x32xf32> to vector<1x32x32xf32>
    tpu.vector_store %arg7[%c0_85, %c0_86, %c0_87], %309 {strides = array<i32>} : memref<1x32x32xf32, #tpu.memory_space<vmem>>, vector<1x32x32xf32>,
    return
  }
  func.func @transform_0(%arg0: i32) -> (i32, i32, i32) {
    %c0_i32 = arith.constant 0 : i32
    %c0_i32_0 = arith.constant 0 : i32
    %c0_i32_1 = arith.constant 0 : i32
    %c0_i32_2 = arith.constant 0 : i32
    return %c0_i32, %c0_i32_0, %c0_i32_1 : i32, i32, i32
  }
  func.func @transform_1(%arg0: i32) -> (i32, i32, i32) {
    %c0_i32 = arith.constant 0 : i32
    %c0_i32_0 = arith.constant 0 : i32
    %c0_i32_1 = arith.constant 0 : i32
    %c0_i32_2 = arith.constant 0 : i32
    return %c0_i32, %c0_i32_0, %c0_i32_1 : i32, i32, i32
  }
  func.func @transform_2(%arg0: i32) -> (i32, i32, i32) {
    %c0_i32 = arith.constant 0 : i32
    %c0_i32_0 = arith.constant 0 : i32
    %c0_i32_1 = arith.constant 0 : i32
    %c0_i32_2 = arith.constant 0 : i32
    return %c0_i32, %c0_i32_0, %c0_i32_1 : i32, i32, i32
  }
  func.func @transform_3(%arg0: i32) -> (i32, i32, i32) {
    %c0_i32 = arith.constant 0 : i32
    %c0_i32_0 = arith.constant 0 : i32
    %c0_i32_1 = arith.constant 0 : i32
    return %arg0, %c0_i32, %c0_i32_0 : i32, i32, i32
  }
  func.func @transform_4(%arg0: i32) -> (i32, i32, i32) {
    %c0_i32 = arith.constant 0 : i32
    %c0_i32_0 = arith.constant 0 : i32
    %c0_i32_1 = arith.constant 0 : i32
    return %arg0, %c0_i32, %c0_i32_0 : i32, i32, i32
  }
  func.func @transform_5(%arg0: i32) -> (i32, i32, i32) {
    %c0_i32 = arith.constant 0 : i32
    %c0_i32_0 = arith.constant 0 : i32
    %c0_i32_1 = arith.constant 0 : i32
    return %arg0, %c0_i32, %c0_i32_0 : i32, i32, i32
  }
  func.func @transform_6(%arg0: i32) -> (i32, i32, i32) {
    %c0_i32 = arith.constant 0 : i32
    %c0_i32_0 = arith.constant 0 : i32
    %c0_i32_1 = arith.constant 0 : i32
    return %arg0, %c0_i32, %c0_i32_0 : i32, i32, i32
  }
}

</mosaic_0001>

<bundles_post_ra>
// kernel: _forward_impl.1
= control target key start
LH: loop header
LB: loop body
LE: loop exit
PB: predicated region body
PF: predicated region fallthrough
CT: control target
= control target key end

     0   :  { %s14972_s21 = smov 0   ;;  %s16832_s0 = inlined_call_operand.vmem [shape: f32[8,4,256], index: 0, kind: input, shape index: {}]   ;;  %s16833_s1 = inlined_call_operand.vmem [shape: f32[4,4,512], index: 1, kind: input, shape index: {}]   ;;  %s16834_s2 = inlined_call_operand.vmem [shape: f32[4,1,512], index: 2, kind: input, shape index: {}]   ;;  %s16835_s3 = inlined_call_operand.vmem [shape: f32[2,4,512], index: 3, kind: input, shape index: {}]   ;;  %s16836_s4 = inlined_call_operand.vmem [shape: f32[2,1,4], index: 4, kind: input, shape index: {}]   ;;  %s16837_s5 = inlined_call_operand.vmem [shape: f32[2,32,32], index: 5, kind: output, shape index: {0}]   ;;  %s16838_s6 = inlined_call_operand.vmem [shape: f32[2,32,32], index: 6, kind: output, shape index: {1}]  }
   0x1 LB: > { %s14455_s22 = sadd.s32 4294967295, %s14922_s21   ;;  %p14459_p0 = scmp.ge.s32.totalorder %s14922_s21, 1  ;;  %s14922_s21 = sphi %s14972_s21, %s17_s21  }
   0x2   : > { %p223_p1 = scmp.lt.s32.totalorder %s14922_s21, 3 }
   0x4   : > { %p224_p2 = pnand %p14459_p0, %p223_p1 }
   0x6   : > { %227 = sbr.rel (%p224_p2) target bundleno = 3357 (0xd1d), region = 40 }
   0xb   : > { %v279_v0 = vld [vmem:[%s16832_s0] sm:$0xff]  ;;  %vm311_vm0 = vcmask 1043456   ;;  %v281_v1 = vld [vmem:[%s16832_s0 + $0x10] sm:$0xff]  ;;  %v280_v2 = vld [vmem:[%s16832_s0 + $0x8] sm:$0xff]  ;;  %v14924_v54 = vmov 0.0   ;;  %v368_v55 = vlaneseq  ;;  %vm430_vm1 = vcmask 1041409  }
   0xc   : > { %v295_v3 = vcombine.high %v279_v0, %v279_v0  ;;  %v312_v4 = vsel %vm311_vm0, %v279_v0, 0.0  ;;  %v297_v5 = vcombine.high %v281_v1, %v281_v1  ;;  %v322_v6 = vsel %vm311_vm0, %v281_v1, 0.0  ;;  %v282_v7 = vld [vmem:[%s16832_s0 + $0x18] sm:$0xff]  ;;  %v283_v8 = vld [vmem:[%s16832_s0 + $0x20] sm:$0xff]  ;;  %v284_v12 = vld [vmem:[%s16832_s0 + $0x28] sm:$0xff]  ;;  %611 = vmatprep.mubr.f32.mxu1 %v14924_v54  ;;  %525 = vmatprep.mubr.f32.mxu0 %v14924_v54  ;;  %p261_p3 = scmp.lt.s32.totalorder %s14455_s22, 1 }
   0xd   : > { %v296_v9 = vcombine.high %v280_v2, %v280_v2  ;;  %v317_v10 = vsel %vm311_vm0, %v280_v2, 0.0  ;;  %v298_v11 = vcombine.high %v282_v7, %v282_v7  ;;  %v327_v15 = vsel %vm311_vm0, %v282_v7, 0.0  ;;  %v285_v21 = vld [vmem:[%s16832_s0 + $0x30] sm:$0xff]  ;;  %v286_v22 = vld [vmem:[%s16832_s0 + $0x38] sm:$0xff]  ;;  %v364_v40 = vld [vmem:[%s16833_s1] sm:$0xff]  ;;  %s14929_s26 = smov 8  }
   0xe   : > { %v313_v13 = vsel %vm311_vm0, %v295_v3, 0.0  ;;  %v323_v14 = vsel %vm311_vm0, %v297_v5, 0.0  ;;  %v299_v16 = vcombine.high %v283_v8, %v283_v8  ;;  %v300_v23 = vcombine.high %v284_v12, %v284_v12  ;;  %v365_v56 = vld [vmem:[%s16833_s1 + $0x8] sm:$0xff]  ;;  %s16851_s22 = smov (!%p261_p3, %s14455_s22), 1  ;;  %s14934_s27 = smov 120  }
   0xf   : > { %v314_v17 = vadd.f32 %v313_v13, %v312_v4  ;;  %v324_v18 = vadd.f32 %v323_v14, %v322_v6  ;;  %v318_v19 = vsel %vm311_vm0, %v296_v9, 0.0  ;;  %v328_v20 = vsel %vm311_vm0, %v298_v11, 0.0  ;;  %s14510_s19 = sshll.u32 %s16851_s22, 4  ;;  %s15709_s15 = scalar_lea.vmem %s16836_s4, %s16851_s22 }
  0x10   : > { %v319_v24 = vadd.f32 %v318_v19, %v317_v10  ;;  %v329_v25 = vadd.f32 %v328_v20, %v327_v15  ;;  %v332_v26 = vsel %vm311_vm0, %v283_v8, 0.0  ;;  %v333_v27 = vsel %vm311_vm0, %v299_v16, 0.0  ;;  %s15112_s24 = scalar_lea.vmem %s16835_s3, %s14510_s19  ;;  %s14935_s28 = smov 16  }
  0x11   : > { %315 = vadd.xlane.f32.xlu0 %v314_v17  ;;  %325 = vadd.xlane.f32.xlu1 %v324_v18  ;;  %v337_v28 = vsel %vm311_vm0, %v284_v12, 0.0  ;;  %v338_v29 = vsel %vm311_vm0, %v300_v23, 0.0  ;;  %v301_v30 = vcombine.high %v285_v21, %v285_v21  ;;  %v302_v31 = vcombine.high %v286_v22, %v286_v22  ;;  %s14936_s29 = smov 24   ;;  %s14511_s30 = sshll.u32 %s16851_s22, 5 }
  0x12   : > { %v334_v32 = vadd.f32 %v333_v27, %v332_v26  ;;  %v339_v33 = vadd.f32 %v338_v29, %v337_v28  ;;  %v342_v34 = vsel %vm311_vm0, %v285_v21, 0.0  ;;  %v347_v36 = vsel %vm311_vm0, %v286_v22, 0.0  ;;  %s16762_s9 = scalar_lea.vmem %s16837_s5, %s14511_s30  ;;  %s278_s12 = scalar_lea.vmem %s16838_s6, %s14511_s30 }
  0x13   : > { %v343_v35 = vsel %vm311_vm0, %v301_v30, 0.0  ;;  %v348_v37 = vsel %vm311_vm0, %v302_v31, 0.0  ;;  %v446_v41 = vcombine.high %v364_v40, %v364_v40  ;;  %v451_v44 = vsel %vm311_vm0, %v364_v40, 0 }
  0x14   : > { %v344_v38 = vadd.f32 %v343_v35, %v342_v34  ;;  %v349_v39 = vadd.f32 %v348_v37, %v347_v36  ;;  %v15027_v45 = vand.u32 4294901760, %v451_v44  ;;  %v15052_v57 = vshrl.u32 %v368_v55, 7 }
  0x15   : > { %320 = vadd.xlane.f32.xlu0 %v319_v24  ;;  %330 = vadd.xlane.f32.xlu1 %v329_v25  ;;  %v453_v42 = vsel %vm311_vm0, %v446_v41, 0  ;;  %v15054_v58 = vand.u32 127, %v368_v55  ;;  %v447_v61 = vcombine.high %v365_v56, %v365_v56  ;;  %vm432_vm2 = vcmask 1042434  }
  0x16   : > { %v15024_v43 = vand.u32 4294901760, %v453_v42  ;;  %v15034_v47 = vsub.f32 %v451_v44, %v15027_v45  ;;  %vm434_vm3 = vcmask 1043459   ;;  %v455_v16 = vsel %vm311_vm0, %v365_v56, 0 }
  0x17   : > { %v400_v62 = vsub.s32 %v15054_v58, %v15052_v57  ;;  %v457_v5 = vsel %vm311_vm0, %v447_v61, 0  ;;  %vm436_vm4 = vcmask 1044484   ;;  %v956_v24 = vand.u32 4294901760, %v455_v16 }
  0x18   : > { %v15030_v46 = vsub.f32 %v453_v42, %v15024_v43  ;;  %490 = vmatprep.subr.mxu0 %v15024_v43  ;;  %v575_v49 = vand.u32 4294901760, %v15034_v47  ;;  %v954_v12 = vand.u32 4294901760, %v457_v5  ;;  %vm438_vm5 = vcmask 1045509  }
  0x19   : > { %335 = vadd.xlane.f32.xlu0 %v334_v32  ;;  %340 = vadd.xlane.f32.xlu1 %v339_v33  ;;  %vm440_vm6 = vcmask 1046534   ;;  %vm442_vm7 = vcmask 1047559   ;;  %vm448_vm8 = vcmask 31744   ;;  %v1039_v32 = vsub.f32 %v455_v16, %v956_v24 }
  0x1a   : > { %492 = vmatpush1.msra.mxu0 %v15027_v45  ;;  %v569_v48 = vand.u32 4294901760, %v15030_v46  ;;  %v576_v51 = vsub.f32 %v15034_v47, %v575_v49  ;;  %v1033_v23 = vsub.f32 %v457_v5, %v954_v12  ;;  %v15137_v56 = vsub.s32 0, %v15052_v57 }
  0x1b   : > { %651 = vmatprep.subr.mxu0 %v15030_v46  ;;  %v15143_v61 = vsub.s32 1, %v15052_v57  ;;  %vm12137_vm9 = vcmask 64512   ;;  %vm16276_vm10 = vcmp.eq.s32.totalorder %v15052_v57, %v15054_v58  ;;  %vm12235_vm11 = vcmp.eq.s32.totalorder %v15052_v57, 0 }
  0x1c   : > { %v570_v50 = vsub.f32 %v15030_v46, %v569_v48  ;;  %v577_v53 = vand.u32 4294901760, %v576_v51  ;;  %v1034_v31 = vand.u32 4294901760, %v1033_v23  ;;  %vm12336_vm12 = vcmp.eq.s32.totalorder %v15052_v57, 1 }
  0x1d   : > { %345 = vadd.xlane.f32.xlu0 %v344_v38  ;;  %350 = vadd.xlane.f32.xlu1 %v349_v39  ;;  %v1040_v38 = vand.u32 4294901760, %v1039_v32  ;;  %vm12437_vm13 = vcmp.eq.s32.totalorder %v15052_v57, 2  ;;  %vm12538_vm14 = vcmp.eq.s32.totalorder %v15052_v57, 3  ;;  %vm12639_vm15 = vcmp.eq.s32.totalorder %v15052_v57, 4 }
  0x1e   : > { %v571_v52 = vand.u32 4294901760, %v570_v50  ;;  %v1035_v37 = vsub.f32 %v1033_v23, %v1034_v31 }
  0x1f   : > { %v1041_v42 = vsub.f32 %v1039_v32, %v1040_v38 }
  0x20   : > { %572 = vmatprep.subr.mxu1 %v571_v52  ;;  %v1036_v41 = vand.u32 4294901760, %v1035_v37 }
  0x21   : > { %578 = vmatpush1.msra.mxu1 %v577_v53  ;;  %v1042_v51 = vand.u32 4294901760, %v1041_v42 }
  0x22   : > { %727 = vmatprep.subr.mxu1 %v15024_v43 }
  0x9a   : > { %v316_v59 = vpop.xlane.xlu0 %315  ;;  %v326_v60 = vpop.xlane.xlu1 %325 }
  0x9b   : > { %v353_v63 = vmul.f32 0.00390625, %v316_v59  ;;  %v355_v0 = vmul.f32 0.00390625, %v326_v60  ;;  %v366_v60 = vld [vmem:[%s16834_s2] sm:$0xf] }
  0x9d   : > { %v401_v6 = vrot.slane %v353_v63, %v400_v62  ;;  %v409_v9 = vrot.slane %v355_v0, %v400_v62  ;;  %v371_v63 = vrot.slane %v366_v60, %v15137_v56 }
  0x9e   : > { %v321_v1 = vpop.xlane.xlu0 %320  ;;  %v331_v2 = vpop.xlane.xlu1 %330 }
  0x9f   : > { %v354_v3 = vmul.f32 0.00390625, %v321_v1  ;;  %v356_v4 = vmul.f32 0.00390625, %v331_v2  ;;  %v375_v1 = vrot.slane %v366_v60, %v15143_v61 }
  0xa1   : > { %v405_v7 = vrot.slane %v354_v3, %v400_v62  ;;  %v413_v8 = vrot.slane %v356_v4, %v400_v62 }
  0xa2   : > { %v336_v10 = vpop.xlane.xlu0 %335  ;;  %v341_v11 = vpop.xlane.xlu1 %340 }
  0xa3   : > { %v431_v13 = vsel %vm430_vm1, %v405_v7, %v401_v6  ;;  %v357_v14 = vmul.f32 0.00390625, %v336_v10  ;;  %v358_v15 = vmul.f32 0.00390625, %v341_v11  ;;  %vm12841_vm1 = vcmp.eq.s32.totalorder %v15052_v57, 6 }
  0xa4   : > { %v433_v17 = vsel %vm432_vm2, %v409_v9, %v431_v13  ;;  %vm12942_vm2 = vcmp.eq.s32.totalorder %v15052_v57, 7 }
  0xa5   : > { %v435_v18 = vsel %vm434_vm3, %v413_v8, %v433_v17  ;;  %v417_v19 = vrot.slane %v357_v14, %v400_v62  ;;  %v421_v20 = vrot.slane %v358_v15, %v400_v62  ;;  %v15155_v15 = vsub.s32 2, %v15052_v57 }
  0xa6   : > { %v346_v21 = vpop.xlane.xlu0 %345  ;;  %v351_v22 = vpop.xlane.xlu1 %350  ;;  %vm14327_vm3 = vcmask 130048  }
  0xa7   : > { %v437_v25 = vsel %vm436_vm4, %v417_v19, %v435_v18  ;;  %v359_v26 = vmul.f32 0.00390625, %v346_v21  ;;  %v360_v27 = vmul.f32 0.00390625, %v351_v22  ;;  %v15158_v19 = vsub.s32 3, %v15052_v57 }
  0xa8   : > { %v439_v30 = vsel %vm438_vm5, %v421_v20, %v437_v25  ;;  %v379_v25 = vrot.slane %v366_v60, %v15155_v15  ;;  %vm14332_vm4 = vcmask 195584   ;;  %vm14349_vm5 = vcmask 261120  }
  0xa9   : > { %v425_v28 = vrot.slane %v359_v26, %v400_v62  ;;  %v429_v29 = vrot.slane %v360_v27, %v400_v62  ;;  %v15166_v26 = vld [vmem:[%s15112_s24 + $0x8] sm:$0xff] }
  0xab   : > { %v441_v33 = vsel %vm440_vm6, %v425_v28, %v439_v30  ;;  %v383_v30 = vrot.slane %v366_v60, %v15158_v19  ;;  %v1410_v60 = vrot.slane %v15166_v26, %v15137_v56 }
  0xac   : > { %v443_v34 = vsel %vm442_vm7, %v429_v29, %v441_v33 }
  0xad   : > { %v449_v35 = vsel %vm448_vm8, %v443_v34, 0 }
  0xae   : > { %v15060_v36 = vand.u32 4294901760, %v449_v35 }
  0xb0   : > { %v15063_v39 = vsub.f32 %v449_v35, %v15060_v36  ;;  %613 = vmatmul.mubr.f32.vlgmr.msra.gmra.mxu1 %v15060_v36 }
  0xb1   : > { %729 = vmatpush1.msra.mxu1 %v15027_v45  ;;  %762 = vmatprep.mubr.f32.mxu1 %v14924_v54 }
  0xb2   : > { %v15069_v40 = vand.u32 4294901760, %v15063_v39  ;;  %881 = vmatprep.subr.mxu1 %v15024_v43  ;;  %v15115_v43 = vld [vmem:[%s15112_s24] sm:$0xff] }
  0xb3   : > { %v15149_v7 = vrot.slane %v15115_v43, %v15137_v56 }
  0xb4   : > { %766 = vmatmul.mubr.f32.vlgmr.msra.gmra.mxu1 %v15069_v40  ;;  %v529_v44 = vsub.f32 %v15063_v39, %v15069_v40 }
  0xb5   : > { %883 = vmatpush1.msra.mxu1 %v15027_v45  ;;  %916 = vmatprep.mubr.f32.mxu1 %v14924_v54  ;;  %v15118_v45 = vsub.s32 4, %v15052_v57 }
  0xb6   : > { %v15077_v50 = vand.u32 4294901760, %v529_v44  ;;  %1037 = vmatprep.subr.mxu1 %v1036_v41 }
  0xb7   : > { %v15122_v46 = vrot.slane %v15115_v43, %v15118_v45  ;;  %v1414_v34 = vrot.slane %v15166_v26, %v15118_v45 }
  0xb8   : > { %531 = vmatmul.mubr.f32.vlgmr.msra.gmra.mxu0 %v15077_v50  ;;  %918 = vmatmul.mubr.f32.vlgmr.msra.gmra.mxu1 %v15060_v36 }
  0xb9   : > { %654 = vmatpush1.msra.mxu0 %v15034_v47  ;;  %687 = vmatprep.mubr.f32.mxu0 %v14924_v54  ;;  %v15125_v47 = vand.u32 4294901760, %v15122_v46 }
  0xba   : > { %1043 = vmatpush1.msra.mxu1 %v1042_v51  ;;  %1076 = vmatprep.mubr.f32.mxu1 %v14924_v54 }
  0xbb   : > { %805 = vmatprep.subr.mxu0 %v569_v48  ;;  %1192 = vmatprep.subr.mxu1 %v954_v12  ;;  %v15129_v48 = vsub.f32 %v15122_v46, %v15125_v47 }
  0xbc   : > { %690 = vmatmul.mubr.f32.vlgmr.msra.gmra.mxu0 %v15063_v39  ;;  %1078 = vmatmul.mubr.f32.vlgmr.msra.gmra.mxu1 %v15060_v36 }
  0xbd   : > { %809 = vmatpush1.msra.mxu0 %v575_v49  ;;  %842 = vmatprep.mubr.f32.mxu0 %v14924_v54  ;;  %v1516_v49 = vand.u32 4294901760, %v15129_v48 }
  0xbe   : > { %1194 = vmatpush1.msra.mxu1 %v956_v24  ;;  %1227 = vmatprep.mubr.f32.mxu1 %v14924_v54 }
  0xbf   : > { %955 = vmatprep.subr.mxu0 %v954_v12  ;;  %1346 = vmatprep.subr.mxu1 %v954_v12  ;;  %v1517_v52 = vsub.f32 %v15129_v48, %v1516_v49  ;;  %v15152_v12 = vand.u32 4294901760, %v15149_v7 }
  0xc0   : > { %844 = vmatmul.mubr.f32.vlgmr.msra.gmra.mxu0 %v15060_v36  ;;  %1231 = vmatmul.mubr.f32.vlgmr.msra.gmra.mxu1 %v15069_v40 }
  0xc1   : > { %957 = vmatpush1.msra.mxu0 %v956_v24  ;;  %990 = vmatprep.mubr.f32.mxu0 %v14924_v54  ;;  %v1518_v53 = vand.u32 4294901760, %v1517_v52  ;;  %v15162_v22 = vsub.f32 %v15149_v7, %v15152_v12 }
  0xc2   : > { %1348 = vmatpush1.msra.mxu1 %v956_v24  ;;  %1381 = vmatprep.mubr.f32.mxu1 %v14924_v54 }
  0xc3   : > { %1116 = vmatprep.subr.mxu0 %v1033_v23  ;;  %v1522_v33 = vand.u32 4294901760, %v15162_v22 }
  0xc4   : > { %996 = vmatmul.mubr.f32.vlgmr.msra.gmra.mxu0 %v15077_v50  ;;  %1383 = vmatmul.mubr.f32.vlgmr.msra.gmra.mxu1 %v15060_v36 }
  0xc5   : > { %1119 = vmatpush1.msra.mxu0 %v1039_v32  ;;  %1152 = vmatprep.mubr.f32.mxu0 %v14924_v54 }
  0xc6   : > { %1270 = vmatprep.subr.mxu0 %v1034_v31  ;;  %1605 = vmatprep.mubr.f32.mxu1 %v15125_v47 }
  0xc8   : > { %1155 = vmatmul.mubr.f32.vlgmr.msra.gmra.mxu0 %v15063_v39 }
  0xc9   : > { %1274 = vmatpush1.msra.mxu0 %v1040_v38  ;;  %1307 = vmatprep.mubr.f32.mxu0 %v14924_v54 }
  0xcc   : > { %1309 = vmatmul.mubr.f32.vlgmr.msra.gmra.mxu0 %v15060_v36 }
  0xcd   : > { %1519 = vmatprep.mubr.f32.mxu0 %v1518_v53 }
 0x170   : > { %v614_v55 = vpop.f32.mrf.mxu1 }
 0x172   : > { %v616_v59 = vpop.f32.mrf.mxu1 }
 0x174   : > { %v767_v62 = vpop.f32.mrf.mxu1 }
 0x176   : > { %v769_v0 = vpop.f32.mrf.mxu1 }
 0x178   : > { %v532_v2 = vpop.f32.mrf.mxu0  ;;  %v919_v3 = vpop.f32.mrf.mxu1 }
 0x179   : > { %v533_v4 = vadd.f32 %v532_v2, %v371_v63 }
 0x17a   : > { %v534_v5 = vpop.f32.mrf.mxu0  ;;  %v921_v6 = vpop.f32.mrf.mxu1 }
 0x17b   : > { %v535_v8 = vadd.f32 %v534_v5, %v375_v1  ;;  %v615_v9 = vadd.f32 %v614_v55, %v533_v4  ;;  %v15189_v4 = vand.u32 4294901760, %v1410_v60 }
 0x17c   : > { %v691_v10 = vpop.f32.mrf.mxu0  ;;  %v1079_v11 = vpop.f32.mrf.mxu1 }
 0x17d   : > { %v692_v13 = vadd.f32 %v691_v10, %v615_v9  ;;  %v617_v14 = vadd.f32 %v616_v59, %v535_v8  ;;  %v1523_v59 = vsub.f32 %v15162_v22, %v1522_v33 }
 0x17e   : > { %v693_v16 = vpop.f32.mrf.mxu0  ;;  %v1081_v20 = vpop.f32.mrf.mxu1 }
 0x17f   : > { %v694_v17 = vadd.f32 %v693_v16, %v617_v14  ;;  %v768_v18 = vadd.f32 %v767_v62, %v692_v13  ;;  %v15183_v62 = vand.u32 4294901760, %v1414_v34  ;;  %v1524_v13 = vand.u32 4294901760, %v1523_v59 }
 0x180   : > { %v845_v21 = vpop.f32.mrf.mxu0  ;;  %v1232_v31 = vpop.f32.mrf.mxu1 }
 0x181   : > { %v846_v23 = vadd.f32 %v845_v21, %v768_v18  ;;  %v770_v24 = vadd.f32 %v769_v0, %v694_v17  ;;  %v15195_v14 = vsub.f32 %v1414_v34, %v15183_v62 }
 0x182   : > { %v847_v27 = vpop.f32.mrf.mxu0  ;;  %v1234_v53 = vpop.f32.mrf.mxu1 }
 0x183   : > { %v920_v28 = vadd.f32 %v919_v3, %v846_v23  ;;  %v848_v29 = vadd.f32 %v847_v27, %v770_v24  ;;  %v1426_v23 = vrot.slane %v15122_v46, %v15137_v56  ;;  %v15203_v24 = vsub.f32 %v1410_v60, %v15189_v4 }
 0x184   : > { %v997_v32 = vpop.f32.mrf.mxu0  ;;  %v1384_v10 = vpop.f32.mrf.mxu1 }
 0x185   : > { %v15172_v35 = vmax.f32 %v920_v28, 0.0  ;;  %v922_v37 = vadd.f32 %v921_v6, %v848_v29  ;;  %v998_v38 = vadd.f32 %v997_v32, %v379_v25  ;;  %v1988_v32 = vand.u32 4294901760, %v15195_v14 }
 0x186   : > { %v999_v41 = vpop.f32.mrf.mxu0  ;;  %v1386_v29 = vpop.f32.mrf.mxu1 }
 0x187   : > { %v1393_v42 = vmul.f32 %v15172_v35, %v15172_v35  ;;  %v15176_v44 = vmax.f32 %v922_v37, 0.0  ;;  %v1000_v51 = vadd.f32 %v999_v41, %v383_v30  ;;  %v1080_v52 = vadd.f32 %v1079_v11, %v998_v38 }
 0x188   : > { %v1156_v55 = vpop.f32.mrf.mxu0 }
 0x189   : > { %v1157_v63 = vadd.f32 %v1156_v55, %v1080_v52  ;;  %v1082_v0 = vadd.f32 %v1081_v20, %v1000_v51  ;;  %v1394_v1 = vmul.f32 %v15176_v44, %v15176_v44  ;;  %v15187_v2 = vand.u32 4294901760, %v1393_v42 }
 0x18a   : > { %v1158_v3 = vpop.f32.mrf.mxu0  ;;  %v1430_v51 = vrot.slane %v1410_v60, %v15137_v56  ;;  %v1994_v52 = vand.u32 4294901760, %v15203_v24  ;;  %v1989_v60 = vsub.f32 %v15195_v14, %v1988_v32 }
 0x18b   : > { %v1159_v5 = vadd.f32 %v1158_v3, %v1082_v0  ;;  %v1233_v6 = vadd.f32 %v1232_v31, %v1157_v63  ;;  %v15191_v8 = vand.u32 4294901760, %v1394_v1  ;;  %v1567_v9 = vsub.f32 %v1393_v42, %v15187_v2 }
 0x18c   : > { %v1310_v11 = vpop.f32.mrf.mxu0  ;;  %v1422_v31 = vrot.slane %v15149_v7, %v15137_v56  ;;  %v1440_v46 = vmul.f32 %v1426_v23, %v1394_v1 }
 0x18d   : > { %v1311_v16 = vadd.f32 %v1310_v11, %v1233_v6  ;;  %1479 = vmatprep.subr.mxu0 %v15191_v8  ;;  %v1235_v17 = vadd.f32 %v1234_v53, %v1159_v5  ;;  %v1561_v18 = vsub.f32 %v1394_v1, %v15191_v8  ;;  %v1568_v20 = vand.u32 4294901760, %v1567_v9 }
 0x18e   : > { %v1312_v21 = vpop.f32.mrf.mxu0  ;;  %1481 = vmatpush1.xpose.msra.mxu0 %v15187_v2  ;;  %v1436_v53 = vmul.f32 %v1426_v23, %v15176_v44  ;;  %v1439_v63 = vmul.f32 %v1422_v31, %v1393_v42  ;;  %v1434_v1 = vrot.slane %v1414_v34, %v15137_v56  ;;  %v1435_v3 = vmul.f32 %v1422_v31, %v15172_v35 }
 0x18f   : > { %v1385_v25 = vadd.f32 %v1384_v10, %v1311_v16  ;;  %v1313_v27 = vadd.f32 %v1312_v21, %v1235_v17  ;;  %1644 = vmatprep.subr.mxu0 %v1561_v18  ;;  %v1562_v28 = vand.u32 4294901760, %v1561_v18  ;;  %v1569_v30 = vsub.f32 %v1567_v9, %v1568_v20 }
 0x190   : > { %v1443_v10 = vadd.f32 %v1440_v46, %v1439_v63  ;;  %v1995_v34 = vsub.f32 %v15203_v24, %v1994_v52  ;;  %v15231_v42 = vand.u32 4294901760, %v1436_v53  ;;  %v15237_v17 = vand.u32 4294901760, %v1435_v3 }
 0x191   : > { %v15208_v37 = vmax.f32 %v1385_v25, 0.0  ;;  %v1387_v38 = vadd.f32 %v1386_v29, %v1313_v27  ;;  %1525 = vmatmul.mubr.f32.vlgmr.msra.gmra.mxu0 %v1524_v13  ;;  %v1563_v41 = vsub.f32 %v1561_v18, %v1562_v28  ;;  %v1570_v0 = vand.u32 4294901760, %v1569_v30 }
 0x192   : > { %1647 = vmatpush1.xpose.msra.mxu0 %v1567_v9  ;;  %1682 = vmatprep.mubr.f32.mxu0 %v15129_v48  ;;  %v1990_v23 = vand.u32 4294901760, %v1989_v60  ;;  %v1996_v25 = vand.u32 4294901760, %v1995_v34  ;;  %v15249_v29 = vsub.f32 %v1436_v53, %v15231_v42  ;;  %v15254_v31 = vsub.f32 %v1435_v3, %v15237_v17  ;;  %v14467_v60 = vld [vmem:[%s16833_s1 + $0x10] sm:$0xff] }
 0x193   : > { %v1395_v7 = vmul.f32 %v15208_v37, %v15208_v37  ;;  %v15216_v55 = vmax.f32 %v1387_v38, 0.0  ;;  %1801 = vmatprep.subr.mxu0 %v1562_v28  ;;  %v1564_v59 = vand.u32 4294901760, %v1563_v41  ;;  %v15246_v28 = vand.u32 4294901760, %v15176_v44 }
 0x194   : > { %v15259_v46 = vand.u32 4294901760, %v15172_v35  ;;  %v15310_v34 = vand.u32 4294901760, %v15208_v37 }
 0x195   : > { %1565 = vmatprep.subr.mxu1 %v1564_v59  ;;  %1685 = vmatmul.mubr.f32.vlgmr.msra.gmra.mxu0 %v15162_v22  ;;  %v1396_v5 = vmul.f32 %v15216_v55, %v15216_v55  ;;  %v15226_v6 = vand.u32 4294901760, %v1395_v7  ;;  %v1441_v9 = vmul.f32 %v1430_v51, %v1395_v7  ;;  %v2505_v53 = vsub.f32 %v15176_v44, %v15246_v28 }
 0x196   : > { %1571 = vmatpush1.xpose.msra.mxu1 %v1570_v0  ;;  %1805 = vmatpush1.xpose.msra.mxu0 %v1568_v20  ;;  %v1437_v22 = vmul.f32 %v1430_v51, %v15208_v37  ;;  %v2511_v44 = vsub.f32 %v15172_v35, %v15259_v46 }
 0x197   : > { %1721 = vmatprep.subr.mxu1 %v15191_v8  ;;  %1839 = vmatprep.mubr.f32.mxu0 %v15125_v47  ;;  %v15235_v11 = vand.u32 4294901760, %v1396_v5  ;;  %v1442_v13 = vmul.f32 %v1434_v1, %v1396_v5  ;;  %v1444_v16 = vadd.f32 %v1443_v10, %v1441_v9  ;;  %v2039_v18 = vsub.f32 %v1395_v7, %v15226_v6 }
 0x198   : > { %v1438_v7 = vmul.f32 %v1434_v1, %v15216_v55  ;;  %v2512_v51 = vand.u32 4294901760, %v2511_v44  ;;  %v15295_v1 = vand.u32 4294901760, %v15216_v55 }
 0x199   : > { %1607 = vmatmul.mubr.f32.vlgmr.msra.gmra.mxu1 %v15152_v12  ;;  %1841 = vmatmul.mubr.f32.vlgmr.msra.gmra.mxu0 %v15152_v12  ;;  %v2033_v20 = vsub.f32 %v1396_v5, %v15235_v11  ;;  %v1445_v21 = vadd.f32 %v1444_v16, %v1442_v13  ;;  %v2040_v27 = vand.u32 4294901760, %v2039_v18  ;;  %v3381_v16 = vcombine.high %v14467_v60, %v14467_v60 }
 0x19a   : > { %1951 = vmatprep.subr.mxu0 %v15235_v11  ;;  %1723 = vmatpush1.xpose.msra.mxu1 %v15187_v2  ;;  %v15279_v59 = vand.u32 4294901760, %v1438_v7  ;;  %v2513_v10 = vsub.f32 %v2511_v44, %v2512_v51 }
 0x19b   : > { %1953 = vmatpush1.xpose.msra.mxu0 %v15226_v6  ;;  %1877 = vmatprep.subr.mxu1 %v15191_v8  ;;  %v2034_v30 = vand.u32 4294901760, %v2033_v20  ;;  %v2041_v41 = vsub.f32 %v2039_v18, %v2040_v27  ;;  %v2460_v8 = vand.u32 4294901760, %v15249_v29 }
 0x19c   : > { %2116 = vmatprep.subr.mxu0 %v2033_v20  ;;  %1446 = vadd.xlane.f32.xlu0 %v1445_v21  ;;  %v15298_v3 = vsub.f32 %v1438_v7, %v15279_v59 }
 0x19d   : > { %1759 = vmatprep.mubr.f32.mxu1 %v1516_v49  ;;  %1991 = vmatprep.mubr.f32.mxu0 %v1990_v23  ;;  %v2035_v38 = vsub.f32 %v2033_v20, %v2034_v30  ;;  %v2466_v49 = vand.u32 4294901760, %v15254_v31 }
 0x19e   : > { %1763 = vmatmul.mubr.f32.vlgmr.msra.gmra.mxu1 %v1522_v33  ;;  %1997 = vmatmul.mubr.f32.vlgmr.msra.gmra.mxu0 %v1996_v25  ;;  %v2042_v33 = vand.u32 4294901760, %v2041_v41 }
 0x19f   : > { %1879 = vmatpush1.xpose.msra.mxu1 %v15187_v2  ;;  %2119 = vmatpush1.xpose.msra.mxu0 %v2039_v18  ;;  %v2036_v48 = vand.u32 4294901760, %v2035_v38  ;;  %v2461_v2 = vsub.f32 %v15249_v29, %v2460_v8  ;;  %v2467_v35 = vsub.f32 %v15254_v31, %v2466_v49  ;;  %v2977_v18 = vsub.f32 %v15216_v55, %v15295_v1 }
 0x1a0   : > { %2273 = vmatprep.subr.mxu0 %v2034_v30  ;;  %1913 = vmatprep.mubr.f32.mxu1 %v15125_v47  ;;  %v2506_v47 = vand.u32 4294901760, %v2505_v53 }
 0x1a1   : > { %2154 = vmatprep.mubr.f32.mxu0 %v15195_v14  ;;  %2037 = vmatprep.subr.mxu1 %v2036_v48  ;;  %v2462_v63 = vand.u32 4294901760, %v2461_v2  ;;  %v2468_v5 = vand.u32 4294901760, %v2467_v35  ;;  %v2514_v14 = vand.u32 4294901760, %v2513_v10 }
 0x1a2   : > { %1915 = vmatmul.mubr.f32.vlgmr.msra.gmra.mxu1 %v15152_v12  ;;  %2157 = vmatmul.mubr.f32.vlgmr.msra.gmra.mxu0 %v15203_v24  ;;  %v15286_v12 = vand.u32 4294901760, %v1437_v22  ;;  %v2507_v0 = vsub.f32 %v2505_v53, %v2506_v47 }
 0x1a3   : > { %2043 = vmatpush1.xpose.msra.mxu1 %v2042_v33  ;;  %2277 = vmatpush1.xpose.msra.mxu0 %v2040_v27  ;;  %v14468_v27 = vld [vmem:[%s16833_s1 + $0x18] sm:$0xff] }
 0x1a4   : > { %2193 = vmatprep.subr.mxu1 %v15235_v11  ;;  %2423 = vmatprep.subr.mxu0 %v15246_v28  ;;  %v15305_v9 = vsub.f32 %v1437_v22, %v15286_v12  ;;  %v2508_v13 = vand.u32 4294901760, %v2507_v0 }
 0x1a5   : > { %2077 = vmatprep.mubr.f32.mxu1 %v15183_v62  ;;  %2311 = vmatprep.mubr.f32.mxu0 %v15183_v62 }
 0x1a6   : > { %2079 = vmatmul.mubr.f32.vlgmr.msra.gmra.mxu1 %v15189_v4  ;;  %2313 = vmatmul.mubr.f32.vlgmr.msra.gmra.mxu0 %v15189_v4  ;;  %v2938_v24 = vand.u32 4294901760, %v15305_v9 }
 0x1a7   : > { %2195 = vmatpush1.xpose.msra.mxu1 %v15226_v6  ;;  %2425 = vmatpush1.xpose.msra.mxu0 %v15259_v46 }
 0x1a8   : > { %2463 = vmatprep.mubr.f32.mxu0 %v2462_v63  ;;  %2349 = vmatprep.subr.mxu1 %v15235_v11  ;;  %v2932_v11 = vand.u32 4294901760, %v15298_v3 }
 0x1a9   : > { %2588 = vmatprep.subr.mxu0 %v2505_v53  ;;  %2231 = vmatprep.mubr.f32.mxu1 %v1988_v32  ;;  %v2983_v32 = vsub.f32 %v15208_v37, %v15310_v34  ;;  %v3382_v53 = vcombine.high %v14468_v27, %v14468_v27 }
 0x1aa   : > { %2235 = vmatmul.mubr.f32.vlgmr.msra.gmra.mxu1 %v1994_v52  ;;  %2469 = vmatmul.mubr.f32.vlgmr.msra.gmra.mxu0 %v2468_v5  ;;  %v3385_v52 = vsel %vm311_vm0, %v3381_v16, 0  ;;  %v2933_v55 = vsub.f32 %v15298_v3, %v2932_v11 }
 0x1ab   : > { %2351 = vmatpush1.xpose.msra.mxu1 %v15226_v6  ;;  %2591 = vmatpush1.xpose.msra.mxu0 %v2511_v44  ;;  %v3383_v6 = vsel %vm311_vm0, %v14467_v60, 0  ;;  %v2984_v37 = vand.u32 4294901760, %v2983_v32  ;;  %v15337_v20 = vand.u32 4294901760, %v3385_v52 }
 0x1ac   : > { %2626 = vmatprep.mubr.f32.mxu0 %v15249_v29  ;;  %2509 = vmatprep.subr.mxu1 %v2508_v13  ;;  %v2934_v21 = vand.u32 4294901760, %v2933_v55  ;;  %v15342_v25 = vand.u32 4294901760, %v3383_v6 }
 0x1ad   : > { %2745 = vmatprep.subr.mxu0 %v2506_v47  ;;  %2385 = vmatprep.mubr.f32.mxu1 %v15183_v62  ;;  %v2978_v62 = vand.u32 4294901760, %v2977_v18  ;;  %v2985_v38 = vsub.f32 %v2983_v32, %v2984_v37  ;;  %v3500_v41 = vsub.f32 %v3385_v52, %v15337_v20 }
 0x1ae   : > { %2387 = vmatmul.mubr.f32.vlgmr.msra.gmra.mxu1 %v15189_v4  ;;  %2629 = vmatmul.mubr.f32.vlgmr.msra.gmra.mxu0 %v15254_v31  ;;  %v2939_v4 = vsub.f32 %v15305_v9, %v2938_v24  ;;  %v3506_v29 = vsub.f32 %v3383_v6, %v15342_v25  ;;  %v3389_v31 = vsel %vm311_vm0, %v3382_v53, 0 }
 0x1af   : > { %2515 = vmatpush1.xpose.msra.mxu1 %v2514_v14  ;;  %2549 = vmatprep.mubr.f32.mxu1 %v15231_v42  ;;  %v2979_v23 = vsub.f32 %v2977_v18, %v2978_v62 }
 0x1b0   : > { %2749 = vmatpush1.xpose.msra.mxu0 %v2512_v51  ;;  %2783 = vmatprep.mubr.f32.mxu0 %v15231_v42  ;;  %v2940_v30 = vand.u32 4294901760, %v2939_v4 }
 0x1b1   : > { %2665 = vmatprep.subr.mxu1 %v15246_v28  ;;  %2895 = vmatprep.subr.mxu0 %v15295_v1  ;;  %v2980_v7 = vand.u32 4294901760, %v2979_v23 }
 0x1b2   : > { %2551 = vmatmul.mubr.f32.vlgmr.msra.gmra.mxu1 %v15237_v17 }
 0x1b3   : > { %2785 = vmatmul.mubr.f32.vlgmr.msra.gmra.mxu0 %v15237_v17  ;;  %2667 = vmatpush1.xpose.msra.mxu1 %v15259_v46 }
 0x1b4   : > { %2703 = vmatprep.mubr.f32.mxu1 %v2460_v8  ;;  %2897 = vmatpush1.xpose.msra.mxu0 %v15310_v34  ;;  %v3501_v8 = vand.u32 4294901760, %v3500_v41 }
 0x1b5   : > { %2935 = vmatprep.mubr.f32.mxu0 %v2934_v21  ;;  %2821 = vmatprep.subr.mxu1 %v15246_v28  ;;  %v2986_v28 = vand.u32 4294901760, %v2985_v38 }
 0x1b6   : > { %3060 = vmatprep.subr.mxu0 %v2977_v18  ;;  %2707 = vmatmul.mubr.f32.vlgmr.msra.gmra.mxu1 %v2466_v49  ;;  %v3502_v48 = vsub.f32 %v3500_v41, %v3501_v8  ;;  %v15365_v49 = vand.u32 4294901760, %v3389_v31 }
 0x1b7   : > { %2941 = vmatmul.mubr.f32.vlgmr.msra.gmra.mxu0 %v2940_v30  ;;  %2823 = vmatpush1.xpose.msra.mxu1 %v15259_v46  ;;  %v3507_v46 = vand.u32 4294901760, %v3506_v29 }
 0x1b8   : > { %2857 = vmatprep.mubr.f32.mxu1 %v15231_v42  ;;  %3063 = vmatpush1.xpose.msra.mxu0 %v2983_v32  ;;  %v3387_v42 = vsel %vm311_vm0, %v14468_v27, 0  ;;  %v3503_v33 = vand.u32 4294901760, %v3502_v48  ;;  %v3965_v44 = vsub.f32 %v3389_v31, %v15365_v49 }
 0x1b9   : > { %3098 = vmatprep.mubr.f32.mxu0 %v15298_v3  ;;  %2981 = vmatprep.subr.mxu1 %v2980_v7  ;;  %v3888_v22 = vand.u32 4294901760, %v3387_v42 }
 0x1ba   : > { %3217 = vmatprep.subr.mxu0 %v2978_v62  ;;  %2859 = vmatmul.mubr.f32.vlgmr.msra.gmra.mxu1 %v15237_v17  ;;  %v3508_v17 = vsub.f32 %v3506_v29, %v3507_v46  ;;  %v3966_v35 = vand.u32 4294901760, %v3965_v44 }
 0x1bb   : > { %3101 = vmatmul.mubr.f32.vlgmr.msra.gmra.mxu0 %v15305_v9  ;;  %2987 = vmatpush1.xpose.msra.mxu1 %v2986_v28  ;;  %v3971_v47 = vsub.f32 %v3387_v42, %v3888_v22 }
 0x1bc   : > { %3021 = vmatprep.mubr.f32.mxu1 %v15279_v59  ;;  %3221 = vmatpush1.xpose.msra.mxu0 %v2984_v37  ;;  %v3509_v2 = vand.u32 4294901760, %v3508_v17 }
 0x1bd   : > { %3255 = vmatprep.mubr.f32.mxu0 %v15279_v59  ;;  %3137 = vmatprep.subr.mxu1 %v15295_v1  ;;  %v3972_v51 = vand.u32 4294901760, %v3971_v47 }
 0x1be   : > { %3023 = vmatmul.mubr.f32.vlgmr.msra.gmra.mxu1 %v15286_v12  ;;  %3422 = vmatprep.subr.mxu0 %v15337_v20 }
 0x1bf   : > { %3257 = vmatmul.mubr.f32.vlgmr.msra.gmra.mxu0 %v15286_v12  ;;  %3139 = vmatpush1.xpose.msra.mxu1 %v15310_v34 }
 0x1c0   : > { %3175 = vmatprep.mubr.f32.mxu1 %v2932_v11  ;;  %3293 = vmatprep.subr.mxu1 %v15295_v1  ;;  %v15413_v1 = vsub.s32 5, %v15052_v57 }
 0x1c1   : > { %3424 = vmatpush1.msra.mxu0 %v15342_v25  ;;  %3457 = vmatprep.mubr.f32.mxu0 %v14924_v54 }
 0x1c2   : > { %3179 = vmatmul.mubr.f32.vlgmr.msra.gmra.mxu1 %v2938_v24  ;;  %3583 = vmatprep.subr.mxu0 %v3500_v41  ;;  %v15417_v3 = vrot.slane %v15115_v43, %v15413_v1 }
 0x1c3   : > { %3463 = vmatmul.mubr.f32.vlgmr.msra.gmra.mxu0 %v15077_v50  ;;  %3295 = vmatpush1.xpose.msra.mxu1 %v15310_v34 }
 0x1c4   : > { %3329 = vmatprep.mubr.f32.mxu1 %v15279_v59  ;;  %3586 = vmatpush1.msra.mxu0 %v3506_v29  ;;  %v3967_v59 = vsub.f32 %v3965_v44, %v3966_v35  ;;  %v15420_v60 = vand.u32 4294901760, %v15417_v3 }
 0x1c5   : > { %3619 = vmatprep.mubr.f32.mxu0 %v14924_v54  ;;  %3504 = vmatprep.subr.mxu1 %v3503_v33 }
 0x1c6   : > { %3331 = vmatmul.mubr.f32.vlgmr.msra.gmra.mxu1 %v15286_v12  ;;  %3737 = vmatprep.subr.mxu0 %v3501_v8  ;;  %v3973_v12 = vsub.f32 %v3971_v47, %v3972_v51  ;;  %v3968_v63 = vand.u32 4294901760, %v3967_v59  ;;  %v15424_v5 = vsub.f32 %v15417_v3, %v15420_v60 }
 0x1c7   : > { %3622 = vmatmul.mubr.f32.vlgmr.msra.gmra.mxu0 %v15063_v39  ;;  %3510 = vmatpush1.msra.mxu1 %v3509_v2 }
 0x1c8   : > { %3543 = vmatprep.mubr.f32.mxu1 %v14924_v54  ;;  %3741 = vmatpush1.msra.mxu0 %v3507_v46  ;;  %v3974_v0 = vand.u32 4294901760, %v3973_v12  ;;  %v4446_v9 = vand.u32 4294901760, %v15424_v5 }
 0x1c9   : > { %3774 = vmatprep.mubr.f32.mxu0 %v14924_v54  ;;  %3659 = vmatprep.subr.mxu1 %v15337_v20 }
 0x1ca   : > { %3545 = vmatmul.mubr.f32.vlgmr.msra.gmra.mxu1 %v15060_v36  ;;  %3887 = vmatprep.subr.mxu0 %v15365_v49  ;;  %v4447_v10 = vsub.f32 %v15424_v5, %v4446_v9 }
 0x1cb   : > { %3776 = vmatmul.mubr.f32.vlgmr.msra.gmra.mxu0 %v15060_v36  ;;  %3661 = vmatpush1.msra.mxu1 %v15342_v25 }
 0x1cc   : > { %3694 = vmatprep.mubr.f32.mxu1 %v14924_v54  ;;  %3889 = vmatpush1.msra.mxu0 %v3888_v22  ;;  %v4448_v34 = vand.u32 4294901760, %v4447_v10 }
 0x1cd   : > { %3922 = vmatprep.mubr.f32.mxu0 %v14924_v54  ;;  %3813 = vmatprep.subr.mxu1 %v15337_v20 }
 0x1ce   : > { %3698 = vmatmul.mubr.f32.vlgmr.msra.gmra.mxu1 %v15069_v40  ;;  %4048 = vmatprep.subr.mxu0 %v3965_v44 }
 0x1cf   : > { %3928 = vmatmul.mubr.f32.vlgmr.msra.gmra.mxu0 %v15077_v50  ;;  %3815 = vmatpush1.msra.mxu1 %v15342_v25 }
 0x1d0   : > { %3848 = vmatprep.mubr.f32.mxu1 %v14924_v54  ;;  %4051 = vmatpush1.msra.mxu0 %v3971_v47 }
 0x1d1   : > { %4084 = vmatprep.mubr.f32.mxu0 %v14924_v54  ;;  %3969 = vmatprep.subr.mxu1 %v3968_v63 }
 0x1d2   : > { %3850 = vmatmul.mubr.f32.vlgmr.msra.gmra.mxu1 %v15060_v36  ;;  %4202 = vmatprep.subr.mxu0 %v3966_v35 }
 0x1d3   : > { %4087 = vmatmul.mubr.f32.vlgmr.msra.gmra.mxu0 %v15063_v39  ;;  %3975 = vmatpush1.msra.mxu1 %v3974_v0 }
 0x1d4   : > { %4008 = vmatprep.mubr.f32.mxu1 %v14924_v54  ;;  %4206 = vmatpush1.msra.mxu0 %v3972_v51 }
 0x1d5   : > { %4239 = vmatprep.mubr.f32.mxu0 %v14924_v54  ;;  %4124 = vmatprep.subr.mxu1 %v15365_v49 }
 0x1d6   : > { %4010 = vmatmul.mubr.f32.vlgmr.msra.gmra.mxu1 %v15060_v36 }
 0x1d7   : > { %4241 = vmatmul.mubr.f32.vlgmr.msra.gmra.mxu0 %v15060_v36  ;;  %4126 = vmatpush1.msra.mxu1 %v3888_v22 }
 0x1d8   : > { %4159 = vmatprep.mubr.f32.mxu1 %v14924_v54  ;;  %4278 = vmatprep.subr.mxu1 %v15365_v49 }
 0x1d9   : > { %4449 = vmatprep.mubr.f32.mxu0 %v4448_v34 }
 0x1da   : > { %4163 = vmatmul.mubr.f32.vlgmr.msra.gmra.mxu1 %v15069_v40 }
 0x1db   : > { %4280 = vmatpush1.msra.mxu1 %v3888_v22  ;;  %4313 = vmatprep.mubr.f32.mxu1 %v14924_v54 }
 0x1de   : > { %4315 = vmatmul.mubr.f32.vlgmr.msra.gmra.mxu1 %v15060_v36 }
 0x1df   : > { %4535 = vmatprep.mubr.f32.mxu1 %v15420_v60 }
 0x251   : > { %v1526_v13 = vpop.f32.mrf.mxu0 }
 0x253   : > { %v1528_v16 = vpop.f32.mrf.mxu0 }
 0x255   : > { %v1686_v11 = vpop.f32.mrf.mxu0 }
 0x257   : > { %v1688_v18 = vpop.f32.mrf.mxu0 }
 0x259   : > { %v1608_v14 = vpop.f32.mrf.mxu1  ;;  %v1842_v24 = vpop.f32.mrf.mxu0 }
 0x25a   : > { %v1609_v32 = vadd.f32 %v1608_v14, %v1526_v13 }
 0x25b   : > { %v1610_v52 = vpop.f32.mrf.mxu1  ;;  %v1844_v55 = vpop.f32.mrf.mxu0 }
 0x25c   : > { %v1687_v62 = vadd.f32 %v1686_v11, %v1609_v32 }
 0x25e   : > { %v1764_v6 = vpop.f32.mrf.mxu1  ;;  %v1998_v4 = vpop.f32.mrf.mxu0 }
 0x25f   : > { %v1765_v37 = vadd.f32 %v1764_v6, %v1687_v62 }
 0x260   : > { %v1766_v20 = vpop.f32.mrf.mxu1  ;;  %v2000_v21 = vpop.f32.mrf.mxu0 }
 0x261   : > { %v1843_v23 = vadd.f32 %v1842_v24, %v1765_v37 }
 0x262   : > { %v1916_v25 = vpop.f32.mrf.mxu1  ;;  %v2158_v27 = vpop.f32.mrf.mxu0 }
 0x263   : > { %v1917_v30 = vadd.f32 %v1916_v25, %v1843_v23 }
 0x264   : > { %v1918_v38 = vpop.f32.mrf.mxu1  ;;  %v2160_v41 = vpop.f32.mrf.mxu0 }
 0x265   : > { %v1999_v53 = vadd.f32 %v1998_v4, %v1917_v30  ;;  %v14469_v38 = vld [vmem:[%s16834_s2 + $0x4] sm:$0xf] }
 0x266   : > { %v2080_v7 = vpop.f32.mrf.mxu1  ;;  %v2314_v29 = vpop.f32.mrf.mxu0 }
 0x267   : > { %v2081_v28 = vadd.f32 %v2080_v7, %v1999_v53 }
 0x268   : > { %v2082_v8 = vpop.f32.mrf.mxu1  ;;  %v2316_v31 = vpop.f32.mrf.mxu0 }
 0x269   : > { %v2159_v46 = vadd.f32 %v2158_v27, %v2081_v28  ;;  %v3362_v28 = vrot.slane %v14469_v38, %v15137_v56 }
 0x26a   : > { %v2236_v42 = vpop.f32.mrf.mxu1  ;;  %v2470_v48 = vpop.f32.mrf.mxu0 }
 0x26b   : > { %v2237_v49 = vadd.f32 %v2236_v42, %v2159_v46  ;;  %v3366_v42 = vrot.slane %v14469_v38, %v15143_v61 }
 0x26c   : > { %v2238_v17 = vpop.f32.mrf.mxu1  ;;  %v2472_v22 = vpop.f32.mrf.mxu0 }
 0x26d   : > { %v2315_v33 = vadd.f32 %v2314_v29, %v2237_v49  ;;  %v1447_v17 = vpop.xlane.xlu0 %1446 }
 0x26e   : > { %v2388_v44 = vpop.f32.mrf.mxu1  ;;  %v2630_v2 = vpop.f32.mrf.mxu0 }
 0x26f   : > { %v2389_v47 = vadd.f32 %v2388_v44, %v2315_v33 }
 0x270   : > { %v2390_v35 = vpop.f32.mrf.mxu1  ;;  %v2632_v51 = vpop.f32.mrf.mxu0 }
 0x271   : > { %v3339_v29 = vrot.slane %v2389_v47, %v15137_v56 }
 0x272   : > { %v2552_v59 = vpop.f32.mrf.mxu1 }
 0x273   : > { %v2553_v12 = vadd.f32 %v2552_v59, %v2470_v48  ;;  %v2786_v63 = vpop.f32.mrf.mxu0  ;;  %v15437_v33 = vadd.f32 %v3339_v29, %v1447_v17 }
 0x274   : > { %v2554_v0 = vpop.f32.mrf.mxu1 }
 0x275   : > { %v2788_v10 = vpop.f32.mrf.mxu0  ;;  %v2631_v34 = vadd.f32 %v2630_v2, %v2553_v12  ;;  %v15445_v0 = vrot.slane %v15115_v43, %v15143_v61 }
 0x276   : > { %v2708_v13 = vpop.f32.mrf.mxu1 }
 0x277   : > { %v2709_v16 = vadd.f32 %v2708_v13, %v2631_v34  ;;  %v2942_v11 = vpop.f32.mrf.mxu0 }
 0x278   : > { %v2710_v18 = vpop.f32.mrf.mxu1 }
 0x279   : > { %v2944_v14 = vpop.f32.mrf.mxu0  ;;  %v2787_v24 = vadd.f32 %v2786_v63, %v2709_v16 }
 0x27a   : > { %v2860_v32 = vpop.f32.mrf.mxu1 }
 0x27b   : > { %v2861_v52 = vadd.f32 %v2860_v32, %v2787_v24  ;;  %v3102_v55 = vpop.f32.mrf.mxu0 }
 0x27c   : > { %v2862_v62 = vpop.f32.mrf.mxu1 }
 0x27d   : > { %v3104_v6 = vpop.f32.mrf.mxu0  ;;  %v2943_v4 = vadd.f32 %v2942_v11, %v2861_v52  ;;  %v15448_v11 = vand.u32 4294901760, %v15445_v0 }
 0x27e   : > { %v3024_v37 = vpop.f32.mrf.mxu1 }
 0x27f   : > { %v3025_v20 = vadd.f32 %v3024_v37, %v2943_v4  ;;  %v3258_v21 = vpop.f32.mrf.mxu0  ;;  %v15453_v43 = vsub.f32 %v15445_v0, %v15448_v11 }
 0x280   : > { %v3026_v23 = vpop.f32.mrf.mxu1 }
 0x281   : > { %v3260_v25 = vpop.f32.mrf.mxu0  ;;  %v3103_v27 = vadd.f32 %v3102_v55, %v3025_v20  ;;  %v3370_v55 = vrot.slane %v14469_v38, %v15155_v15  ;;  %v3374_v20 = vrot.slane %v14469_v38, %v15158_v19  ;;  %v4452_v29 = vand.u32 4294901760, %v15453_v43 }
 0x282   : > { %v3180_v30 = vpop.f32.mrf.mxu1 }
 0x283   : > { %v3181_v41 = vadd.f32 %v3180_v30, %v3103_v27  ;;  %v3464_v53 = vpop.f32.mrf.mxu0  ;;  %v15458_v30 = vrot.slane %v15166_v26, %v15413_v1 }
 0x284   : > { %v3182_v7 = vpop.f32.mrf.mxu1  ;;  %v3465_v44 = vadd.f32 %v3464_v53, %v3362_v28 }
 0x285   : > { %v3466_v8 = vpop.f32.mrf.mxu0  ;;  %v3259_v31 = vadd.f32 %v3258_v21, %v3181_v41  ;;  %v15470_v17 = vand.u32 4294901760, %v15458_v30 }
 0x286   : > { %v3332_v46 = vpop.f32.mrf.mxu1  ;;  %v3467_v59 = vadd.f32 %v3466_v8, %v3366_v42 }
 0x287   : > { %v3333_v48 = vadd.f32 %v3332_v46, %v3259_v31  ;;  %v3623_v49 = vpop.f32.mrf.mxu0 }
 0x288   : > { %v3334_v22 = vpop.f32.mrf.mxu1 }
 0x289   : > { %v15439_v2 = vmul.f32 2.0, %v3333_v48  ;;  %v3625_v35 = vpop.f32.mrf.mxu0 }
 0x28a   : > { %v3546_v51 = vpop.f32.mrf.mxu1 }
 0x28b   : > { %v3342_v47 = vsub.f32 %v15437_v33, %v15439_v2  ;;  %v3547_v12 = vadd.f32 %v3546_v51, %v3465_v44  ;;  %v3777_v63 = vpop.f32.mrf.mxu0  ;;  %v4453_v51 = vsub.f32 %v15453_v43, %v4452_v29 }
 0x28c   : > { %v3548_v10 = vpop.f32.mrf.mxu1 }
 0x28d   : > { %v3549_v34 = vadd.f32 %v3548_v10, %v3467_v59  ;;  %v3779_v13 = vpop.f32.mrf.mxu0  ;;  %v3624_v16 = vadd.f32 %v3623_v49, %v3547_v12  ;;  %v4340_v49 = vrot.slane %v15166_v26, %v15143_v61 }
 0x28e   : > { %v3699_v18 = vpop.f32.mrf.mxu1 }
 0x28f   : > { %v3700_v14 = vadd.f32 %v3699_v18, %v3624_v16  ;;  %v3929_v24 = vpop.f32.mrf.mxu0  ;;  %v3626_v32 = vadd.f32 %v3625_v35, %v3549_v34  ;;  %v15479_v10 = vand.u32 4294901760, %v4340_v49 }
 0x290   : > { %v3701_v52 = vpop.f32.mrf.mxu1  ;;  %v3930_v41 = vadd.f32 %v3929_v24, %v3370_v55  ;;  %v4454_v55 = vand.u32 4294901760, %v4453_v51 }
 0x291   : > { %v3702_v62 = vadd.f32 %v3701_v52, %v3626_v32  ;;  %v3931_v6 = vpop.f32.mrf.mxu0  ;;  %v3778_v4 = vadd.f32 %v3777_v63, %v3700_v14  ;;  %v15486_v14 = vsub.f32 %v15458_v30, %v15470_v17 }
 0x292   : > { %v3851_v37 = vpop.f32.mrf.mxu1  ;;  %v3932_v31 = vadd.f32 %v3931_v6, %v3374_v20  ;;  %v15494_v20 = vsub.f32 %v4340_v49, %v15479_v10 }
 0x293   : > { %v3852_v21 = vadd.f32 %v3851_v37, %v3778_v4  ;;  %v4088_v23 = vpop.f32.mrf.mxu0  ;;  %v3780_v25 = vadd.f32 %v3779_v13, %v3702_v62  ;;  %v4356_v37 = vrot.slane %v15417_v3, %v15143_v61 }
 0x294   : > { %v3853_v27 = vpop.f32.mrf.mxu1 }
 0x295   : > { %v15460_v53 = vmax.f32 %v3852_v21, 0.0  ;;  %v3854_v7 = vadd.f32 %v3853_v27, %v3780_v25  ;;  %v4090_v28 = vpop.f32.mrf.mxu0  ;;  %v4352_v27 = vrot.slane %v15445_v0, %v15143_v61 }
 0x296   : > { %v4011_v8 = vpop.f32.mrf.mxu1 }
 0x297   : > { %v4325_v38 = vmul.f32 %v15460_v53, %v15460_v53  ;;  %v15465_v46 = vmax.f32 %v3854_v7, 0.0  ;;  %v4012_v42 = vadd.f32 %v4011_v8, %v3930_v41  ;;  %v4242_v59 = vpop.f32.mrf.mxu0 }
 0x298   : > { %v4013_v48 = vpop.f32.mrf.mxu1 }
 0x299   : > { %v4326_v22 = vmul.f32 %v15465_v46, %v15465_v46  ;;  %v4014_v44 = vadd.f32 %v4013_v48, %v3932_v31  ;;  %v4089_v35 = vadd.f32 %v4088_v23, %v4012_v42  ;;  %v15477_v63 = vand.u32 4294901760, %v4325_v38  ;;  %v4244_v62 = vpop.f32.mrf.mxu0 }
 0x29a   : > { %v4164_v12 = vpop.f32.mrf.mxu1  ;;  %v4360_v48 = vrot.slane %v4340_v49, %v15143_v61 }
 0x29b   : > { %v4165_v34 = vadd.f32 %v4164_v12, %v4089_v35  ;;  %v4091_v26 = vadd.f32 %v4090_v28, %v4014_v44  ;;  %v15481_v13 = vand.u32 4294901760, %v4326_v22  ;;  %v4497_v18 = vsub.f32 %v4325_v38, %v15477_v63 }
 0x29c   : > { %v4166_v16 = vpop.f32.mrf.mxu1  ;;  %v4918_v28 = vand.u32 4294901760, %v15486_v14  ;;  %v4370_v3 = vmul.f32 %v4356_v37, %v4326_v22  ;;  %v4924_v44 = vand.u32 4294901760, %v15494_v20  ;;  %v4366_v35 = vmul.f32 %v4356_v37, %v15465_v46 }
 0x29d   : > { %v4167_v24 = vadd.f32 %v4166_v16, %v4091_v26  ;;  %4409 = vmatprep.subr.mxu0 %v15481_v13  ;;  %v4243_v32 = vadd.f32 %v4242_v59, %v4165_v34  ;;  %v4491_v52 = vsub.f32 %v4326_v22, %v15481_v13  ;;  %v4498_v4 = vand.u32 4294901760, %v4497_v18 }
 0x29e   : > { %v4316_v6 = vpop.f32.mrf.mxu1  ;;  %4411 = vmatpush1.xpose.msra.mxu0 %v15477_v63  ;;  %v4369_v12 = vmul.f32 %v4352_v27, %v4325_v38  ;;  %v4365_v34 = vmul.f32 %v4352_v27, %v15460_v53  ;;  %v4364_v26 = vrot.slane %v15458_v30, %v15143_v61  ;;  %v4919_v49 = vsub.f32 %v15486_v14, %v4918_v28 }
 0x29f   : > { %v4317_v21 = vadd.f32 %v4316_v6, %v4243_v32  ;;  %4574 = vmatprep.subr.mxu0 %v4491_v52  ;;  %v4245_v23 = vadd.f32 %v4244_v62, %v4167_v24  ;;  %v4492_v25 = vand.u32 4294901760, %v4491_v52  ;;  %v4499_v7 = vsub.f32 %v4497_v18, %v4498_v4 }
 0x2a0   : > { %v4318_v41 = vpop.f32.mrf.mxu1  ;;  %v4373_v38 = vadd.f32 %v4370_v3, %v4369_v12  ;;  %v4925_v30 = vsub.f32 %v15494_v20, %v4924_v44  ;;  %v15523_v32 = vand.u32 4294901760, %v4366_v35  ;;  %v15529_v6 = vand.u32 4294901760, %v4365_v34 }
 0x2a1   : > { %v15499_v8 = vmax.f32 %v4317_v21, 0.0  ;;  %v4319_v31 = vadd.f32 %v4318_v41, %v4245_v23  ;;  %4455 = vmatmul.mubr.f32.vlgmr.msra.gmra.mxu0 %v4454_v55  ;;  %v4493_v42 = vsub.f32 %v4491_v52, %v4492_v25  ;;  %v4500_v22 = vand.u32 4294901760, %v4499_v7 }
 0x2a2   : > { %4577 = vmatpush1.xpose.msra.mxu0 %v4497_v18  ;;  %4612 = vmatprep.mubr.f32.mxu0 %v15424_v5  ;;  %v4920_v23 = vand.u32 4294901760, %v4919_v49  ;;  %v15538_v41 = vand.u32 4294901760, %v15465_v46  ;;  %v15541_v7 = vsub.f32 %v4366_v35, %v15523_v32 }
 0x2a3   : > { %v4327_v0 = vmul.f32 %v15499_v8, %v15499_v8  ;;  %v15507_v51 = vmax.f32 %v4319_v31, 0.0  ;;  %4731 = vmatprep.subr.mxu0 %v4492_v25  ;;  %v4494_v59 = vand.u32 4294901760, %v4493_v42  ;;  %v4926_v25 = vand.u32 4294901760, %v4925_v30 }
 0x2a4   : > { %v15546_v42 = vsub.f32 %v4365_v34, %v15529_v6  ;;  %v5435_v35 = vsub.f32 %v15465_v46, %v15538_v41 }
 0x2a5   : > { %v4328_v16 = vmul.f32 %v15507_v51, %v15507_v51  ;;  %4495 = vmatprep.subr.mxu1 %v4494_v59  ;;  %4615 = vmatmul.mubr.f32.vlgmr.msra.gmra.mxu0 %v15453_v43  ;;  %v15518_v18 = vand.u32 4294901760, %v4327_v0  ;;  %v4371_v24 = vmul.f32 %v4360_v48, %v4327_v0  ;;  %v15551_v59 = vand.u32 4294901760, %v15460_v53 }
 0x2a6   : > { %4501 = vmatpush1.xpose.msra.mxu1 %v4500_v22  ;;  %4735 = vmatpush1.xpose.msra.mxu0 %v4498_v4  ;;  %v4368_v12 = vmul.f32 %v4364_v26, %v15507_v51  ;;  %v4367_v43 = vmul.f32 %v4360_v48, %v15499_v8  ;;  %v15587_v49 = vand.u32 4294901760, %v15507_v51 }
 0x2a7   : > { %4651 = vmatprep.subr.mxu1 %v15481_v13  ;;  %4769 = vmatprep.mubr.f32.mxu0 %v15420_v60  ;;  %v15527_v52 = vand.u32 4294901760, %v4328_v16  ;;  %v4372_v55 = vmul.f32 %v4364_v26, %v4328_v16  ;;  %v4374_v62 = vadd.f32 %v4373_v38, %v4371_v24  ;;  %v4969_v37 = vsub.f32 %v4327_v0, %v15518_v18  ;;  %v14470_v24 = vld [vmem:[%s16833_s1 + $0x20] sm:$0xff] }
 0x2a8   : > { %v5441_v46 = vsub.f32 %v15460_v53, %v15551_v59  ;;  %v15571_v34 = vand.u32 4294901760, %v4368_v12 }
 0x2a9   : > { %4537 = vmatmul.mubr.f32.vlgmr.msra.gmra.mxu1 %v15448_v11  ;;  %4771 = vmatmul.mubr.f32.vlgmr.msra.gmra.mxu0 %v15448_v11  ;;  %v4963_v4 = vsub.f32 %v4328_v16, %v15527_v52  ;;  %v4375_v21 = vadd.f32 %v4374_v62, %v4372_v55  ;;  %v4970_v27 = vand.u32 4294901760, %v4969_v37  ;;  %v15602_v62 = vand.u32 4294901760, %v15499_v8 }
 0x2aa   : > { %4881 = vmatprep.subr.mxu0 %v15527_v52  ;;  %4653 = vmatpush1.xpose.msra.mxu1 %v15477_v63  ;;  %v5442_v48 = vand.u32 4294901760, %v5441_v46  ;;  %v15590_v16 = vsub.f32 %v4368_v12, %v15571_v34 }
 0x2ab   : > { %4883 = vmatpush1.xpose.msra.mxu0 %v15518_v18  ;;  %4807 = vmatprep.subr.mxu1 %v15481_v13  ;;  %v4964_v31 = vand.u32 4294901760, %v4963_v4  ;;  %v4971_v0 = vsub.f32 %v4969_v37, %v4970_v27  ;;  %v5390_v13 = vand.u32 4294901760, %v15541_v7 }
 0x2ac   : > { %5046 = vmatprep.subr.mxu0 %v4963_v4  ;;  %4376 = vadd.xlane.f32.xlu0 %v4375_v21  ;;  %v5443_v55 = vsub.f32 %v5441_v46, %v5442_v48  ;;  %v5907_v21 = vsub.f32 %v15507_v51, %v15587_v49 }
 0x2ad   : > { %4689 = vmatprep.mubr.f32.mxu1 %v4446_v9  ;;  %4921 = vmatprep.mubr.f32.mxu0 %v4920_v23  ;;  %v4965_v3 = vsub.f32 %v4963_v4, %v4964_v31  ;;  %v5396_v9 = vand.u32 4294901760, %v15546_v42  ;;  %v6306_v4 = vcombine.high %v14470_v24, %v14470_v24 }
 0x2ae   : > { %4693 = vmatmul.mubr.f32.vlgmr.msra.gmra.mxu1 %v4452_v29  ;;  %4927 = vmatmul.mubr.f32.vlgmr.msra.gmra.mxu0 %v4926_v25  ;;  %v4972_v29 = vand.u32 4294901760, %v4971_v0 }
 0x2af   : > { %4809 = vmatpush1.xpose.msra.mxu1 %v15477_v63  ;;  %5049 = vmatpush1.xpose.msra.mxu0 %v4969_v37  ;;  %v4966_v5 = vand.u32 4294901760, %v4965_v3  ;;  %v5391_v63 = vsub.f32 %v15541_v7, %v5390_v13  ;;  %v5397_v53 = vsub.f32 %v15546_v42, %v5396_v9  ;;  %v14471_v3 = vld [vmem:[%s16833_s1 + $0x28] sm:$0xff] }
 0x2b0   : > { %5203 = vmatprep.subr.mxu0 %v4964_v31  ;;  %4843 = vmatprep.mubr.f32.mxu1 %v15420_v60  ;;  %v5436_v60 = vand.u32 4294901760, %v5435_v35 }
 0x2b1   : > { %5084 = vmatprep.mubr.f32.mxu0 %v15486_v14  ;;  %4967 = vmatprep.subr.mxu1 %v4966_v5  ;;  %v5392_v22 = vand.u32 4294901760, %v5391_v63  ;;  %v5398_v38 = vand.u32 4294901760, %v5397_v53  ;;  %v5444_v14 = vand.u32 4294901760, %v5443_v55  ;;  %v6307_v5 = vcombine.high %v14471_v3, %v14471_v3  ;;  %v15719_v55 = vld [vmem:[%s15112_s24] sm:$0xff] }
 0x2b2   : > { %4845 = vmatmul.mubr.f32.vlgmr.msra.gmra.mxu1 %v15448_v11  ;;  %5087 = vmatmul.mubr.f32.vlgmr.msra.gmra.mxu0 %v15494_v20  ;;  %v15578_v11 = vand.u32 4294901760, %v4367_v43  ;;  %v5437_v26 = vsub.f32 %v5435_v35, %v5436_v60 }
 0x2b3   : > { %4973 = vmatpush1.xpose.msra.mxu1 %v4972_v29  ;;  %5207 = vmatpush1.xpose.msra.mxu0 %v4970_v27 }
 0x2b4   : > { %5123 = vmatprep.subr.mxu1 %v15527_v52  ;;  %5353 = vmatprep.subr.mxu0 %v15538_v41  ;;  %v15597_v30 = vsub.f32 %v4367_v43, %v15578_v11  ;;  %v5438_v37 = vand.u32 4294901760, %v5437_v26 }
 0x2b5   : > { %5007 = vmatprep.mubr.f32.mxu1 %v15470_v17  ;;  %5241 = vmatprep.mubr.f32.mxu0 %v15470_v17 }
 0x2b6   : > { %5009 = vmatmul.mubr.f32.vlgmr.msra.gmra.mxu1 %v15479_v10  ;;  %5243 = vmatmul.mubr.f32.vlgmr.msra.gmra.mxu0 %v15479_v10  ;;  %v5868_v20 = vand.u32 4294901760, %v15597_v30 }
 0x2b7   : > { %5125 = vmatpush1.xpose.msra.mxu1 %v15518_v18  ;;  %5355 = vmatpush1.xpose.msra.mxu0 %v15551_v59 }
 0x2b8   : > { %5393 = vmatprep.mubr.f32.mxu0 %v5392_v22  ;;  %5279 = vmatprep.subr.mxu1 %v15527_v52  ;;  %v5862_v52 = vand.u32 4294901760, %v15590_v16 }
 0x2b9   : > { %5518 = vmatprep.subr.mxu0 %v5435_v35  ;;  %5161 = vmatprep.mubr.f32.mxu1 %v4918_v28  ;;  %v5913_v28 = vsub.f32 %v15499_v8, %v15602_v62 }
 0x2ba   : > { %5165 = vmatmul.mubr.f32.vlgmr.msra.gmra.mxu1 %v4924_v44  ;;  %5399 = vmatmul.mubr.f32.vlgmr.msra.gmra.mxu0 %v5398_v38  ;;  %v6310_v44 = vsel %vm311_vm0, %v6306_v4, 0  ;;  %v5863_v51 = vsub.f32 %v15590_v16, %v5862_v52  ;;  %v15712_v38 = vld [vmem:[%s15709_s15] ss:$0 sm:$0xff] }
 0x2bb   : > { %5281 = vmatpush1.xpose.msra.mxu1 %v15518_v18  ;;  %5521 = vmatpush1.xpose.msra.mxu0 %v5441_v46  ;;  %v6308_v18 = vsel %vm311_vm0, %v14470_v24, 0  ;;  %v5914_v8 = vand.u32 4294901760, %v5913_v28  ;;  %v15629_v23 = vand.u32 4294901760, %v6310_v44  ;;  %v16839_v24 = vmov 3  }
 0x2bc   : > { %5556 = vmatprep.mubr.f32.mxu0 %v15541_v7  ;;  %5439 = vmatprep.subr.mxu1 %v5438_v37  ;;  %v5864_v25 = vand.u32 4294901760, %v5863_v51  ;;  %v15634_v31 = vand.u32 4294901760, %v6308_v18 }
 0x2bd   : > { %5675 = vmatprep.subr.mxu0 %v5436_v60  ;;  %5315 = vmatprep.mubr.f32.mxu1 %v15470_v17  ;;  %v5908_v17 = vand.u32 4294901760, %v5907_v21  ;;  %v5915_v35 = vsub.f32 %v5913_v28, %v5914_v8  ;;  %v6425_v12 = vsub.f32 %v6310_v44, %v15629_v23 }
 0x2be   : > { %5317 = vmatmul.mubr.f32.vlgmr.msra.gmra.mxu1 %v15479_v10  ;;  %5559 = vmatmul.mubr.f32.vlgmr.msra.gmra.mxu0 %v15546_v42  ;;  %v5869_v10 = vsub.f32 %v15597_v30, %v5868_v20  ;;  %v6431_v7 = vsub.f32 %v6308_v18, %v15634_v31  ;;  %v6314_v42 = vsel %vm311_vm0, %v6307_v5, 0 }
 0x2bf   : > { %5445 = vmatpush1.xpose.msra.mxu1 %v5444_v14  ;;  %5479 = vmatprep.mubr.f32.mxu1 %v15523_v32  ;;  %v5909_v27 = vsub.f32 %v5907_v21, %v5908_v17  ;;  %v15657_v29 = vand.u32 4294901760, %v6314_v42 }
 0x2c0   : > { %5679 = vmatpush1.xpose.msra.mxu0 %v5442_v48  ;;  %5713 = vmatprep.mubr.f32.mxu0 %v15523_v32  ;;  %v5870_v0 = vand.u32 4294901760, %v5869_v10 }
 0x2c1   : > { %5595 = vmatprep.subr.mxu1 %v15538_v41  ;;  %5825 = vmatprep.subr.mxu0 %v15587_v49  ;;  %v5910_v43 = vand.u32 4294901760, %v5909_v27  ;;  %v6890_v60 = vsub.f32 %v6314_v42, %v15657_v29 }
 0x2c2   : > { %5481 = vmatmul.mubr.f32.vlgmr.msra.gmra.mxu1 %v15529_v6  ;;  %14798 = vset.pattern.permute.xlu1 %v16839_v24 }
 0x2c3   : > { %5715 = vmatmul.mubr.f32.vlgmr.msra.gmra.mxu0 %v15529_v6  ;;  %5597 = vmatpush1.xpose.msra.mxu1 %v15551_v59  ;;  %v6891_v22 = vand.u32 4294901760, %v6890_v60 }
 0x2c4   : > { %5633 = vmatprep.mubr.f32.mxu1 %v5390_v13  ;;  %5827 = vmatpush1.xpose.msra.mxu0 %v15602_v62  ;;  %v6426_v13 = vand.u32 4294901760, %v6425_v12 }
 0x2c5   : > { %5865 = vmatprep.mubr.f32.mxu0 %v5864_v25  ;;  %5751 = vmatprep.subr.mxu1 %v15538_v41  ;;  %v5916_v41 = vand.u32 4294901760, %v5915_v35 }
 0x2c6   : > { %5990 = vmatprep.subr.mxu0 %v5907_v21  ;;  %5637 = vmatmul.mubr.f32.vlgmr.msra.gmra.mxu1 %v5396_v9  ;;  %v6427_v9 = vsub.f32 %v6425_v12, %v6426_v13 }
 0x2c7   : > { %5871 = vmatmul.mubr.f32.vlgmr.msra.gmra.mxu0 %v5870_v0  ;;  %5753 = vmatpush1.xpose.msra.mxu1 %v15551_v59  ;;  %v6432_v59 = vand.u32 4294901760, %v6431_v7 }
 0x2c8   : > { %5787 = vmatprep.mubr.f32.mxu1 %v15523_v32  ;;  %5993 = vmatpush1.xpose.msra.mxu0 %v5913_v28  ;;  %v6312_v32 = vsel %vm311_vm0, %v14471_v3, 0  ;;  %v6428_v63 = vand.u32 4294901760, %v6427_v9 }
 0x2c9   : > { %6028 = vmatprep.mubr.f32.mxu0 %v15590_v16  ;;  %5911 = vmatprep.subr.mxu1 %v5910_v43  ;;  %v6813_v46 = vand.u32 4294901760, %v6312_v32 }
 0x2ca   : > { %6147 = vmatprep.subr.mxu0 %v5908_v17  ;;  %5789 = vmatmul.mubr.f32.vlgmr.msra.gmra.mxu1 %v15529_v6  ;;  %v6433_v6 = vsub.f32 %v6431_v7, %v6432_v59 }
 0x2cb   : > { %6031 = vmatmul.mubr.f32.vlgmr.msra.gmra.mxu0 %v15597_v30  ;;  %5917 = vmatpush1.xpose.msra.mxu1 %v5916_v41  ;;  %v6896_v48 = vsub.f32 %v6312_v32, %v6813_v46  ;;  %v15716_v30 = vsub.s32 6, %v15052_v57 }
 0x2cc   : > { %5951 = vmatprep.mubr.f32.mxu1 %v15571_v34  ;;  %6151 = vmatpush1.xpose.msra.mxu0 %v5914_v8  ;;  %v6434_v53 = vand.u32 4294901760, %v6433_v6 }
 0x2cd   : > { %6185 = vmatprep.mubr.f32.mxu0 %v15571_v34  ;;  %6067 = vmatprep.subr.mxu1 %v15587_v49  ;;  %v6897_v26 = vand.u32 4294901760, %v6896_v48 }
 0x2ce   : > { %5953 = vmatmul.mubr.f32.vlgmr.msra.gmra.mxu1 %v15578_v11  ;;  %6347 = vmatprep.subr.mxu0 %v15629_v23 }
 0x2cf   : > { %6187 = vmatmul.mubr.f32.vlgmr.msra.gmra.mxu0 %v15578_v11  ;;  %6069 = vmatpush1.xpose.msra.mxu1 %v15602_v62 }
 0x2d0   : > { %6105 = vmatprep.mubr.f32.mxu1 %v5862_v52  ;;  %6223 = vmatprep.subr.mxu1 %v15587_v49 }
 0x2d1   : > { %6349 = vmatpush1.msra.mxu0 %v15634_v31  ;;  %6382 = vmatprep.mubr.f32.mxu0 %v14924_v54 }
 0x2d2   : > { %6109 = vmatmul.mubr.f32.vlgmr.msra.gmra.mxu1 %v5868_v20  ;;  %6508 = vmatprep.subr.mxu0 %v6425_v12  ;;  %v16841_v20 = vmov 1  }
 0x2d3   : > { %6388 = vmatmul.mubr.f32.vlgmr.msra.gmra.mxu0 %v15077_v50  ;;  %6225 = vmatpush1.xpose.msra.mxu1 %v15602_v62  ;;  %v15723_v62 = vrot.slane %v15719_v55, %v15716_v30 }
 0x2d4   : > { %6259 = vmatprep.mubr.f32.mxu1 %v15571_v34  ;;  %6511 = vmatpush1.msra.mxu0 %v6431_v7  ;;  %v6892_v34 = vsub.f32 %v6890_v60, %v6891_v22 }
 0x2d5   : > { %6544 = vmatprep.mubr.f32.mxu0 %v14924_v54  ;;  %6429 = vmatprep.subr.mxu1 %v6428_v63  ;;  %v15726_v37 = vand.u32 4294901760, %v15723_v62 }
 0x2d6   : > { %6261 = vmatmul.mubr.f32.vlgmr.msra.gmra.mxu1 %v15578_v11  ;;  %6662 = vmatprep.subr.mxu0 %v6426_v13  ;;  %v6898_v11 = vsub.f32 %v6896_v48, %v6897_v26  ;;  %v6893_v49 = vand.u32 4294901760, %v6892_v34 }
 0x2d7   : > { %6547 = vmatmul.mubr.f32.vlgmr.msra.gmra.mxu0 %v15063_v39  ;;  %6435 = vmatpush1.msra.mxu1 %v6434_v53  ;;  %v15730_v4 = vsub.f32 %v15723_v62, %v15726_v37 }
 0x2d8   : > { %6468 = vmatprep.mubr.f32.mxu1 %v14924_v54  ;;  %6666 = vmatpush1.msra.mxu0 %v6432_v59  ;;  %v6899_v16 = vand.u32 4294901760, %v6898_v11 }
 0x2d9   : > { %6699 = vmatprep.mubr.f32.mxu0 %v14924_v54  ;;  %6584 = vmatprep.subr.mxu1 %v15629_v23  ;;  %v7371_v52 = vand.u32 4294901760, %v15730_v4 }
 0x2da   : > { %6470 = vmatmul.mubr.f32.vlgmr.msra.gmra.mxu1 %v15060_v36  ;;  %6812 = vmatprep.subr.mxu0 %v15657_v29 }
 0x2db   : > { %6701 = vmatmul.mubr.f32.vlgmr.msra.gmra.mxu0 %v15060_v36  ;;  %6586 = vmatpush1.msra.mxu1 %v15634_v31  ;;  %v7372_v21 = vsub.f32 %v15730_v4, %v7371_v52 }
 0x2dc   : > { %6619 = vmatprep.mubr.f32.mxu1 %v14924_v54  ;;  %6814 = vmatpush1.msra.mxu0 %v6813_v46 }
 0x2dd   : > { %6847 = vmatprep.mubr.f32.mxu0 %v14924_v54  ;;  %6738 = vmatprep.subr.mxu1 %v15629_v23  ;;  %v7373_v14 = vand.u32 4294901760, %v7372_v21 }
 0x2de   : > { %6623 = vmatmul.mubr.f32.vlgmr.msra.gmra.mxu1 %v15069_v40  ;;  %6973 = vmatprep.subr.mxu0 %v6890_v60 }
 0x2df   : > { %6853 = vmatmul.mubr.f32.vlgmr.msra.gmra.mxu0 %v15077_v50  ;;  %6740 = vmatpush1.msra.mxu1 %v15634_v31 }
 0x2e0   : > { %6773 = vmatprep.mubr.f32.mxu1 %v14924_v54  ;;  %6976 = vmatpush1.msra.mxu0 %v6896_v48 }
 0x2e1   : > { %7009 = vmatprep.mubr.f32.mxu0 %v14924_v54  ;;  %6894 = vmatprep.subr.mxu1 %v6893_v49 }
 0x2e2   : > { %6775 = vmatmul.mubr.f32.vlgmr.msra.gmra.mxu1 %v15060_v36  ;;  %7127 = vmatprep.subr.mxu0 %v6891_v22 }
 0x2e3   : > { %7012 = vmatmul.mubr.f32.vlgmr.msra.gmra.mxu0 %v15063_v39  ;;  %6900 = vmatpush1.msra.mxu1 %v6899_v16 }
 0x2e4   : > { %6933 = vmatprep.mubr.f32.mxu1 %v14924_v54  ;;  %7131 = vmatpush1.msra.mxu0 %v6897_v26 }
 0x2e5   : > { %7164 = vmatprep.mubr.f32.mxu0 %v14924_v54  ;;  %7049 = vmatprep.subr.mxu1 %v15657_v29 }
 0x2e6   : > { %6935 = vmatmul.mubr.f32.vlgmr.msra.gmra.mxu1 %v15060_v36  ;;  %12124 = vperm.xlu1 %14798, %v15712_v38  }
 0x2e7   : > { %7166 = vmatmul.mubr.f32.vlgmr.msra.gmra.mxu0 %v15060_v36  ;;  %7051 = vmatpush1.msra.mxu1 %v6813_v46 }
 0x2e8   : > { %7084 = vmatprep.mubr.f32.mxu1 %v14924_v54  ;;  %7203 = vmatprep.subr.mxu1 %v15657_v29 }
 0x2e9   : > { %7374 = vmatprep.mubr.f32.mxu0 %v7373_v14 }
 0x2ea   : > { %7088 = vmatmul.mubr.f32.vlgmr.msra.gmra.mxu1 %v15069_v40  ;;  %14800 = vset.pattern.permute.xlu1 %v16841_v20 }
 0x2eb   : > { %7205 = vmatpush1.msra.mxu1 %v6813_v46  ;;  %7238 = vmatprep.mubr.f32.mxu1 %v14924_v54 }
 0x2ee   : > { %7240 = vmatmul.mubr.f32.vlgmr.msra.gmra.mxu1 %v15060_v36 }
 0x2ef   : > { %7460 = vmatprep.mubr.f32.mxu1 %v15726_v37 }
 0x361   : > { %v4456_v28 = vpop.f32.mrf.mxu0 }
 0x363   : > { %v4458_v44 = vpop.f32.mrf.mxu0 }
 0x365   : > { %v4616_v51 = vpop.f32.mrf.mxu0 }
 0x367   : > { %v4618_v17 = vpop.f32.mrf.mxu0 }
 0x369   : > { %v4538_v18 = vpop.f32.mrf.mxu1  ;;  %v4772_v10 = vpop.f32.mrf.mxu0 }
 0x36a   : > { %v4539_v8 = vadd.f32 %v4538_v18, %v4456_v28 }
 0x36b   : > { %v4540_v23 = vpop.f32.mrf.mxu1  ;;  %v4774_v25 = vpop.f32.mrf.mxu0 }
 0x36c   : > { %v4617_v27 = vadd.f32 %v4616_v51, %v4539_v8 }
 0x36e   : > { %v4694_v31 = vpop.f32.mrf.mxu1  ;;  %v4928_v3 = vpop.f32.mrf.mxu0 }
 0x36f   : > { %v4695_v0 = vadd.f32 %v4694_v31, %v4617_v27 }
 0x370   : > { %v4696_v35 = vpop.f32.mrf.mxu1  ;;  %v4930_v12 = vpop.f32.mrf.mxu0 }
 0x371   : > { %v4773_v5 = vadd.f32 %v4772_v10, %v4695_v0 }
 0x372   : > { %v4846_v43 = vpop.f32.mrf.mxu1  ;;  %v5088_v7 = vpop.f32.mrf.mxu0 }
 0x373   : > { %v4847_v41 = vadd.f32 %v4846_v43, %v4773_v5 }
 0x374   : > { %v4848_v13 = vpop.f32.mrf.mxu1  ;;  %v5090_v42 = vpop.f32.mrf.mxu0 }
 0x375   : > { %v4929_v59 = vadd.f32 %v4928_v3, %v4847_v41 }
 0x376   : > { %v5010_v32 = vpop.f32.mrf.mxu1  ;;  %v5244_v9 = vpop.f32.mrf.mxu0 }
 0x377   : > { %v5011_v29 = vadd.f32 %v5010_v32, %v4929_v59 }
 0x378   : > { %v5012_v6 = vpop.f32.mrf.mxu1  ;;  %v5246_v46 = vpop.f32.mrf.mxu0 }
 0x379   : > { %v5089_v63 = vadd.f32 %v5088_v7, %v5011_v29  ;;  %v14472_v6 = vld [vmem:[%s16834_s2 + $0x8] sm:$0xf] }
 0x37a   : > { %v5166_v60 = vpop.f32.mrf.mxu1  ;;  %v5400_v53 = vpop.f32.mrf.mxu0 }
 0x37b   : > { %v5167_v48 = vadd.f32 %v5166_v60, %v5089_v63 }
 0x37c   : > { %v5168_v22 = vpop.f32.mrf.mxu1  ;;  %v5402_v26 = vpop.f32.mrf.mxu0 }
 0x37d   : > { %v5245_v34 = vadd.f32 %v5244_v9, %v5167_v48  ;;  %v6287_v48 = vrot.slane %v14472_v6, %v15137_v56 }
 0x37e   : > { %v5318_v11 = vpop.f32.mrf.mxu1  ;;  %v5560_v49 = vpop.f32.mrf.mxu0 }
 0x37f   : > { %v5319_v16 = vadd.f32 %v5318_v11, %v5245_v34  ;;  %v6291_v11 = vrot.slane %v14472_v6, %v15143_v61 }
 0x380   : > { %v5320_v21 = vpop.f32.mrf.mxu1  ;;  %v5562_v14 = vpop.f32.mrf.mxu0 }
 0x381   : > { %v4377_v14 = vpop.xlane.xlu0 %4376 }
 0x382   : > { %v5482_v28 = vpop.f32.mrf.mxu1 }
 0x383   : > { %v5483_v44 = vadd.f32 %v5482_v28, %v5400_v53  ;;  %v5716_v51 = vpop.f32.mrf.mxu0  ;;  %v6269_v53 = vrot.slane %v5319_v16, %v15137_v56  ;;  %v15750_v16 = vrot.slane %v15719_v55, %v15155_v15 }
 0x384   : > { %v5484_v17 = vpop.f32.mrf.mxu1 }
 0x385   : > { %v5718_v18 = vpop.f32.mrf.mxu0  ;;  %v5561_v10 = vadd.f32 %v5560_v49, %v5483_v44  ;;  %v15744_v44 = vadd.f32 %v6269_v53, %v4377_v14 }
 0x386   : > { %v5638_v8 = vpop.f32.mrf.mxu1 }
 0x387   : > { %v5639_v23 = vadd.f32 %v5638_v8, %v5561_v10  ;;  %v5872_v25 = vpop.f32.mrf.mxu0 }
 0x388   : > { %v5640_v27 = vpop.f32.mrf.mxu1 }
 0x389   : > { %v5874_v31 = vpop.f32.mrf.mxu0  ;;  %v5717_v3 = vadd.f32 %v5716_v51, %v5639_v23 }
 0x38a   : > { %v5790_v0 = vpop.f32.mrf.mxu1 }
 0x38b   : > { %v5791_v35 = vadd.f32 %v5790_v0, %v5717_v3  ;;  %v6032_v12 = vpop.f32.mrf.mxu0  ;;  %v15755_v3 = vand.u32 4294901760, %v15750_v16 }
 0x38c   : > { %v5792_v5 = vpop.f32.mrf.mxu1 }
 0x38d   : > { %v6034_v43 = vpop.f32.mrf.mxu0  ;;  %v5873_v7 = vadd.f32 %v5872_v25, %v5791_v35 }
 0x38e   : > { %v5954_v41 = vpop.f32.mrf.mxu1 }
 0x38f   : > { %v5955_v13 = vadd.f32 %v5954_v41, %v5873_v7  ;;  %v6188_v42 = vpop.f32.mrf.mxu0 }
 0x390   : > { %v5956_v59 = vpop.f32.mrf.mxu1 }
 0x391   : > { %v6190_v32 = vpop.f32.mrf.mxu0  ;;  %v6033_v9 = vadd.f32 %v6032_v12, %v5955_v13  ;;  %v6295_v59 = vrot.slane %v14472_v6, %v15155_v15 }
 0x392   : > { %v6110_v29 = vpop.f32.mrf.mxu1 }
 0x393   : > { %v6111_v46 = vadd.f32 %v6110_v29, %v6033_v9  ;;  %v6389_v63 = vpop.f32.mrf.mxu0 }
 0x394   : > { %v6112_v60 = vpop.f32.mrf.mxu1  ;;  %v6390_v51 = vadd.f32 %v6389_v63, %v6287_v48  ;;  %v6299_v63 = vrot.slane %v14472_v6, %v15158_v19 }
 0x395   : > { %v6391_v22 = vpop.f32.mrf.mxu0  ;;  %v6189_v26 = vadd.f32 %v6188_v42, %v6111_v46  ;;  %v15759_v42 = vsub.f32 %v15750_v16, %v15755_v3 }
 0x396   : > { %v6262_v34 = vpop.f32.mrf.mxu1  ;;  %v6392_v8 = vadd.f32 %v6391_v22, %v6291_v11 }
 0x397   : > { %v6263_v49 = vadd.f32 %v6262_v34, %v6189_v26  ;;  %v6548_v21 = vpop.f32.mrf.mxu0  ;;  %v7377_v26 = vand.u32 4294901760, %v15759_v42 }
 0x398   : > { %v6264_v28 = vpop.f32.mrf.mxu1 }
 0x399   : > { %v15746_v17 = vmul.f32 2.0, %v6263_v49  ;;  %v6550_v18 = vpop.f32.mrf.mxu0 }
 0x39a   : > { %v6471_v10 = vpop.f32.mrf.mxu1 }
 0x39b   : > { %v6272_v23 = vsub.f32 %v15744_v44, %v15746_v17  ;;  %v6472_v25 = vadd.f32 %v6471_v10, %v6390_v51  ;;  %v6702_v27 = vpop.f32.mrf.mxu0 }
 0x39c   : > { %v6473_v31 = vpop.f32.mrf.mxu1 }
 0x39d   : > { %v6474_v0 = vadd.f32 %v6473_v31, %v6392_v8  ;;  %v6704_v35 = vpop.f32.mrf.mxu0  ;;  %v6549_v12 = vadd.f32 %v6548_v21, %v6472_v25  ;;  %v15767_v21 = vld [vmem:[%s15112_s24 + $0x8] sm:$0xff]  ;;  %v7378_v31 = vsub.f32 %v15759_v42, %v7377_v26 }
 0x39e   : > { %v6624_v5 = vpop.f32.mrf.mxu1  ;;  %v7269_v14 = vrot.slane %v15767_v21, %v15716_v30  ;;  %v7265_v6 = vrot.slane %v15767_v21, %v15155_v15 }
 0x39f   : > { %v6625_v43 = vadd.f32 %v6624_v5, %v6549_v12  ;;  %v6854_v7 = vpop.f32.mrf.mxu0  ;;  %v6551_v41 = vadd.f32 %v6550_v18, %v6474_v0 }
 0x3a0   : > { %v6626_v13 = vpop.f32.mrf.mxu1  ;;  %v6855_v34 = vadd.f32 %v6854_v7, %v6295_v59  ;;  %v15782_v12 = vand.u32 4294901760, %v7269_v14  ;;  %v15784_v5 = vand.u32 4294901760, %v7265_v6 }
 0x3a1   : > { %v6627_v32 = vadd.f32 %v6626_v13, %v6551_v41  ;;  %v6856_v9 = vpop.f32.mrf.mxu0  ;;  %v6703_v29 = vadd.f32 %v6702_v27, %v6625_v43 }
 0x3a2   : > { %v6776_v46 = vpop.f32.mrf.mxu1  ;;  %v6857_v18 = vadd.f32 %v6856_v9, %v6299_v63 }
 0x3a3   : > { %v6777_v60 = vadd.f32 %v6776_v46, %v6703_v29  ;;  %v7013_v53 = vpop.f32.mrf.mxu0  ;;  %v6705_v48 = vadd.f32 %v6704_v35, %v6627_v32  ;;  %v7379_v46 = vand.u32 4294901760, %v7378_v31  ;;  %v7277_v31 = vrot.slane %v15750_v16, %v15155_v15 }
 0x3a4   : > { %v6778_v22 = vpop.f32.mrf.mxu1 }
 0x3a5   : > { %v15764_v11 = vmax.f32 %v6777_v60, 0.0  ;;  %v6779_v49 = vadd.f32 %v6778_v22, %v6705_v48  ;;  %v7015_v28 = vpop.f32.mrf.mxu0  ;;  %v15794_v22 = vsub.f32 %v7269_v14, %v15782_v12 }
 0x3a6   : > { %v6936_v51 = vpop.f32.mrf.mxu1 }
 0x3a7   : > { %v7250_v10 = vmul.f32 %v15764_v11, %v15764_v11  ;;  %v15775_v8 = vmax.f32 %v6779_v49, 0.0  ;;  %v6937_v25 = vadd.f32 %v6936_v51, %v6855_v34  ;;  %v7167_v43 = vpop.f32.mrf.mxu0  ;;  %v7281_v34 = vrot.slane %v15723_v62, %v15155_v15 }
 0x3a8   : > { %v6938_v27 = vpop.f32.mrf.mxu1  ;;  %v7843_v62 = vand.u32 4294901760, %v15794_v22 }
 0x3a9   : > { %v7251_v0 = vmul.f32 %v15775_v8, %v15775_v8  ;;  %v6939_v35 = vadd.f32 %v6938_v27, %v6857_v18  ;;  %v7014_v7 = vadd.f32 %v7013_v53, %v6937_v25  ;;  %v15786_v13 = vand.u32 4294901760, %v7250_v10  ;;  %v7169_v49 = vpop.f32.mrf.mxu0 }
 0x3aa   : > { %v7089_v41 = vpop.f32.mrf.mxu1  ;;  %v15797_v53 = vsub.f32 %v7265_v6, %v15784_v5  ;;  %v15843_v20 = vand.u32 4294901760, %v15775_v8 }
 0x3ab   : > { %v7016_v59 = vadd.f32 %v7015_v28, %v6939_v35  ;;  %v15788_v32 = vand.u32 4294901760, %v7251_v0  ;;  %v7090_v9 = vadd.f32 %v7089_v41, %v7014_v7  ;;  %v7422_v63 = vsub.f32 %v7250_v10, %v15786_v13 }
 0x3ac   : > { %v7091_v29 = vpop.f32.mrf.mxu1 }
 0x3ad   : > { %v7092_v60 = vadd.f32 %v7091_v29, %v7016_v59  ;;  %7334 = vmatprep.subr.mxu0 %v15788_v32  ;;  %v7416_v48 = vsub.f32 %v7251_v0, %v15788_v32  ;;  %v7168_v28 = vadd.f32 %v7167_v43, %v7090_v9  ;;  %v7423_v18 = vand.u32 4294901760, %v7422_v63 }
 0x3ae   : > { %v7241_v51 = vpop.f32.mrf.mxu1  ;;  %7336 = vmatpush1.xpose.msra.mxu0 %v15786_v13  ;;  %v7849_v43 = vand.u32 4294901760, %v15797_v53  ;;  %v7291_v9 = vmul.f32 %v7281_v34, %v15775_v8 }
 0x3af   : > { %7499 = vmatprep.subr.mxu0 %v7416_v48  ;;  %v7170_v25 = vadd.f32 %v7169_v49, %v7092_v60  ;;  %v7417_v27 = vand.u32 4294901760, %v7416_v48  ;;  %v7242_v35 = vadd.f32 %v7241_v51, %v7168_v28  ;;  %v7424_v41 = vsub.f32 %v7422_v63, %v7423_v18 }
 0x3b0   : > { %v7243_v7 = vpop.f32.mrf.mxu1  ;;  %v7295_v60 = vmul.f32 %v7281_v34, %v7251_v0  ;;  %v7285_v28 = vrot.slane %v7265_v6, %v15155_v15  ;;  %v7844_v0 = vsub.f32 %v15794_v22, %v7843_v62  ;;  %v15826_v6 = vand.u32 4294901760, %v7291_v9 }
 0x3b1   : > { %v7244_v59 = vadd.f32 %v7243_v7, %v7170_v25  ;;  %7380 = vmatmul.mubr.f32.vlgmr.msra.gmra.mxu0 %v7379_v46  ;;  %v7418_v29 = vsub.f32 %v7416_v48, %v7417_v27  ;;  %v15807_v24 = vmax.f32 %v7242_v35, 0.0  ;;  %v7289_v46 = vrot.slane %v7269_v14, %v15155_v15 }
 0x3b2   : > { %7502 = vmatpush1.xpose.msra.mxu0 %v7422_v63  ;;  %7537 = vmatprep.mubr.f32.mxu0 %v15730_v4  ;;  %v7290_v48 = vmul.f32 %v7277_v31, %v15764_v11  ;;  %v7425_v25 = vand.u32 4294901760, %v7424_v41  ;;  %v7294_v35 = vmul.f32 %v7277_v31, %v7250_v10  ;;  %v7850_v14 = vsub.f32 %v15797_v53, %v7849_v43 }
 0x3b3   : > { %v15810_v49 = vmax.f32 %v7244_v59, 0.0  ;;  %7656 = vmatprep.subr.mxu0 %v7417_v27  ;;  %v7419_v16 = vand.u32 4294901760, %v7418_v29  ;;  %v7252_v51 = vmul.f32 %v15807_v24, %v15807_v24 }
 0x3b4   : > { %v7298_v27 = vadd.f32 %v7295_v60, %v7294_v35  ;;  %v15834_v41 = vand.u32 4294901760, %v7290_v48  ;;  %v7851_v60 = vand.u32 4294901760, %v7850_v14 }
 0x3b5   : > { %v7253_v63 = vmul.f32 %v15810_v49, %v15810_v49  ;;  %7420 = vmatprep.subr.mxu1 %v7419_v16  ;;  %7540 = vmatmul.mubr.f32.vlgmr.msra.gmra.mxu0 %v15759_v42  ;;  %v15828_v34 = vand.u32 4294901760, %v7252_v51  ;;  %v7296_v10 = vmul.f32 %v7285_v28, %v7252_v51  ;;  %v7845_v16 = vand.u32 4294901760, %v7844_v0 }
 0x3b6   : > { %7426 = vmatpush1.xpose.msra.mxu1 %v7425_v25  ;;  %7660 = vmatpush1.xpose.msra.mxu0 %v7423_v18 }
 0x3b7   : > { %7576 = vmatprep.subr.mxu1 %v15788_v32  ;;  %7694 = vmatprep.mubr.f32.mxu0 %v15726_v37  ;;  %v15832_v31 = vand.u32 4294901760, %v7253_v63  ;;  %v7297_v7 = vmul.f32 %v7289_v46, %v7253_v63  ;;  %v7299_v59 = vadd.f32 %v7298_v27, %v7296_v10  ;;  %v7894_v29 = vsub.f32 %v7252_v51, %v15828_v34 }
 0x3b8   : > { %v15846_v10 = vsub.f32 %v7291_v9, %v15826_v6  ;;  %v15856_v27 = vand.u32 4294901760, %v15764_v11  ;;  %v8360_v9 = vsub.f32 %v15775_v8, %v15843_v20  ;;  %v7292_v8 = vmul.f32 %v7285_v28, %v15807_v24 }
 0x3b9   : > { %7462 = vmatmul.mubr.f32.vlgmr.msra.gmra.mxu1 %v15755_v3  ;;  %7696 = vmatmul.mubr.f32.vlgmr.msra.gmra.mxu0 %v15755_v3  ;;  %v7888_v18 = vsub.f32 %v7253_v63, %v15832_v31  ;;  %v7300_v25 = vadd.f32 %v7299_v59, %v7297_v7  ;;  %v7895_v35 = vand.u32 4294901760, %v7894_v29  ;;  %v15851_v63 = vsub.f32 %v7290_v48, %v15834_v41 }
 0x3ba   : > { %7806 = vmatprep.subr.mxu0 %v15832_v31  ;;  %7578 = vmatpush1.xpose.msra.mxu1 %v15786_v13  ;;  %v15885_v28 = vand.u32 4294901760, %v7292_v8 }
 0x3bb   : > { %7808 = vmatpush1.xpose.msra.mxu0 %v15828_v34  ;;  %7732 = vmatprep.subr.mxu1 %v15788_v32  ;;  %v7889_v51 = vand.u32 4294901760, %v7888_v18  ;;  %v7896_v14 = vsub.f32 %v7894_v29, %v7895_v35  ;;  %v8315_v32 = vand.u32 4294901760, %v15846_v10  ;;  %v8321_v48 = vand.u32 4294901760, %v15851_v63 }
 0x3bc   : > { %7971 = vmatprep.subr.mxu0 %v7888_v18  ;;  %7301 = vadd.xlane.f32.xlu1 %v7300_v25 }
 0x3bd   : > { %7614 = vmatprep.mubr.f32.mxu1 %v7371_v52  ;;  %7846 = vmatprep.mubr.f32.mxu0 %v7845_v16  ;;  %v7890_v0 = vsub.f32 %v7888_v18, %v7889_v51  ;;  %v7293_v52 = vmul.f32 %v7289_v46, %v15810_v49  ;;  %v7897_v42 = vand.u32 4294901760, %v7896_v14  ;;  %v15893_v18 = vand.u32 4294901760, %v15810_v49 }
 0x3be   : > { %7618 = vmatmul.mubr.f32.vlgmr.msra.gmra.mxu1 %v7377_v26  ;;  %7852 = vmatmul.mubr.f32.vlgmr.msra.gmra.mxu0 %v7851_v60  ;;  %v8366_v26 = vsub.f32 %v15764_v11, %v15856_v27  ;;  %v8322_v11 = vsub.f32 %v15851_v63, %v8321_v48  ;;  %v14473_v60 = vld [vmem:[%s16833_s1 + $0x30] sm:$0xff] }
 0x3bf   : > { %7734 = vmatpush1.xpose.msra.mxu1 %v15786_v13  ;;  %7974 = vmatpush1.xpose.msra.mxu0 %v7894_v29  ;;  %v7891_v4 = vand.u32 4294901760, %v7890_v0  ;;  %v8316_v13 = vsub.f32 %v15846_v10, %v8315_v32  ;;  %v15876_v46 = vand.u32 4294901760, %v7293_v52  ;;  %v9231_v0 = vcombine.high %v14473_v60, %v14473_v60 }
 0x3c0   : > { %8128 = vmatprep.subr.mxu0 %v7889_v51  ;;  %7768 = vmatprep.mubr.f32.mxu1 %v15726_v37  ;;  %v8361_v37 = vand.u32 4294901760, %v8360_v9  ;;  %v8323_v29 = vand.u32 4294901760, %v8322_v11  ;;  %v15909_v51 = vand.u32 4294901760, %v15807_v24 }
 0x3c1   : > { %8009 = vmatprep.mubr.f32.mxu0 %v15794_v22  ;;  %7892 = vmatprep.subr.mxu1 %v7891_v4  ;;  %v8317_v7 = vand.u32 4294901760, %v8316_v13  ;;  %v15896_v16 = vsub.f32 %v7293_v52, %v15876_v46  ;;  %v9235_v14 = vsel %vm311_vm0, %v9231_v0, 0  ;;  %v14474_v13 = vld [vmem:[%s16833_s1 + $0x38] sm:$0xff] }
 0x3c2   : > { %7770 = vmatmul.mubr.f32.vlgmr.msra.gmra.mxu1 %v15755_v3  ;;  %8012 = vmatmul.mubr.f32.vlgmr.msra.gmra.mxu0 %v15797_v53  ;;  %v8367_v3 = vand.u32 4294901760, %v8366_v26  ;;  %v8362_v59 = vsub.f32 %v8360_v9, %v8361_v37  ;;  %v15936_v52 = vand.u32 4294901760, %v9235_v14 }
 0x3c3   : > { %7898 = vmatpush1.xpose.msra.mxu1 %v7897_v42  ;;  %8132 = vmatpush1.xpose.msra.mxu0 %v7895_v35  ;;  %v15904_v35 = vsub.f32 %v7292_v8, %v15885_v28  ;;  %v8787_v22 = vand.u32 4294901760, %v15896_v16 }
 0x3c4   : > { %8048 = vmatprep.subr.mxu1 %v15832_v31  ;;  %8278 = vmatprep.subr.mxu0 %v15843_v20  ;;  %v8368_v25 = vsub.f32 %v8366_v26, %v8367_v3  ;;  %v9350_v11 = vsub.f32 %v9235_v14, %v15936_v52 }
 0x3c5   : > { %7932 = vmatprep.mubr.f32.mxu1 %v15782_v12  ;;  %8166 = vmatprep.mubr.f32.mxu0 %v15782_v12 }
 0x3c6   : > { %7934 = vmatmul.mubr.f32.vlgmr.msra.gmra.mxu1 %v15784_v5  ;;  %8168 = vmatmul.mubr.f32.vlgmr.msra.gmra.mxu0 %v15784_v5  ;;  %v8369_v53 = vand.u32 4294901760, %v8368_v25 }
 0x3c7   : > { %8050 = vmatpush1.xpose.msra.mxu1 %v15828_v34  ;;  %8280 = vmatpush1.xpose.msra.mxu0 %v15856_v27 }
 0x3c8   : > { %8318 = vmatprep.mubr.f32.mxu0 %v8317_v7  ;;  %8204 = vmatprep.subr.mxu1 %v15832_v31  ;;  %v8363_v31 = vand.u32 4294901760, %v8362_v59 }
 0x3c9   : > { %8443 = vmatprep.subr.mxu0 %v8360_v9  ;;  %8086 = vmatprep.mubr.f32.mxu1 %v7843_v62  ;;  %v8832_v62 = vsub.f32 %v15810_v49, %v15893_v18 }
 0x3ca   : > { %8090 = vmatmul.mubr.f32.vlgmr.msra.gmra.mxu1 %v7849_v43  ;;  %8324 = vmatmul.mubr.f32.vlgmr.msra.gmra.mxu0 %v8323_v29  ;;  %v8793_v43 = vand.u32 4294901760, %v15904_v35 }
 0x3cb   : > { %8206 = vmatpush1.xpose.msra.mxu1 %v15828_v34  ;;  %8446 = vmatpush1.xpose.msra.mxu0 %v8366_v26  ;;  %v8838_v34 = vsub.f32 %v15807_v24, %v15909_v51  ;;  %v8833_v49 = vand.u32 4294901760, %v8832_v62  ;;  %v14927_v24 = vmov 0  }
 0x3cc   : > { %8481 = vmatprep.mubr.f32.mxu0 %v15846_v10  ;;  %8364 = vmatprep.subr.mxu1 %v8363_v31  ;;  %v8794_v9 = vsub.f32 %v15904_v35, %v8793_v43 }
 0x3cd   : > { %8600 = vmatprep.subr.mxu0 %v8361_v37  ;;  %8240 = vmatprep.mubr.f32.mxu1 %v15782_v12  ;;  %v8788_v12 = vsub.f32 %v15896_v16, %v8787_v22  ;;  %v8839_v4 = vand.u32 4294901760, %v8838_v34  ;;  %v8834_v26 = vsub.f32 %v8832_v62, %v8833_v49 }
 0x3ce   : > { %6274 = vperm.xlu1 %14800, %v15712_v38   ;;  %8242 = vmatmul.mubr.f32.vlgmr.msra.gmra.mxu1 %v15784_v5  ;;  %v9233_v5 = vsel %vm311_vm0, %v14473_v60, 0  ;;  %v8795_v37 = vand.u32 4294901760, %v8794_v9 }
 0x3cf   : > { %8484 = vmatmul.mubr.f32.vlgmr.msra.gmra.mxu0 %v15851_v63  ;;  %8370 = vmatpush1.xpose.msra.mxu1 %v8369_v53  ;;  %v8789_v42 = vand.u32 4294901760, %v8788_v12  ;;  %v15942_v8 = vand.u32 4294901760, %v9233_v5  ;;  %v8835_v7 = vand.u32 4294901760, %v8834_v26 }
 0x3d0   : > { %8404 = vmatprep.mubr.f32.mxu1 %v15826_v6  ;;  %8604 = vmatpush1.xpose.msra.mxu0 %v8367_v3  ;;  %v9232_v3 = vcombine.high %v14474_v13, %v14474_v13 }
 0x3d1   : > { %8638 = vmatprep.mubr.f32.mxu0 %v15826_v6  ;;  %8520 = vmatprep.subr.mxu1 %v15843_v20  ;;  %v9356_v10 = vsub.f32 %v9233_v5, %v15942_v8 }
 0x3d2   : > { %8750 = vmatprep.subr.mxu0 %v15893_v18  ;;  %14801 = vset.pattern.permute.xlu1 %v14927_v24  ;;  %v9239_v63 = vsel %vm311_vm0, %v9232_v3, 0 }
 0x3d3   : > { %8406 = vmatmul.mubr.f32.vlgmr.msra.gmra.mxu1 %v15834_v41  ;;  %8640 = vmatmul.mubr.f32.vlgmr.msra.gmra.mxu0 %v15834_v41  ;;  %v15965_v59 = vand.u32 4294901760, %v9239_v63 }
 0x3d4   : > { %3349 = vperm.xlu1 %14801, %v15712_v38   ;;  %8522 = vmatpush1.xpose.msra.mxu1 %v15856_v27  ;;  %v8840_v38 = vsub.f32 %v8838_v34, %v8839_v4 }
 0x3d5   : > { %8558 = vmatprep.mubr.f32.mxu1 %v8315_v32  ;;  %8752 = vmatpush1.xpose.msra.mxu0 %v15909_v51  ;;  %v9351_v32 = vand.u32 4294901760, %v9350_v11  ;;  %v9815_v25 = vsub.f32 %v9239_v63, %v15965_v59 }
 0x3d6   : > { %8790 = vmatprep.mubr.f32.mxu0 %v8789_v42  ;;  %8676 = vmatprep.subr.mxu1 %v15843_v20  ;;  %v8841_v20 = vand.u32 4294901760, %v8840_v38 }
 0x3d7   : > { %8915 = vmatprep.subr.mxu0 %v8832_v62  ;;  %8562 = vmatmul.mubr.f32.vlgmr.msra.gmra.mxu1 %v8321_v48  ;;  %v9352_v48 = vsub.f32 %v9350_v11, %v9351_v32 }
 0x3d8   : > { %8796 = vmatmul.mubr.f32.vlgmr.msra.gmra.mxu0 %v8795_v37  ;;  %8678 = vmatpush1.xpose.msra.mxu1 %v15856_v27  ;;  %v9357_v27 = vand.u32 4294901760, %v9356_v10 }
 0x3d9   : > { %8712 = vmatprep.mubr.f32.mxu1 %v15826_v6  ;;  %8918 = vmatpush1.xpose.msra.mxu0 %v8838_v34  ;;  %v9237_v6 = vsel %vm311_vm0, %v14474_v13, 0  ;;  %v9353_v60 = vand.u32 4294901760, %v9352_v48  ;;  %vm12740_vm0 = vcmp.eq.s32.totalorder %v15052_v57, 5 }
 0x3da   : > { %8953 = vmatprep.mubr.f32.mxu0 %v15896_v16  ;;  %8836 = vmatprep.subr.mxu1 %v8835_v7  ;;  %v9738_v29 = vand.u32 4294901760, %v9237_v6 }
 0x3db   : > { %9072 = vmatprep.subr.mxu0 %v8833_v49  ;;  %8714 = vmatmul.mubr.f32.vlgmr.msra.gmra.mxu1 %v15834_v41  ;;  %v9358_v41 = vsub.f32 %v9356_v10, %v9357_v27 }
 0x3dc   : > { %8956 = vmatmul.mubr.f32.vlgmr.msra.gmra.mxu0 %v15904_v35  ;;  %8842 = vmatpush1.xpose.msra.mxu1 %v8841_v20  ;;  %v9821_v16 = vsub.f32 %v9237_v6, %v9738_v29 }
 0x3dd   : > { %8876 = vmatprep.mubr.f32.mxu1 %v15876_v46  ;;  %9076 = vmatpush1.xpose.msra.mxu0 %v8839_v4  ;;  %v9359_v31 = vand.u32 4294901760, %v9358_v41 }
 0x3de   : > { %9110 = vmatprep.mubr.f32.mxu0 %v15876_v46  ;;  %8992 = vmatprep.subr.mxu1 %v15893_v18  ;;  %v9822_v35 = vand.u32 4294901760, %v9821_v16 }
 0x3df   : > { %8878 = vmatmul.mubr.f32.vlgmr.msra.gmra.mxu1 %v15885_v28  ;;  %9272 = vmatprep.subr.mxu0 %v15936_v52 }
 0x3e0   : > { %9112 = vmatmul.mubr.f32.vlgmr.msra.gmra.mxu0 %v15885_v28  ;;  %8994 = vmatpush1.xpose.msra.mxu1 %v15909_v51 }
 0x3e1   : > { %9030 = vmatprep.mubr.f32.mxu1 %v8787_v22  ;;  %9148 = vmatprep.subr.mxu1 %v15893_v18  ;;  %v9816_v18 = vand.u32 4294901760, %v9815_v25 }
 0x3e2   : > { %9274 = vmatpush1.msra.mxu0 %v15942_v8  ;;  %9307 = vmatprep.mubr.f32.mxu0 %v14924_v54 }
 0x3e3   : > { %9034 = vmatmul.mubr.f32.vlgmr.msra.gmra.mxu1 %v8793_v43  ;;  %9433 = vmatprep.subr.mxu0 %v9350_v11  ;;  %v14928_v43 = vmov 2  }
 0x3e4   : > { %9313 = vmatmul.mubr.f32.vlgmr.msra.gmra.mxu0 %v15077_v50  ;;  %9150 = vmatpush1.xpose.msra.mxu1 %v15909_v51 }
 0x3e5   : > { %9184 = vmatprep.mubr.f32.mxu1 %v15876_v46  ;;  %9436 = vmatpush1.msra.mxu0 %v9356_v10  ;;  %v9817_v46 = vsub.f32 %v9815_v25, %v9816_v18 }
 0x3e6   : > { %9469 = vmatprep.mubr.f32.mxu0 %v14924_v54  ;;  %9354 = vmatprep.subr.mxu1 %v9353_v60 }
 0x3e7   : > { %9186 = vmatmul.mubr.f32.vlgmr.msra.gmra.mxu1 %v15885_v28  ;;  %9587 = vmatprep.subr.mxu0 %v9351_v32  ;;  %v9823_v28 = vsub.f32 %v9821_v16, %v9822_v35  ;;  %v9818_v51 = vand.u32 4294901760, %v9817_v46 }
 0x3e8   : > { %9472 = vmatmul.mubr.f32.vlgmr.msra.gmra.mxu0 %v15063_v39  ;;  %9360 = vmatpush1.msra.mxu1 %v9359_v31 }
 0x3e9   : > { %9393 = vmatprep.mubr.f32.mxu1 %v14924_v54  ;;  %9591 = vmatpush1.msra.mxu0 %v9357_v27  ;;  %v9824_v0 = vand.u32 4294901760, %v9823_v28 }
 0x3ea   : > { %9624 = vmatprep.mubr.f32.mxu0 %v14924_v54  ;;  %9509 = vmatprep.subr.mxu1 %v15936_v52 }
 0x3eb   : > { %9395 = vmatmul.mubr.f32.vlgmr.msra.gmra.mxu1 %v15060_v36  ;;  %9737 = vmatprep.subr.mxu0 %v15965_v59 }
 0x3ec   : > { %9626 = vmatmul.mubr.f32.vlgmr.msra.gmra.mxu0 %v15060_v36  ;;  %9511 = vmatpush1.msra.mxu1 %v15942_v8 }
 0x3ed   : > { %9544 = vmatprep.mubr.f32.mxu1 %v14924_v54  ;;  %9739 = vmatpush1.msra.mxu0 %v9738_v29 }
 0x3ee   : > { %9772 = vmatprep.mubr.f32.mxu0 %v14924_v54  ;;  %9663 = vmatprep.subr.mxu1 %v15936_v52 }
 0x3ef   : > { %9548 = vmatmul.mubr.f32.vlgmr.msra.gmra.mxu1 %v15069_v40  ;;  %9898 = vmatprep.subr.mxu0 %v9815_v25 }
 0x3f0   : > { %9778 = vmatmul.mubr.f32.vlgmr.msra.gmra.mxu0 %v15077_v50  ;;  %9665 = vmatpush1.msra.mxu1 %v15942_v8 }
 0x3f1   : > { %9698 = vmatprep.mubr.f32.mxu1 %v14924_v54  ;;  %9901 = vmatpush1.msra.mxu0 %v9821_v16 }
 0x3f2   : > { %9934 = vmatprep.mubr.f32.mxu0 %v14924_v54  ;;  %9819 = vmatprep.subr.mxu1 %v9818_v51 }
 0x3f3   : > { %9700 = vmatmul.mubr.f32.vlgmr.msra.gmra.mxu1 %v15060_v36  ;;  %10052 = vmatprep.subr.mxu0 %v9816_v18 }
 0x3f4   : > { %9937 = vmatmul.mubr.f32.vlgmr.msra.gmra.mxu0 %v15063_v39  ;;  %9825 = vmatpush1.msra.mxu1 %v9824_v0  ;;  %v16013_v39 = vsub.s32 7, %v15052_v57 }
 0x3f5   : > { %9858 = vmatprep.mubr.f32.mxu1 %v14924_v54  ;;  %10056 = vmatpush1.msra.mxu0 %v9822_v35 }
 0x3f6   : > { %10089 = vmatprep.mubr.f32.mxu0 %v14924_v54  ;;  %9974 = vmatprep.subr.mxu1 %v15965_v59  ;;  %v16017_v50 = vrot.slane %v15719_v55, %v16013_v39 }
 0x3f7   : > { %9860 = vmatmul.mubr.f32.vlgmr.msra.gmra.mxu1 %v15060_v36  ;;  %14799 = vset.pattern.permute.xlu0 %v14928_v43 }
 0x3f8   : > { %10091 = vmatmul.mubr.f32.vlgmr.msra.gmra.mxu0 %v15060_v36  ;;  %9976 = vmatpush1.msra.mxu1 %v9738_v29  ;;  %v16020_v22 = vand.u32 4294901760, %v16017_v50 }
 0x3f9   : > { %10009 = vmatprep.mubr.f32.mxu1 %v14924_v54  ;;  %10128 = vmatprep.subr.mxu1 %v15965_v59 }
 0x3fa   : > { %v16024_v62 = vsub.f32 %v16017_v50, %v16020_v22 }
 0x3fb   : > { %10013 = vmatmul.mubr.f32.vlgmr.msra.gmra.mxu1 %v15069_v40 }
 0x3fc   : > { %10130 = vmatpush1.msra.mxu1 %v9738_v29  ;;  %10163 = vmatprep.mubr.f32.mxu1 %v14924_v54  ;;  %v10296_v40 = vand.u32 4294901760, %v16024_v62 }
 0x3ff   : > { %10165 = vmatmul.mubr.f32.vlgmr.msra.gmra.mxu1 %v15060_v36  ;;  %v10297_v36 = vsub.f32 %v16024_v62, %v10296_v40 }
 0x400   : > { %10385 = vmatprep.mubr.f32.mxu1 %v16020_v22 }
 0x401   : > { %v10298_v53 = vand.u32 4294901760, %v10297_v36 }
 0x403   : > { %10299 = vmatprep.mubr.f32.mxu0 %v10298_v53 }
 0x471   : > { %v7381_v34 = vpop.f32.mrf.mxu0 }
 0x473   : > { %v7383_v14 = vpop.f32.mrf.mxu0 }
 0x475   : > { %v7541_v12 = vpop.f32.mrf.mxu0 }
 0x477   : > { %v7543_v49 = vpop.f32.mrf.mxu0 }
 0x479   : > { %v7463_v5 = vpop.f32.mrf.mxu1  ;;  %v7697_v9 = vpop.f32.mrf.mxu0 }
 0x47a   : > { %v7464_v4 = vadd.f32 %v7463_v5, %v7381_v34 }
 0x47b   : > { %v7465_v52 = vpop.f32.mrf.mxu1  ;;  %v7699_v42 = vpop.f32.mrf.mxu0 }
 0x47c   : > { %v7542_v26 = vadd.f32 %v7541_v12, %v7464_v4 }
 0x47e   : > { %v7619_v8 = vpop.f32.mrf.mxu1  ;;  %v7853_v13 = vpop.f32.mrf.mxu0 }
 0x47f   : > { %v7620_v37 = vadd.f32 %v7619_v8, %v7542_v26 }
 0x480   : > { %v7621_v38 = vpop.f32.mrf.mxu1  ;;  %v7855_v11 = vpop.f32.mrf.mxu0 }
 0x481   : > { %v7698_v3 = vadd.f32 %v7697_v9, %v7620_v37 }
 0x482   : > { %v7771_v7 = vpop.f32.mrf.mxu1  ;;  %v8013_v10 = vpop.f32.mrf.mxu0 }
 0x483   : > { %v7772_v20 = vadd.f32 %v7771_v7, %v7698_v3 }
 0x484   : > { %v7773_v32 = vpop.f32.mrf.mxu1  ;;  %v8015_v63 = vpop.f32.mrf.mxu0 }
 0x485   : > { %v7854_v27 = vadd.f32 %v7853_v13, %v7772_v20 }
 0x486   : > { %v7935_v6 = vpop.f32.mrf.mxu1  ;;  %v8169_v48 = vpop.f32.mrf.mxu0 }
 0x487   : > { %v7936_v59 = vadd.f32 %v7935_v6, %v7854_v27 }
 0x488   : > { %v7937_v41 = vpop.f32.mrf.mxu1  ;;  %v8171_v29 = vpop.f32.mrf.mxu0 }
 0x489   : > { %v8014_v60 = vadd.f32 %v8013_v10, %v7936_v59  ;;  %v16032_v59 = vpop.permute.xlu1 %12124  ;;  %v14475_v29 = vld [vmem:[%s16834_s2 + $0xc] sm:$0xf] }
 0x48a   : > { %v8091_v25 = vpop.f32.mrf.mxu1  ;;  %v8325_v31 = vpop.f32.mrf.mxu0 }
 0x48b   : > { %v8092_v16 = vadd.f32 %v8091_v25, %v8014_v60 }
 0x48c   : > { %v8093_v18 = vpop.f32.mrf.mxu1  ;;  %v8327_v35 = vpop.f32.mrf.mxu0 }
 0x48d   : > { %v8170_v46 = vadd.f32 %v8169_v48, %v8092_v16  ;;  %v9212_v18 = vrot.slane %v14475_v29, %v15137_v56 }
 0x48e   : > { %v8243_v28 = vpop.f32.mrf.mxu1 }
 0x48f   : > { %v8244_v51 = vadd.f32 %v8243_v28, %v8170_v46  ;;  %v8485_v0 = vpop.f32.mrf.mxu0 }
 0x490   : > { %v8245_v36 = vpop.f32.mrf.mxu1 }
 0x491   : > { %v8487_v53 = vpop.f32.mrf.mxu0  ;;  %v9194_v16 = vrot.slane %v8244_v51, %v15137_v56  ;;  %v16046_v51 = vrot.slane %v15719_v55, %v15158_v19 }
 0x493   : > { %v8407_v34 = vpop.f32.mrf.mxu1  ;;  %v8641_v14 = vpop.f32.mrf.mxu0 }
 0x494   : > { %v8408_v12 = vadd.f32 %v8407_v34, %v8325_v31  ;;  %v7302_v34 = vpop.xlane.xlu1 %7301 }
 0x495   : > { %v8409_v49 = vpop.f32.mrf.mxu1  ;;  %v8643_v5 = vpop.f32.mrf.mxu0 }
 0x496   : > { %v8486_v9 = vadd.f32 %v8485_v0, %v8408_v12  ;;  %v9216_v0 = vrot.slane %v14475_v29, %v15143_v61 }
 0x497   : > { %v8563_v4 = vpop.f32.mrf.mxu1 }
 0x498   : > { %v8564_v52 = vadd.f32 %v8563_v4, %v8486_v9  ;;  %v8797_v42 = vpop.f32.mrf.mxu0  ;;  %v16042_v9 = vadd.f32 %v9194_v16, %v7302_v34 }
 0x499   : > { %v8565_v26 = vpop.f32.mrf.mxu1 }
 0x49a   : > { %v8799_v8 = vpop.f32.mrf.mxu0  ;;  %v8642_v13 = vadd.f32 %v8641_v14, %v8564_v52 }
 0x49b   : > { %v8715_v37 = vpop.f32.mrf.mxu1 }
 0x49c   : > { %v8716_v38 = vadd.f32 %v8715_v37, %v8642_v13  ;;  %v8957_v11 = vpop.f32.mrf.mxu0  ;;  %v16051_v37 = vand.u32 4294901760, %v16046_v51 }
 0x49d   : > { %v8717_v3 = vpop.f32.mrf.mxu1 }
 0x49e   : > { %v8959_v7 = vpop.f32.mrf.mxu0  ;;  %v8798_v10 = vadd.f32 %v8797_v42, %v8716_v38  ;;  %v16055_v55 = vsub.f32 %v16046_v51, %v16051_v37 }
 0x49f   : > { %v8879_v20 = vpop.f32.mrf.mxu1 }
 0x4a0   : > { %v8880_v32 = vadd.f32 %v8879_v20, %v8798_v10  ;;  %v9113_v63 = vpop.f32.mrf.mxu0 }
 0x4a1   : > { %v8881_v27 = vpop.f32.mrf.mxu1 }
 0x4a2   : > { %v9115_v6 = vpop.f32.mrf.mxu0  ;;  %v8958_v48 = vadd.f32 %v8957_v11, %v8880_v32  ;;  %v9220_v27 = vrot.slane %v14475_v29, %v15155_v15 }
 0x4a3   : > { %v9035_v41 = vpop.f32.mrf.mxu1 }
 0x4a4   : > { %v9036_v60 = vadd.f32 %v9035_v41, %v8958_v48  ;;  %v9314_v25 = vpop.f32.mrf.mxu0 }
 0x4a5   : > { %v9037_v31 = vpop.f32.mrf.mxu1  ;;  %v9315_v12 = vadd.f32 %v9314_v25, %v9212_v18  ;;  %v9224_v25 = vrot.slane %v14475_v29, %v15158_v19 }
 0x4a6   : > { %v9316_v35 = vpop.f32.mrf.mxu0  ;;  %v9114_v46 = vadd.f32 %v9113_v63, %v9036_v60 }
 0x4a7   : > { %v9187_v28 = vpop.f32.mrf.mxu1  ;;  %v9317_v52 = vadd.f32 %v9316_v35, %v9216_v0 }
 0x4a8   : > { %v9188_v36 = vadd.f32 %v9187_v28, %v9114_v46  ;;  %v9473_v53 = vpop.f32.mrf.mxu0  ;;  %v10302_v46 = vand.u32 4294901760, %v16055_v55 }
 0x4a9   : > { %v9189_v14 = vpop.f32.mrf.mxu1 }
 0x4aa   : > { %v16040_v49 = vmul.f32 2.0, %v9188_v36  ;;  %v9475_v5 = vpop.f32.mrf.mxu0 }
 0x4ab   : > { %v9396_v4 = vpop.f32.mrf.mxu1 }
 0x4ac   : > { %v9397_v42 = vadd.f32 %v9396_v4, %v9315_v12  ;;  %v9627_v26 = vpop.f32.mrf.mxu0  ;;  %v9197_v8 = vsub.f32 %v16042_v9, %v16040_v49  ;;  %v10190_v12 = vrot.slane %v15767_v21, %v15158_v19 }
 0x4ad   : > { %v9398_v13 = vpop.f32.mrf.mxu1 }
 0x4ae   : > { %v9399_v38 = vadd.f32 %v9398_v13, %v9317_v52  ;;  %v9629_v11 = vpop.f32.mrf.mxu0  ;;  %v9474_v3 = vadd.f32 %v9473_v53, %v9397_v42  ;;  %v10194_v53 = vrot.slane %v15767_v21, %v16013_v39 }
 0x4af   : > { %v9549_v7 = vpop.f32.mrf.mxu1 }
 0x4b0   : > { %v9550_v10 = vadd.f32 %v9549_v7, %v9474_v3  ;;  %v9779_v20 = vpop.f32.mrf.mxu0  ;;  %v9476_v32 = vadd.f32 %v9475_v5, %v9399_v38  ;;  %v16077_v3 = vand.u32 4294901760, %v10190_v12 }
 0x4b1   : > { %v9551_v63 = vpop.f32.mrf.mxu1  ;;  %v9780_v28 = vadd.f32 %v9779_v20, %v9220_v27 }
 0x4b2   : > { %v9552_v6 = vadd.f32 %v9551_v63, %v9476_v32  ;;  %v9781_v48 = vpop.f32.mrf.mxu0  ;;  %v9628_v41 = vadd.f32 %v9627_v26, %v9550_v10  ;;  %v10303_v26 = vsub.f32 %v16055_v55, %v10302_v46 }
 0x4b3   : > { %v9701_v60 = vpop.f32.mrf.mxu1  ;;  %v9782_v5 = vadd.f32 %v9781_v48, %v9224_v25 }
 0x4b4   : > { %v9702_v31 = vadd.f32 %v9701_v60, %v9628_v41  ;;  %v9938_v16 = vpop.f32.mrf.mxu0  ;;  %v9630_v18 = vadd.f32 %v9629_v11, %v9552_v6  ;;  %v16075_v11 = vand.u32 4294901760, %v10194_v53  ;;  %v10304_v48 = vand.u32 4294901760, %v10303_v26 }
 0x4b5   : > { %v9703_v35 = vpop.f32.mrf.mxu1 }
 0x4b6   : > { %v16060_v0 = vmax.f32 %v9702_v31, 0.0  ;;  %v9704_v36 = vadd.f32 %v9703_v35, %v9630_v18  ;;  %v9940_v34 = vpop.f32.mrf.mxu0  ;;  %v16087_v31 = vsub.f32 %v10190_v12, %v16077_v3  ;;  %v10206_v18 = vrot.slane %v16017_v50, %v15158_v19 }
 0x4b7   : > { %v9861_v14 = vpop.f32.mrf.mxu1 }
 0x4b8   : > { %v10175_v29 = vmul.f32 %v16060_v0, %v16060_v0  ;;  %v16068_v4 = vmax.f32 %v9704_v36, 0.0  ;;  %v9862_v52 = vadd.f32 %v9861_v14, %v9780_v28  ;;  %v10092_v21 = vpop.f32.mrf.mxu0 }
 0x4b9   : > { %v9863_v42 = vpop.f32.mrf.mxu1 }
 0x4ba   : > { %v10176_v13 = vmul.f32 %v16068_v4, %v16068_v4  ;;  %v9864_v38 = vadd.f32 %v9863_v42, %v9782_v5  ;;  %v9939_v7 = vadd.f32 %v9938_v16, %v9862_v52  ;;  %v16079_v20 = vand.u32 4294901760, %v10175_v29  ;;  %v10094_v35 = vpop.f32.mrf.mxu0 }
 0x4bb   : > { %v10014_v10 = vpop.f32.mrf.mxu1  ;;  %v16090_v16 = vsub.f32 %v10194_v53, %v16075_v11  ;;  %v10202_v52 = vrot.slane %v16046_v51, %v15158_v19 }
 0x4bc   : > { %v9941_v32 = vadd.f32 %v9940_v34, %v9864_v38  ;;  %v16081_v63 = vand.u32 4294901760, %v10176_v13  ;;  %v10015_v27 = vadd.f32 %v10014_v10, %v9939_v7  ;;  %v10347_v41 = vsub.f32 %v10175_v29, %v16079_v20 }
 0x4bd   : > { %v10016_v6 = vpop.f32.mrf.mxu1  ;;  %v10768_v50 = vand.u32 4294901760, %v16090_v16 }
 0x4be   : > { %v10017_v60 = vadd.f32 %v10016_v6, %v9941_v32  ;;  %10259 = vmatprep.subr.mxu0 %v16081_v63  ;;  %v10341_v25 = vsub.f32 %v10176_v13, %v16081_v63  ;;  %v10093_v28 = vadd.f32 %v10092_v21, %v10015_v27  ;;  %v10348_v34 = vand.u32 4294901760, %v10347_v41 }
 0x4bf   : > { %v10166_v36 = vpop.f32.mrf.mxu1  ;;  %10261 = vmatpush1.xpose.msra.mxu0 %v16079_v20  ;;  %v10774_v21 = vand.u32 4294901760, %v16087_v31  ;;  %v10216_v32 = vmul.f32 %v10206_v18, %v16068_v4  ;;  %v10220_v6 = vmul.f32 %v10206_v18, %v10176_v13  ;;  %v10769_v13 = vsub.f32 %v16090_v16, %v10768_v50 }
 0x4c0   : > { %10424 = vmatprep.subr.mxu0 %v10341_v25  ;;  %v10095_v14 = vadd.f32 %v10094_v35, %v10017_v60  ;;  %v10342_v5 = vand.u32 4294901760, %v10341_v25  ;;  %v10167_v42 = vadd.f32 %v10166_v36, %v10093_v28  ;;  %v10349_v38 = vsub.f32 %v10347_v41, %v10348_v34 }
 0x4c1   : > { %v10168_v26 = vpop.f32.mrf.mxu1  ;;  %v10210_v35 = vrot.slane %v10190_v12, %v15158_v19  ;;  %v16119_v12 = vand.u32 4294901760, %v10216_v32 }
 0x4c2   : > { %v10169_v7 = vadd.f32 %v10168_v26, %v10095_v14  ;;  %10305 = vmatmul.mubr.f32.vlgmr.msra.gmra.mxu0 %v10304_v48  ;;  %v10343_v10 = vsub.f32 %v10341_v25, %v10342_v5  ;;  %v16100_v27 = vmax.f32 %v10167_v42, 0.0  ;;  %v10214_v48 = vrot.slane %v10194_v53, %v15158_v19 }
 0x4c3   : > { %10427 = vmatpush1.xpose.msra.mxu0 %v10347_v41  ;;  %10462 = vmatprep.mubr.f32.mxu0 %v16024_v62  ;;  %v10215_v25 = vmul.f32 %v10202_v52, %v16060_v0  ;;  %v10350_v36 = vand.u32 4294901760, %v10349_v38  ;;  %v10219_v14 = vmul.f32 %v10202_v52, %v10175_v29  ;;  %v10775_v53 = vsub.f32 %v16087_v31, %v10774_v21 }
 0x4c4   : > { %v16103_v60 = vmax.f32 %v10169_v7, 0.0  ;;  %10581 = vmatprep.subr.mxu0 %v10342_v5  ;;  %v10344_v51 = vand.u32 4294901760, %v10343_v10  ;;  %v10177_v28 = vmul.f32 %v16100_v27, %v16100_v27  ;;  %v10770_v10 = vand.u32 4294901760, %v10769_v13 }
 0x4c5   : > { %v10223_v5 = vadd.f32 %v10220_v6, %v10219_v14  ;;  %v16127_v26 = vand.u32 4294901760, %v10215_v25  ;;  %v10776_v6 = vand.u32 4294901760, %v10775_v53  ;;  %v16136_v14 = vand.u32 4294901760, %v16068_v4 }
 0x4c6   : > { %v10178_v41 = vmul.f32 %v16103_v60, %v16103_v60  ;;  %10345 = vmatprep.subr.mxu1 %v10344_v51  ;;  %10465 = vmatmul.mubr.f32.vlgmr.msra.gmra.mxu0 %v16055_v55  ;;  %v16121_v18 = vand.u32 4294901760, %v10177_v28  ;;  %v10221_v29 = vmul.f32 %v10210_v35, %v10177_v28  ;;  %v10218_v62 = vmul.f32 %v10214_v48, %v16103_v60 }
 0x4c7   : > { %10351 = vmatpush1.xpose.msra.mxu1 %v10350_v36  ;;  %10585 = vmatpush1.xpose.msra.mxu0 %v10348_v34  ;;  %v10217_v55 = vmul.f32 %v10210_v35, %v16100_v27  ;;  %v16204_v2 = vand.u32 4294901760, %v16100_v27 }
 0x4c8   : > { %10501 = vmatprep.subr.mxu1 %v16081_v63  ;;  %10619 = vmatprep.mubr.f32.mxu0 %v16020_v22  ;;  %v16125_v52 = vand.u32 4294901760, %v10178_v41  ;;  %v10222_v42 = vmul.f32 %v10214_v48, %v10178_v41  ;;  %v10224_v38 = vadd.f32 %v10223_v5, %v10221_v29  ;;  %v10819_v7 = vsub.f32 %v10177_v28, %v16121_v18 }
 0x4c9   : > { %v16139_v29 = vsub.f32 %v10216_v32, %v16119_v12  ;;  %v16149_v5 = vand.u32 4294901760, %v16060_v0  ;;  %v16151_v32 = vpop.permute.xlu1 %6274  ;;  %v16171_v48 = vand.u32 4294901760, %v10218_v62 }
 0x4ca   : > { %10387 = vmatmul.mubr.f32.vlgmr.msra.gmra.mxu1 %v16051_v37  ;;  %10621 = vmatmul.mubr.f32.vlgmr.msra.gmra.mxu0 %v16051_v37  ;;  %v10813_v34 = vsub.f32 %v10178_v41, %v16125_v52  ;;  %v10225_v51 = vadd.f32 %v10224_v38, %v10222_v42  ;;  %v10820_v36 = vand.u32 4294901760, %v10819_v7  ;;  %v16144_v41 = vsub.f32 %v10215_v25, %v16127_v26 }
 0x4cb   : > { %10731 = vmatprep.subr.mxu0 %v16125_v52  ;;  %10503 = vmatpush1.xpose.msra.mxu1 %v16079_v20  ;;  %v11285_v25 = vsub.f32 %v16068_v4, %v16136_v14  ;;  %v11291_v4 = vsub.f32 %v16060_v0, %v16149_v5  ;;  %v16178_v0 = vand.u32 4294901760, %v10217_v55 }
 0x4cc   : > { %10733 = vmatpush1.xpose.msra.mxu0 %v16121_v18  ;;  %10657 = vmatprep.subr.mxu1 %v16081_v63  ;;  %v10814_v28 = vand.u32 4294901760, %v10813_v34  ;;  %v10821_v53 = vsub.f32 %v10819_v7, %v10820_v36  ;;  %v11240_v63 = vand.u32 4294901760, %v16139_v29  ;;  %v11246_v42 = vand.u32 4294901760, %v16144_v41 }
 0x4cd   : > { %10896 = vmatprep.subr.mxu0 %v10813_v34  ;;  %10226 = vadd.xlane.f32.xlu0 %v10225_v51  ;;  %v3350_v35 = vpop.permute.xlu1 %3349  ;;  %v11292_v38 = vand.u32 4294901760, %v11291_v4  ;;  %v16195_v51 = vsub.f32 %v10218_v62, %v16171_v48 }
 0x4ce   : > { %10539 = vmatprep.mubr.f32.mxu1 %v10296_v40  ;;  %10771 = vmatprep.mubr.f32.mxu0 %v10770_v10  ;;  %v10815_v13 = vsub.f32 %v10813_v34, %v10814_v28  ;;  %v16187_v10 = vadd.f32 %v3350_v35, %v3342_v47 }
 0x4cf   : > { %10543 = vmatmul.mubr.f32.vlgmr.msra.gmra.mxu1 %v10302_v46  ;;  %10777 = vmatmul.mubr.f32.vlgmr.msra.gmra.mxu0 %v10776_v6  ;;  %v10822_v46 = vand.u32 4294901760, %v10821_v53  ;;  %v16192_v6 = vand.u32 4294901760, %v16103_v60  ;;  %v11293_v33 = vsub.f32 %v11291_v4, %v11292_v38 }
 0x4d0   : > { %10659 = vmatpush1.xpose.msra.mxu1 %v16079_v20  ;;  %10899 = vmatpush1.xpose.msra.mxu0 %v10819_v7  ;;  %v10816_v40 = vand.u32 4294901760, %v10815_v13  ;;  %v11241_v20 = vsub.f32 %v16139_v29, %v11240_v63  ;;  %v12133_v44 = vsel %vm16276_vm10, -1e+30, %v16187_v10 }
 0x4d1   : > { %11053 = vmatprep.subr.mxu0 %v10814_v28  ;;  %10693 = vmatprep.mubr.f32.mxu1 %v16020_v22  ;;  %v11286_v22 = vand.u32 4294901760, %v11285_v25  ;;  %v16199_v28 = vsub.f32 %v10217_v55, %v16178_v0  ;;  %v11757_v13 = vsub.f32 %v16103_v60, %v16192_v6  ;;  %v12138_v17 = vsel %vm12137_vm9, %v12133_v44, -inf }
 0x4d2   : > { %10934 = vmatprep.mubr.f32.mxu0 %v16090_v16  ;;  %10817 = vmatprep.subr.mxu1 %v10816_v40  ;;  %v11242_v7 = vand.u32 4294901760, %v11241_v20  ;;  %v13016_v16 = vsel %vm12137_vm9, %v16187_v10, 0 }
 0x4d3   : > { %10695 = vmatmul.mubr.f32.vlgmr.msra.gmra.mxu1 %v16051_v37  ;;  %10937 = vmatmul.mubr.f32.vlgmr.msra.gmra.mxu0 %v16087_v31  ;;  %v11247_v37 = vsub.f32 %v16144_v41, %v11246_v42  ;;  %v11287_v34 = vsub.f32 %v11285_v25, %v11286_v22  ;;  %v11294_v31 = vand.u32 4294901760, %v11293_v33  ;;  %v16221_v60 = vand.u32 4294901760, %v13016_v16 }
 0x4d4   : > { %10823 = vmatpush1.xpose.msra.mxu1 %v10822_v46  ;;  %11057 = vmatpush1.xpose.msra.mxu0 %v10820_v36  ;;  %v11758_v53 = vand.u32 4294901760, %v11757_v13 }
 0x4d5   : > { %10973 = vmatprep.subr.mxu1 %v16125_v52  ;;  %11203 = vmatprep.subr.mxu0 %v16136_v14  ;;  %v11248_v36 = vand.u32 4294901760, %v11247_v37  ;;  %v11288_v47 = vand.u32 4294901760, %v11287_v34 }
 0x4d6   : > { %10857 = vmatprep.mubr.f32.mxu1 %v16075_v11  ;;  %11091 = vmatprep.mubr.f32.mxu0 %v16075_v11  ;;  %v11759_v40 = vsub.f32 %v11757_v13, %v11758_v53 }
 0x4d7   : > { %10859 = vmatmul.mubr.f32.vlgmr.msra.gmra.mxu1 %v16077_v3  ;;  %11093 = vmatmul.mubr.f32.vlgmr.msra.gmra.mxu0 %v16077_v3 }
 0x4d8   : > { %10975 = vmatpush1.xpose.msra.mxu1 %v16121_v18  ;;  %11205 = vmatpush1.xpose.msra.mxu0 %v16149_v5  ;;  %v11760_v20 = vand.u32 4294901760, %v11759_v40 }
 0x4d9   : > { %11243 = vmatprep.mubr.f32.mxu0 %v11242_v7  ;;  %11129 = vmatprep.subr.mxu1 %v16125_v52  ;;  %v11712_v52 = vand.u32 4294901760, %v16195_v51 }
 0x4da   : > { %11368 = vmatprep.subr.mxu0 %v11285_v25  ;;  %11011 = vmatprep.mubr.f32.mxu1 %v10768_v50  ;;  %v11718_v50 = vand.u32 4294901760, %v16199_v28  ;;  %v16232_v25 = vsub.f32 %v13016_v16, %v16221_v60 }
 0x4db   : > { %11015 = vmatmul.mubr.f32.vlgmr.msra.gmra.mxu1 %v10774_v21  ;;  %11249 = vmatmul.mubr.f32.vlgmr.msra.gmra.mxu0 %v11248_v36  ;;  %v11763_v21 = vsub.f32 %v16100_v27, %v16204_v2  ;;  %v14915_v27 = vld [vmem:[%s15709_s15] ss:$0 sm:$0xff] }
 0x4dc   : > { %11131 = vmatpush1.xpose.msra.mxu1 %v16121_v18  ;;  %11371 = vmatpush1.xpose.msra.mxu0 %v11291_v4  ;;  %v11713_v18 = vsub.f32 %v16195_v51, %v11712_v52  ;;  %v16243_v4 = vand.u32 4294901760, %v16232_v25 }
 0x4dd   : > { %11406 = vmatprep.mubr.f32.mxu0 %v16139_v29  ;;  %11289 = vmatprep.subr.mxu1 %v11288_v47 }
 0x4de   : > { %11525 = vmatprep.subr.mxu0 %v11286_v22  ;;  %11165 = vmatprep.mubr.f32.mxu1 %v16075_v11  ;;  %v11719_v11 = vsub.f32 %v16199_v28, %v11718_v50  ;;  %v11714_v62 = vand.u32 4294901760, %v11713_v18  ;;  %v13111_v29 = vsub.f32 %v16232_v25, %v16243_v4 }
 0x4df   : > { %11167 = vmatmul.mubr.f32.vlgmr.msra.gmra.mxu1 %v16077_v3  ;;  %11409 = vmatmul.mubr.f32.vlgmr.msra.gmra.mxu0 %v16144_v41  ;;  %v11764_v3 = vand.u32 4294901760, %v11763_v21 }
 0x4e0   : > { %11295 = vmatpush1.xpose.msra.mxu1 %v11294_v31  ;;  %11329 = vmatprep.mubr.f32.mxu1 %v16119_v12  ;;  %v11720_v55 = vand.u32 4294901760, %v11719_v11 }
 0x4e1   : > { %11529 = vmatpush1.xpose.msra.mxu0 %v11292_v38  ;;  %11563 = vmatprep.mubr.f32.mxu0 %v16119_v12  ;;  %v11765_v46 = vsub.f32 %v11763_v21, %v11764_v3 }
 0x4e2   : > { %11445 = vmatprep.subr.mxu1 %v16136_v14  ;;  %11675 = vmatprep.subr.mxu0 %v16192_v6 }
 0x4e3   : > { %11331 = vmatmul.mubr.f32.vlgmr.msra.gmra.mxu1 %v16127_v26  ;;  %9199 = vperm.xlu0 %14799, %v14915_v27  }
 0x4e4   : > { %11565 = vmatmul.mubr.f32.vlgmr.msra.gmra.mxu0 %v16127_v26  ;;  %11447 = vmatpush1.xpose.msra.mxu1 %v16149_v5 }
 0x4e5   : > { %11483 = vmatprep.mubr.f32.mxu1 %v11240_v63  ;;  %11677 = vmatpush1.xpose.msra.mxu0 %v16204_v2 }
 0x4e6   : > { %11715 = vmatprep.mubr.f32.mxu0 %v11714_v62  ;;  %11601 = vmatprep.subr.mxu1 %v16136_v14  ;;  %v11766_v14 = vand.u32 4294901760, %v11765_v46 }
 0x4e7   : > { %11840 = vmatprep.subr.mxu0 %v11757_v13  ;;  %11487 = vmatmul.mubr.f32.vlgmr.msra.gmra.mxu1 %v11246_v42 }
 0x4e8   : > { %11721 = vmatmul.mubr.f32.vlgmr.msra.gmra.mxu0 %v11720_v55  ;;  %11603 = vmatpush1.xpose.msra.mxu1 %v16149_v5 }
 0x4e9   : > { %11637 = vmatprep.mubr.f32.mxu1 %v16119_v12  ;;  %11843 = vmatpush1.xpose.msra.mxu0 %v11763_v21  ;;  %v16256_v12 = vand.u32 4294901760, %v13111_v29 }
 0x4ea   : > { %11878 = vmatprep.mubr.f32.mxu0 %v16195_v51  ;;  %11761 = vmatprep.subr.mxu1 %v11760_v20 }
 0x4eb   : > { %11997 = vmatprep.subr.mxu0 %v11758_v53  ;;  %11639 = vmatmul.mubr.f32.vlgmr.msra.gmra.mxu1 %v16127_v26 }
 0x4ec   : > { %11881 = vmatmul.mubr.f32.vlgmr.msra.gmra.mxu0 %v16199_v28  ;;  %11767 = vmatpush1.xpose.msra.mxu1 %v11766_v14 }
 0x4ed   : > { %11801 = vmatprep.mubr.f32.mxu1 %v16171_v48  ;;  %12001 = vmatpush1.xpose.msra.mxu0 %v11764_v3 }
 0x4ee   : > { %12035 = vmatprep.mubr.f32.mxu0 %v16171_v48  ;;  %11917 = vmatprep.subr.mxu1 %v16192_v6 }
 0x4ef   : > { %11803 = vmatmul.mubr.f32.vlgmr.msra.gmra.mxu1 %v16178_v0  ;;  %14802 = vset.pattern.permute.xlu0 %v14927_v24 }
 0x4f0   : > { %12037 = vmatmul.mubr.f32.vlgmr.msra.gmra.mxu0 %v16178_v0  ;;  %11919 = vmatpush1.xpose.msra.mxu1 %v16204_v2 }
 0x4f1   : > { %11955 = vmatprep.mubr.f32.mxu1 %v11712_v52  ;;  %14617 = vmatprep.mubr.f32.mxu0 %v16256_v12 }
 0x4f2   : > { %12073 = vmatprep.subr.mxu1 %v16192_v6 }
 0x4f3   : > { %11959 = vmatmul.mubr.f32.vlgmr.msra.gmra.mxu1 %v11718_v50 }
 0x4f4   : > { %12075 = vmatpush1.xpose.msra.mxu1 %v16204_v2  ;;  %12109 = vmatprep.mubr.f32.mxu1 %v16171_v48 }
 0x4f7   : > { %12111 = vmatmul.mubr.f32.vlgmr.msra.gmra.mxu1 %v16178_v0 }
 0x4f8   : > { %14631 = vmatprep.mubr.f32.mxu1 %v16221_v60 }
 0x556   : > { %v16267_v26 = vpop.xlane.xlu0 %10226 }
 0x55e   : > { %v9200_v24 = vpop.permute.xlu0 %9199 }
 0x55f   : > { %v16272_v41 = vadd.f32 %v9200_v24, %v9197_v8 }
 0x561   : > { %v16283_v63 = vsel %vm16276_vm10, -1e+30, %v16272_v41  ;;  %v13022_v5 = vsel %vm12137_vm9, %v16272_v41, 0 }
 0x562   : > { %v12144_v42 = vsel %vm12137_vm9, %v16283_v63, -inf }
 0x563   : > { %12145 = vmax.xlane.f32.xlu0 %v12144_v42 }
 0x582   : > { %v10306_v22 = vpop.f32.mrf.mxu0 }
 0x584   : > { %v10308_v48 = vpop.f32.mrf.mxu0 }
 0x586   : > { %v10466_v49 = vpop.f32.mrf.mxu0 }
 0x588   : > { %v10468_v9 = vpop.f32.mrf.mxu0 }
 0x58a   : > { %v10388_v8 = vpop.f32.mrf.mxu1  ;;  %v10622_v35 = vpop.f32.mrf.mxu0 }
 0x58b   : > { %v10389_v37 = vadd.f32 %v10388_v8, %v10306_v22 }
 0x58c   : > { %v10390_v58 = vpop.f32.mrf.mxu1  ;;  %v10624_v0 = vpop.f32.mrf.mxu0 }
 0x58d   : > { %v10467_v38 = vadd.f32 %v10466_v49, %v10389_v37 }
 0x58f   : > { %v10544_v7 = vpop.f32.mrf.mxu1  ;;  %v10778_v34 = vpop.f32.mrf.mxu0 }
 0x590   : > { %v10545_v36 = vadd.f32 %v10544_v7, %v10467_v38 }
 0x591   : > { %v10546_v6 = vpop.f32.mrf.mxu1  ;;  %v10780_v51 = vpop.f32.mrf.mxu0 }
 0x592   : > { %v10623_v52 = vadd.f32 %v10622_v35, %v10545_v36 }
 0x593   : > { %v10696_v28 = vpop.f32.mrf.mxu1  ;;  %v10938_v33 = vpop.f32.mrf.mxu0 }
 0x594   : > { %v10697_v21 = vadd.f32 %v10696_v28, %v10623_v52 }
 0x595   : > { %v10698_v2 = vpop.f32.mrf.mxu1  ;;  %v10940_v47 = vpop.f32.mrf.mxu0 }
 0x596   : > { %v10779_v27 = vadd.f32 %v10778_v34, %v10697_v21 }
 0x597   : > { %v10860_v13 = vpop.f32.mrf.mxu1  ;;  %v11094_v16 = vpop.f32.mrf.mxu0 }
 0x598   : > { %v10861_v20 = vadd.f32 %v10860_v13, %v10779_v27 }
 0x599   : > { %v10862_v31 = vpop.f32.mrf.mxu1  ;;  %v11096_v50 = vpop.f32.mrf.mxu0 }
 0x59a   : > { %v10939_v22 = vadd.f32 %v10938_v33, %v10861_v20 }
 0x59b   : > { %v11016_v18 = vpop.f32.mrf.mxu1  ;;  %v11250_v53 = vpop.f32.mrf.mxu0 }
 0x59c   : > { %v11017_v58 = vadd.f32 %v11016_v18, %v10939_v22 }
 0x59d   : > { %v11018_v11 = vpop.f32.mrf.mxu1  ;;  %v11252_v3 = vpop.f32.mrf.mxu0 }
 0x59e   : > { %v11095_v36 = vadd.f32 %v11094_v16, %v11017_v58 }
 0x59f   : > { %v11168_v62 = vpop.f32.mrf.mxu1  ;;  %v11410_v40 = vpop.f32.mrf.mxu0 }
 0x5a0   : > { %v11169_v31 = vadd.f32 %v11168_v62, %v11095_v36  ;;  %v16293_v62 = vadd.f32 %v16151_v32, %v6272_v23  ;;  %v16313_v23 = vsel %vm16276_vm10, 1.0, %v14924_v54 }
 0x5a1   : > { %v11170_v55 = vpop.f32.mrf.mxu1  ;;  %v11412_v46 = vpop.f32.mrf.mxu0  ;;  %12196 = vrot.lane.b32.xlu0 %v16313_v23, %s14929_s26 }
 0x5a2   : > { %v12119_v18 = vrot.slane %v11169_v31, %v15137_v56 }
 0x5a3   : > { %v11332_v14 = vpop.f32.mrf.mxu1 }
 0x5a4   : > { %v11333_v29 = vadd.f32 %v11332_v14, %v11250_v53  ;;  %v11566_v24 = vpop.f32.mrf.mxu0  ;;  %v12120_v16 = vadd.f32 %v12119_v18, %v16267_v26  ;;  %v12134_v26 = vsel %vm16276_vm10, -1e+30, %v16293_v62 }
 0x5a5   : > { %v11334_v42 = vpop.f32.mrf.mxu1  ;;  %v12141_v22 = vsel %vm12137_vm9, %v12134_v26, -inf }
 0x5a6   : > { %v11568_v48 = vpop.f32.mrf.mxu0  ;;  %v11411_v49 = vadd.f32 %v11410_v40, %v11333_v29 }
 0x5a7   : > { %v11488_v9 = vpop.f32.mrf.mxu1 }
 0x5a8   : > { %v11489_v8 = vadd.f32 %v11488_v9, %v11411_v49  ;;  %v11722_v35 = vpop.f32.mrf.mxu0 }
 0x5a9   : > { %v11490_v37 = vpop.f32.mrf.mxu1 }
 0x5aa   : > { %v11724_v0 = vpop.f32.mrf.mxu0  ;;  %v11567_v38 = vadd.f32 %v11566_v24, %v11489_v8 }
 0x5ab   : > { %v11640_v7 = vpop.f32.mrf.mxu1 }
 0x5ac   : > { %v11641_v34 = vadd.f32 %v11640_v7, %v11567_v38  ;;  %v11882_v6 = vpop.f32.mrf.mxu0 }
 0x5ad   : > { %v11642_v51 = vpop.f32.mrf.mxu1 }
 0x5ae   : > { %v11884_v28 = vpop.f32.mrf.mxu0  ;;  %v11723_v2 = vadd.f32 %v11722_v35, %v11641_v34 }
 0x5af   : > { %v11804_v47 = vpop.f32.mrf.mxu1 }
 0x5b0   : > { %v11805_v52 = vadd.f32 %v11804_v47, %v11723_v2  ;;  %v12038_v13 = vpop.f32.mrf.mxu0 }
 0x5b1   : > { %v11806_v33 = vpop.f32.mrf.mxu1 }
 0x5b2   : > { %v12040_v50 = vpop.f32.mrf.mxu0  ;;  %v11883_v21 = vadd.f32 %v11882_v6, %v11805_v52 }
 0x5b3   : > { %v11960_v53 = vpop.f32.mrf.mxu1 }
 0x5b4   : > { %v11961_v11 = vadd.f32 %v11960_v53, %v11883_v21 }
 0x5b5   : > { %v11962_v3 = vpop.f32.mrf.mxu1 }
 0x5b6   : > { %v12039_v27 = vadd.f32 %v12038_v13, %v11961_v11  ;;  %v13019_v11 = vsel %vm12137_vm9, %v16293_v62, 0 }
 0x5b7   : > { %v12112_v40 = vpop.f32.mrf.mxu1 }
 0x5b8   : > { %v12113_v55 = vadd.f32 %v12112_v40, %v12039_v27  ;;  %v16332_v27 = vand.u32 4294901760, %v13019_v11 }
 0x5b9   : > { %v12114_v46 = vpop.f32.mrf.mxu1 }
 0x5ba   : > { %v12121_v20 = vmul.f32 2.0, %v12113_v55 }
 0x5bc   : > { %v12122_v14 = vsub.f32 %v12120_v16, %v12121_v20 }
 0x5be   : > { %v16296_v29 = vadd.f32 %v16032_v59, %v12122_v14 }
 0x5c0   : > { %v12136_v24 = vsel %vm16276_vm10, -1e+30, %v16296_v29  ;;  %v13025_v14 = vsel %vm12137_vm9, %v16296_v29, 0 }
 0x5c1   : > { %v12147_v42 = vsel %vm12137_vm9, %v12136_v24, -inf }
 0x5c2   : > { %12148 = vmax.xlane.f32.xlu1 %v12147_v42 }
 0x5c6   : > { %12142 = vmax.xlane.f32.xlu1 %v12141_v22 }
 0x5ca   : > { %12139 = vmax.xlane.f32.xlu1 %v12138_v17 }
 0x5ec   : > { %v12146_v59 = vpop.xlane.xlu0 %12145 }
 0x5ed   : > { %v12152_v32 = vsub.f32 %v16283_v63, %v12146_v59 }
 0x5ef   : > { %v12158_v48 = vmul.f32 1.442695, %v12152_v32 }
 0x5f1   : > { %14833 = vpow2.f32 %v12158_v48  ;;  %v16359_v48 = vand.u32 4294901760, %v13025_v14 }
 0x5fe   : > { %v14834_v7 = vpop.eup %14833 }
 0x5ff   : > { %v12164_v51 = vsel %vm16276_vm10, 0.0, %v14834_v7 }
 0x600   : > { %v12172_v28 = vsel %vm12137_vm9, %v12164_v51, 0.0 }
 0x613   : > { %v16337_v16 = vpop.permute.xlu0 %12196 }
 0x64b   : > { %v12149_v49 = vpop.xlane.xlu1 %12148 }
 0x64c   : > { %v12153_v9 = vsub.f32 %v12136_v24, %v12149_v49 }
 0x64e   : > { %v12160_v8 = vmul.f32 1.442695, %v12153_v9 }
 0x64f   : > { %v12143_v35 = vpop.xlane.xlu1 %12142 }
 0x650   : > { %14835 = vpow2.f32 %v12160_v8  ;;  %v12151_v37 = vsub.f32 %v12134_v26, %v12143_v35  ;;  %v16344_v26 = vand.u32 4294901760, %v13022_v5 }
 0x652   : > { %v12156_v58 = vmul.f32 1.442695, %v12151_v37 }
 0x653   : > { %v12140_v0 = vpop.xlane.xlu1 %12139 }
 0x654   : > { %14837 = vpow2.f32 %v12156_v58  ;;  %v12150_v54 = vsub.f32 %v12133_v44, %v12140_v0  ;;  %v16351_v44 = vsub.f32 %v13019_v11, %v16332_v27  ;;  %v16370_v0 = vsub.f32 %v13022_v5, %v16344_v26 }
 0x656   : > { %v12154_v38 = vmul.f32 1.442695, %v12150_v54 }
 0x658   : > { %14839 = vpow2.f32 %v12154_v38 }
 0x65d   : > { %v14836_v34 = vpop.eup %14835 }
 0x65e   : > { %v12165_v6 = vsel %vm16276_vm10, 0.0, %v14836_v34  ;;  %v16378_v34 = vand.u32 4294901760, %v16351_v44 }
 0x65f   : > { %v12175_v63 = vsel %vm12137_vm9, %v12165_v6, 0.0 }
 0x660   : > { %12176 = vadd.xlane.f32.xlu1 %v12175_v63 }
 0x661   : > { %v14838_v36 = vpop.eup %14837 }
 0x662   : > { %v12163_v2 = vsel %vm16276_vm10, 0.0, %v14838_v36  ;;  %v16387_v36 = vsub.f32 %v13025_v14, %v16359_v48 }
 0x663   : > { %v12169_v52 = vsel %vm12137_vm9, %v12163_v2, 0.0 }
 0x664   : > { %12173 = vadd.xlane.f32.xlu1 %v12172_v28  ;;  %v16409_v5 = vand.u32 4294901760, %v16387_v36 }
 0x665   : > { %v14840_v47 = vpop.eup %14839 }
 0x666   : > { %v12162_v13 = vsel %vm16276_vm10, 0.0, %v14840_v47  ;;  %16846 = vst [vmem:[#allocation2_spill] sm:$0xff] %v16409_v5 }
 0x667   : > { %v12166_v33 = vsel %vm12137_vm9, %v12162_v13, 0.0 }
 0x668   : > { %12170 = vadd.xlane.f32.xlu1 %v12169_v52 }
 0x66c   : > { %12167 = vadd.xlane.f32.xlu1 %v12166_v33 }
 0x6e9   : > { %v12177_v31 = vpop.xlane.xlu1 %12176 }
 0x6ea   : > { %14841 = vrcp.f32 %v12177_v31 }
 0x6ed   : > { %v12174_v50 = vpop.xlane.xlu1 %12173 }
 0x6ee   : > { %14843 = vrcp.f32 %v12174_v50 }
 0x6f1   : > { %v12171_v21 = vpop.xlane.xlu1 %12170 }
 0x6f2   : > { %14845 = vrcp.f32 %v12171_v21  ;;  %v16399_v21 = vand.u32 4294901760, %v16370_v0 }
 0x6f5   : > { %v12168_v53 = vpop.xlane.xlu1 %12167 }
 0x6f6   : > { %14847 = vrcp.f32 %v12168_v53  ;;  %v13121_v53 = vsub.f32 %v16351_v44, %v16378_v34 }
 0x6f7   : > { %v14842_v3 = vpop.eup %14841 }
 0x6f8   : > { %v12185_v18 = vmul.f32 %v14842_v3, %v12165_v6 }
 0x6fa   : > { %v12190_v40 = vmul.f32 0.1, %v12185_v18  ;;  %v13037_v55 = vsel %vm12137_vm9, %v12185_v18, 0 }
 0x6fb   : > { %v14844_v46 = vpop.eup %14843  ;;  %v16339_v20 = vand.u32 4294901760, %v13037_v55 }
 0x6fc   : > { %v12183_v24 = vmul.f32 %v14844_v46, %v12164_v51  ;;  %v12194_v42 = vsub.f32 %v16313_v23, %v12190_v40 }
 0x6fd   : > { %14609 = vmatprep.subr.mxu0 %v16339_v20  ;;  %v16348_v22 = vsub.f32 %v13037_v55, %v16339_v20 }
 0x6fe   : > { %v12189_v17 = vmul.f32 0.1, %v12183_v24  ;;  %v16355_v59 = vsel %vm12137_vm9, %v12194_v42, %v16337_v16  ;;  %v13034_v32 = vsel %vm12137_vm9, %v12183_v24, 0  ;;  %14610 = vmatpush3.xpose.msra.mxu0 %v16339_v20  ;;  %v13131_v42 = vsub.f32 %v16370_v0, %v16399_v21 }
 0x6ff   : > { %v14846_v49 = vpop.eup %14845  ;;  %v16361_v9 = vand.u32 4294901760, %v13034_v32  ;;  %v14479_v8 = vadd.f32 -1.0, %v16355_v59  ;;  %v16365_v35 = vand.u32 4294901760, %v16348_v22 }
 0x700   : > { %v12181_v37 = vmul.f32 %v14846_v49, %v12163_v2  ;;  %v12193_v58 = vsub.f32 %v16313_v23, %v12189_v17 }
 0x701   : > { %14611 = vmatprep.subr.mxu0 %v16361_v9  ;;  %v12255_v54 = vrot.slane %v14479_v8, %v15137_v56  ;;  %v13176_v38 = vsub.f32 %v16348_v22, %v16365_v35  ;;  %v13181_v7 = vsub.f32 %v13034_v32, %v16361_v9 }
 0x702   : > { %v12188_v6 = vmul.f32 0.1, %v12181_v37  ;;  %v16382_v63 = vsel %vm12137_vm9, %v12193_v58, %v16337_v16  ;;  %v13031_v51 = vsel %vm12137_vm9, %v12181_v37, 0  ;;  %14612 = vmatpush3.xpose.msra.mxu0 %v16361_v9  ;;  %v13141_v37 = vsub.f32 %v16387_v36, %v16409_v5 }
 0x703   : > { %v14848_v28 = vpop.eup %14847  ;;  %14849 = vrcp.f32 %v16382_v63  ;;  %v16390_v2 = vand.u32 4294901760, %v13031_v51  ;;  %v12259_v47 = vsel %vm12235_vm11, %v12255_v54, %v16355_v59  ;;  %v13177_v52 = vand.u32 4294901760, %v13176_v38 }
 0x704   : > { %v12179_v33 = vmul.f32 %v14848_v28, %v12162_v13  ;;  %v12192_v31 = vsub.f32 %v16313_v23, %v12188_v6  ;;  %12277 = vperm.xlu0 %14802, %v12259_v47   ;;  %v16396_v50 = vand.u32 4294901760, %v13181_v7  ;;  %14851 = vrcp.f32 %v16355_v59 }
 0x705   : > { %14613 = vmatprep.subr.mxu0 %v16390_v2  ;;  %14623 = vmatprep.subr.mxu1 %v13177_v52  ;;  %v13188_v11 = vsub.f32 %v13031_v51, %v16390_v2  ;;  %v16446_v38 = vand.u32 4294901760, %v13141_v37 }
 0x706   : > { %v12187_v3 = vmul.f32 0.1, %v12179_v33  ;;  %v13028_v18 = vsel %vm12137_vm9, %v12179_v33, 0  ;;  %14614 = vmatpush3.xpose.msra.mxu0 %v16390_v2  ;;  %14624 = vmatpush3.xpose.msra.mxu1 %v13177_v52  ;;  %v13183_v13 = vsub.f32 %v13181_v7, %v16396_v50  ;;  %v16413_v40 = vsel %vm12137_vm9, %v12192_v31, %v16337_v16 }
 0x707   : > { %v16416_v55 = vand.u32 4294901760, %v13028_v18  ;;  %v16418_v46 = vand.u32 4294901760, %v13188_v11  ;;  %14853 = vrcp.f32 %v16413_v40  ;;  %v14477_v31 = vadd.f32 -1.0, %v16413_v40 }
 0x708   : > { %v12191_v14 = vsub.f32 %v16313_v23, %v12187_v3  ;;  %v13184_v24 = vand.u32 4294901760, %v13183_v13  ;;  %v16432_v23 = vand.u32 4294901760, %v13121_v53 }
 0x709   : > { %14615 = vmatprep.subr.mxu0 %v16416_v55  ;;  %v13190_v17 = vsub.f32 %v13188_v11, %v16418_v46  ;;  %v13195_v32 = vsub.f32 %v13028_v18, %v16416_v55  ;;  %v12247_v3 = vrot.slane %v14477_v31, %v15137_v56 }
 0x70a   : > { %v16428_v49 = vsel %vm12137_vm9, %v12191_v14, %v16337_v16  ;;  %14625 = vmatprep.subr.mxu1 %v13184_v24  ;;  %14616 = vmatpush3.xpose.msra.mxu0 %v16416_v55  ;;  %v16440_v16 = vand.u32 4294901760, %v13131_v42  ;;  %v16847_v14 = vmov 1  }
 0x70b   : > { %14855 = vrcp.f32 %v16428_v49  ;;  %14626 = vmatpush3.xpose.msra.mxu1 %v13184_v24  ;;  %14637 = vmatprep.subr.mxu0 %v16348_v22  ;;  %v13191_v8 = vand.u32 4294901760, %v13190_v17  ;;  %v16438_v58 = vand.u32 4294901760, %v13195_v32  ;;  %v14476_v47 = vadd.f32 -1.0, %v16428_v49 }
 0x70c   : > { %v12257_v13 = vsel %vm12235_vm11, %v12247_v3, %v16413_v40 }
 0x70d   : > { %14618 = vmatmul.mubr.f32.vlgmr.msra.gmra.mxu0 %v16432_v23  ;;  %14627 = vmatprep.subr.mxu1 %v13191_v8  ;;  %v13197_v54 = vsub.f32 %v13195_v32, %v16438_v58  ;;  %v12243_v53 = vrot.slane %v14476_v47, %v15137_v56 }
 0x70e   : > { %14620 = vmatprep.mubr.f32.mxu0 %v16440_v16  ;;  %14638 = vmatpush3.xpose.msra.mxu0 %v16348_v22  ;;  %v14478_v22 = vadd.f32 -1.0, %v16382_v63 }
 0x70f   : > { %14628 = vmatpush3.xpose.msra.mxu1 %v13191_v8  ;;  %14639 = vmatprep.subr.mxu0 %v13181_v7  ;;  %v13198_v6 = vand.u32 4294901760, %v13197_v54  ;;  %v12256_v18 = vsel %vm12235_vm11, %v12243_v53, %v16428_v49 }
 0x710   : > { %v14850_v51 = vpop.eup %14849  ;;  %v12251_v33 = vrot.slane %v14478_v22, %v15137_v56 }
 0x711   : > { %12223 = vperm.xlu1 %14801, %v14850_v51   ;;  %14621 = vmatmul.mubr.f32.gmra.mxu0 %v16446_v38  ;;  %v14852_v28 = vpop.eup %14851 }
 0x712   : > { %14629 = vmatprep.subr.mxu1 %v13198_v6  ;;  %14640 = vmatpush3.xpose.msra.mxu0 %v13181_v7 }
 0x713   : > { %14630 = vmatpush3.xpose.msra.mxu1 %v13198_v6  ;;  %14645 = vmatprep.mubr.f32.mxu0 %v16232_v25 }
 0x714   : > { %14641 = vmatprep.subr.mxu0 %v13188_v11  ;;  %14651 = vmatprep.subr.mxu1 %v16339_v20  ;;  %v14854_v52 = vpop.eup %14853 }
 0x715   : > { %12228 = vperm.xlu1 %14801, %v14852_v28  }
 0x716   : > { %14632 = vmatmul.mubr.f32.vlgmr.msra.gmra.mxu1 %v16332_v27  ;;  %14642 = vmatpush3.xpose.msra.mxu0 %v13188_v11  ;;  %v12258_v11 = vsel %vm12235_vm11, %v12251_v33, %v16382_v63 }
 0x717   : > { %14634 = vmatprep.mubr.f32.mxu1 %v16344_v26  ;;  %14652 = vmatpush3.xpose.msra.mxu1 %v16339_v20 }
 0x718   : > { %v14856_v7 = vpop.eup %14855  ;;  %14643 = vmatprep.subr.mxu0 %v13195_v32  ;;  %14653 = vmatprep.subr.mxu1 %v16361_v9 }
 0x719   : > { %12218 = vperm.xlu1 %14801, %v14854_v52   ;;  %12213 = vperm.xlu0 %14802, %v14856_v7  }
 0x71a   : > { %14635 = vmatmul.mubr.f32.gmra.mxu1 %v16359_v48  ;;  %14644 = vmatpush3.xpose.msra.mxu0 %v13195_v32 }
 0x71b   : > { %14654 = vmatpush3.xpose.msra.mxu1 %v16361_v9  ;;  %14659 = vmatprep.mubr.f32.mxu1 %v16243_v4 }
 0x71c   : > { %14655 = vmatprep.subr.mxu1 %v16390_v2  ;;  %14665 = vmatprep.subr.mxu0 %v16365_v35 }
 0x71d   : > { %12272 = vperm.xlu1 %14801, %v12258_v11   ;;  %14646 = vmatmul.mubr.f32.vlgmr.msra.gmra.mxu0 %v16351_v44 }
 0x71e   : > { %12262 = vperm.xlu0 %14802, %v12256_v18   ;;  %14648 = vmatprep.mubr.f32.mxu0 %v16370_v0 }
 0x71f   : > { %14656 = vmatpush3.xpose.msra.mxu1 %v16390_v2  ;;  %14666 = vmatpush3.xpose.msra.mxu0 %v16365_v35 }
 0x720   : > { %14657 = vmatprep.subr.mxu1 %v16416_v55  ;;  %14667 = vmatprep.subr.mxu0 %v16396_v50 }
 0x721   : > { %12267 = vperm.xlu1 %14801, %v12257_v13   ;;  %14649 = vmatmul.mubr.f32.gmra.mxu0 %v16387_v36 }
 0x722   : > { %14673 = vmatprep.mubr.f32.mxu0 %v16221_v60  ;;  %14803 = vset.pattern.permute.xlu0 %v16847_v14 }
 0x723   : > { %14658 = vmatpush3.xpose.msra.mxu1 %v16416_v55  ;;  %14668 = vmatpush3.xpose.msra.mxu0 %v16396_v50 }
 0x724   : > { %14669 = vmatprep.subr.mxu0 %v16418_v46  ;;  %14679 = vmatprep.subr.mxu1 %v16339_v20 }
 0x725   : > { %14804 = vset.pattern.permute.xlu1 %v16847_v14 }
 0x726   : > { %14660 = vmatmul.mubr.f32.vlgmr.msra.gmra.mxu1 %v16378_v34 }
 0x727   : > { %14662 = vmatprep.mubr.f32.mxu1 %v16399_v21  ;;  %14670 = vmatpush3.xpose.msra.mxu0 %v16418_v46 }
 0x728   : > { %14680 = vmatpush3.xpose.msra.mxu1 %v16339_v20  ;;  %14671 = vmatprep.subr.mxu0 %v16438_v58 }
 0x729   : > { %14681 = vmatprep.subr.mxu1 %v16361_v9 }
 0x72a   : > { %14663 = vmatmul.mubr.f32.gmra.mxu1 %v16409_v5 }
 0x72b   : > { %14672 = vmatpush3.xpose.msra.mxu0 %v16438_v58  ;;  %14687 = vmatprep.mubr.f32.mxu1 %v16221_v60 }
 0x72c   : > { %14682 = vmatpush3.xpose.msra.mxu1 %v16361_v9 }
 0x72d   : > { %14683 = vmatprep.subr.mxu1 %v16390_v2 }
 0x72e   : > { %14674 = vmatmul.mubr.f32.vlgmr.msra.gmra.mxu0 %v16332_v27 }
 0x72f   : > { %14676 = vmatprep.mubr.f32.mxu0 %v16344_v26 }
 0x730   : > { %14684 = vmatpush3.xpose.msra.mxu1 %v16390_v2 }
 0x731   : > { %14685 = vmatprep.subr.mxu1 %v16416_v55 }
 0x732   : > { %14677 = vmatmul.mubr.f32.gmra.mxu0 %v16359_v48 }
 0x733   : > { %14701 = vmatprep.mubr.f32.mxu0 %v16256_v12 }
 0x734   : > { %14686 = vmatpush3.xpose.msra.mxu1 %v16416_v55 }
 0x737   : > { %14688 = vmatmul.mubr.f32.vlgmr.msra.gmra.mxu1 %v16332_v27 }
 0x738   : > { %14690 = vmatprep.mubr.f32.mxu1 %v16344_v26 }
 0x73b   : > { %14691 = vmatmul.mubr.f32.gmra.mxu1 %v16359_v48 }
 0x73c   : > { %14715 = vmatprep.mubr.f32.mxu1 %v16221_v60 }
 0x77f   : > { %v12278_v9 = vpop.permute.xlu0 %12277 }
 0x78c   : > { %v12224_v20 = vpop.permute.xlu1 %12223 }
 0x78d   : > { %v12233_v50 = vmul.f32 %v12224_v20, %v16382_v63 }
 0x78f   : > { %v12291_v8 = vrot.slane %v12233_v50, %v15137_v56 }
 0x790   : > { %v12229_v35 = vpop.permute.xlu1 %12228 }
 0x791   : > { %v12234_v2 = vmul.f32 %v12229_v35, %v16355_v59 }
 0x793   : > { %v12295_v46 = vrot.slane %v12234_v2, %v15137_v56 }
 0x794   : > { %v12214_v12 = vpop.permute.xlu0 %12213  ;;  %v12219_v24 = vpop.permute.xlu1 %12218 }
 0x795   : > { %v12299_v55 = vmul.f32 %v12295_v46, %v12278_v9  ;;  %v12231_v42 = vmul.f32 %v12214_v12, %v16428_v49  ;;  %v12232_v32 = vmul.f32 %v12219_v24, %v16413_v40 }
 0x797   : > { %v12303_v17 = vsub.f32 %v16355_v59, %v12299_v55  ;;  %v12283_v58 = vrot.slane %v12231_v42, %v15137_v56  ;;  %v12287_v28 = vrot.slane %v12232_v32, %v15137_v56 }
 0x798   : > { %v12273_v37 = vpop.permute.xlu1 %12272 }
 0x799   : > { %14857 = vrcp.f32 %v12303_v17  ;;  %v12298_v54 = vmul.f32 %v12291_v8, %v12273_v37  ;;  %v12263_v6 = vpop.permute.xlu0 %12262  ;;  %v14483_v33 = vadd.f32 -1.0, %v12303_v17 }
 0x79a   : > { %v12296_v47 = vmul.f32 %v12283_v58, %v12263_v6 }
 0x79b   : > { %v12302_v51 = vsub.f32 %v16382_v63, %v12298_v54  ;;  %v12356_v53 = vrot.slane %v14483_v33, %v15143_v61 }
 0x79c   : > { %v12268_v22 = vpop.permute.xlu1 %12267  ;;  %v12300_v7 = vsub.f32 %v16428_v49, %v12296_v47 }
 0x79d   : > { %14859 = vrcp.f32 %v12302_v51  ;;  %v12297_v52 = vmul.f32 %v12287_v28, %v12268_v22  ;;  %v14482_v11 = vadd.f32 -1.0, %v12302_v51  ;;  %v12360_v56 = vsel %vm12336_vm12, %v12356_v53, %v12303_v17 }
 0x79e   : > { %v14480_v14 = vadd.f32 -1.0, %v12300_v7 }
 0x79f   : > { %v12301_v59 = vsub.f32 %v16413_v40, %v12297_v52  ;;  %v12352_v3 = vrot.slane %v14482_v11, %v15143_v61 }
 0x7a0   : > { %v12344_v35 = vrot.slane %v14480_v14, %v15143_v61 }
 0x7a1   : > { %14861 = vrcp.f32 %v12301_v59  ;;  %v14481_v18 = vadd.f32 -1.0, %v12301_v59  ;;  %v12359_v49 = vsel %vm12336_vm12, %v12352_v3, %v12302_v51 }
 0x7a2   : > { %14863 = vrcp.f32 %v12300_v7  ;;  %v12357_v2 = vsel %vm12336_vm12, %v12344_v35, %v12300_v7 }
 0x7a3   : > { %v12348_v13 = vrot.slane %v14481_v18, %v15143_v61 }
 0x7a5   : > { %v12358_v9 = vsel %vm12336_vm12, %v12348_v13, %v12301_v59 }
 0x7a6   : > { %v14858_v31 = vpop.eup %14857 }
 0x7a7   : > { %12329 = vperm.xlu1 %14804, %v14858_v31  }
 0x7aa   : > { %v14860_v63 = vpop.eup %14859 }
 0x7ab   : > { %12378 = vperm.xlu1 %14804, %v12360_v56   ;;  %12324 = vperm.xlu0 %14803, %v14860_v63  }
 0x7ae   : > { %v14862_v40 = vpop.eup %14861 }
 0x7af   : > { %12373 = vperm.xlu0 %14803, %v12359_v49   ;;  %12319 = vperm.xlu1 %14804, %v14862_v40   ;;  %v14864_v20 = vpop.eup %14863 }
 0x7b3   : > { %12368 = vperm.xlu0 %14803, %v12358_v9   ;;  %12314 = vperm.xlu1 %14804, %v14864_v20  }
 0x7b7   : > { %12363 = vperm.xlu1 %14804, %v12357_v2   ;;  %14805 = vset.pattern.permute.xlu0 %v14928_v43 }
 0x7bb   : > { %14806 = vset.pattern.permute.xlu1 %v14928_v43 }
 0x822   : > { %v12330_v50 = vpop.permute.xlu1 %12329 }
 0x823   : > { %v12335_v46 = vmul.f32 %v12330_v50, %v12303_v17 }
 0x825   : > { %v12396_v12 = vrot.slane %v12335_v46, %v15143_v61 }
 0x826   : > { %v12325_v24 = vpop.permute.xlu0 %12324  ;;  %v12379_v55 = vpop.permute.xlu1 %12378 }
 0x827   : > { %v12334_v42 = vmul.f32 %v12325_v24, %v12302_v51  ;;  %v12400_v32 = vmul.f32 %v12396_v12, %v12379_v55  ;;  %v16848_v12 = vmov 3  }
 0x829   : > { %v12404_v8 = vsub.f32 %v12303_v17, %v12400_v32  ;;  %v12392_v37 = vrot.slane %v12334_v42, %v15143_v61 }
 0x82a   : > { %v12374_v58 = vpop.permute.xlu0 %12373  ;;  %v12320_v54 = vpop.permute.xlu1 %12319 }
 0x82b   : > { %14865 = vrcp.f32 %v12404_v8  ;;  %v12399_v6 = vmul.f32 %v12392_v37, %v12374_v58  ;;  %v12333_v28 = vmul.f32 %v12320_v54, %v12301_v59  ;;  %v14487_v18 = vadd.f32 -1.0, %v12404_v8 }
 0x82d   : > { %v12403_v22 = vsub.f32 %v12302_v51, %v12399_v6  ;;  %v12388_v47 = vrot.slane %v12333_v28, %v15143_v61  ;;  %v12457_v51 = vrot.slane %v14487_v18, %v15155_v15 }
 0x82e   : > { %v12369_v43 = vpop.permute.xlu0 %12368  ;;  %v12315_v52 = vpop.permute.xlu1 %12314 }
 0x82f   : > { %14867 = vrcp.f32 %v12403_v22  ;;  %v12398_v33 = vmul.f32 %v12388_v47, %v12369_v43  ;;  %v12332_v31 = vmul.f32 %v12315_v52, %v12300_v7  ;;  %v14486_v49 = vadd.f32 -1.0, %v12403_v22 }
 0x830   : > { %v12461_v14 = vsel %vm12437_vm13, %v12457_v51, %v12404_v8 }
 0x831   : > { %v12402_v53 = vsub.f32 %v12301_v59, %v12398_v33  ;;  %v12384_v11 = vrot.slane %v12332_v31, %v15143_v61  ;;  %v12453_v59 = vrot.slane %v14486_v49, %v15155_v15 }
 0x832   : > { %v12364_v63 = vpop.permute.xlu1 %12363 }
 0x833   : > { %14869 = vrcp.f32 %v12402_v53  ;;  %v12397_v17 = vmul.f32 %v12384_v11, %v12364_v63  ;;  %v14485_v61 = vadd.f32 -1.0, %v12402_v53  ;;  %v12460_v9 = vsel %vm12437_vm13, %v12453_v59, %v12403_v22 }
 0x835   : > { %v12401_v56 = vsub.f32 %v12300_v7, %v12397_v17  ;;  %v12449_v35 = vrot.slane %v14485_v61, %v15155_v15 }
 0x837   : > { %14871 = vrcp.f32 %v12401_v56  ;;  %v14484_v20 = vadd.f32 -1.0, %v12401_v56  ;;  %v12459_v50 = vsel %vm12437_vm13, %v12449_v35, %v12402_v53 }
 0x838   : > { %v14866_v3 = vpop.eup %14865 }
 0x839   : > { %12430 = vperm.xlu0 %14805, %v14866_v3   ;;  %v12445_v2 = vrot.slane %v14484_v20, %v15155_v15 }
 0x83b   : > { %v12458_v46 = vsel %vm12437_vm13, %v12445_v2, %v12401_v56 }
 0x83c   : > { %v14868_v40 = vpop.eup %14867 }
 0x83d   : > { %12425 = vperm.xlu1 %14806, %v14868_v40  }
 0x840   : > { %v14870_v13 = vpop.eup %14869 }
 0x841   : > { %12479 = vperm.xlu1 %14806, %v12461_v14   ;;  %12420 = vperm.xlu0 %14805, %v14870_v13  }
 0x844   : > { %v14872_v7 = vpop.eup %14871 }
 0x845   : > { %12474 = vperm.xlu1 %14806, %v12460_v9   ;;  %12415 = vperm.xlu0 %14805, %v14872_v7  }
 0x849   : > { %12469 = vperm.xlu1 %14806, %v12459_v50   ;;  %12464 = vperm.xlu0 %14805, %v12458_v46  }
 0x84d   : > { %14808 = vset.pattern.permute.xlu1 %v16848_v12  ;;  %14807 = vset.pattern.permute.xlu0 %v16848_v12 }
 0x8b4   : > { %v12431_v24 = vpop.permute.xlu0 %12430 }
 0x8b5   : > { %v12436_v55 = vmul.f32 %v12431_v24, %v12404_v8 }
 0x8b7   : > { %v12497_v37 = vrot.slane %v12436_v55, %v15155_v15  ;;  %v14930_v55 = vmov 4  }
 0x8b8   : > { %v12426_v42 = vpop.permute.xlu1 %12425 }
 0x8b9   : > { %v12435_v32 = vmul.f32 %v12426_v42, %v12403_v22 }
 0x8bb   : > { %v12493_v43 = vrot.slane %v12435_v32, %v15155_v15 }
 0x8bc   : > { %v12421_v58 = vpop.permute.xlu0 %12420  ;;  %v12480_v54 = vpop.permute.xlu1 %12479 }
 0x8bd   : > { %v12501_v6 = vmul.f32 %v12497_v37, %v12480_v54  ;;  %v12434_v28 = vmul.f32 %v12421_v58, %v12402_v53 }
 0x8bf   : > { %v12505_v47 = vsub.f32 %v12404_v8, %v12501_v6  ;;  %v12489_v3 = vrot.slane %v12434_v28, %v15155_v15 }
 0x8c0   : > { %v12416_v52 = vpop.permute.xlu0 %12415  ;;  %v12475_v33 = vpop.permute.xlu1 %12474 }
 0x8c1   : > { %14873 = vrcp.f32 %v12505_v47  ;;  %v12433_v31 = vmul.f32 %v12416_v52, %v12401_v56  ;;  %v12500_v11 = vmul.f32 %v12493_v43, %v12475_v33  ;;  %v14491_v8 = vadd.f32 -1.0, %v12505_v47 }
 0x8c3   : > { %v12504_v63 = vsub.f32 %v12403_v22, %v12500_v11  ;;  %v12485_v17 = vrot.slane %v12433_v31, %v15155_v15  ;;  %v12558_v61 = vrot.slane %v14491_v8, %v15158_v19 }
 0x8c4   : > { %v12465_v18 = vpop.permute.xlu0 %12464  ;;  %v12470_v40 = vpop.permute.xlu1 %12469 }
 0x8c5   : > { %14875 = vrcp.f32 %v12504_v63  ;;  %v12499_v51 = vmul.f32 %v12489_v3, %v12470_v40  ;;  %v12498_v49 = vmul.f32 %v12485_v17, %v12465_v18  ;;  %v14490_v20 = vadd.f32 -1.0, %v12504_v63 }
 0x8c6   : > { %v12562_v15 = vsel %vm12538_vm14, %v12558_v61, %v12505_v47 }
 0x8c7   : > { %v12503_v13 = vsub.f32 %v12402_v53, %v12499_v51  ;;  %v12502_v14 = vsub.f32 %v12401_v56, %v12498_v49  ;;  %v12554_v7 = vrot.slane %v14490_v20, %v15158_v19 }
 0x8c9   : > { %14877 = vrcp.f32 %v12503_v13  ;;  %v14489_v9 = vadd.f32 -1.0, %v12503_v13  ;;  %v12561_v53 = vsel %vm12538_vm14, %v12554_v7, %v12504_v63  ;;  %v14488_v2 = vadd.f32 -1.0, %v12502_v14 }
 0x8ca   : > { %14879 = vrcp.f32 %v12502_v14 }
 0x8cb   : > { %v12550_v56 = vrot.slane %v14489_v9, %v15158_v19  ;;  %v12546_v12 = vrot.slane %v14488_v2, %v15158_v19 }
 0x8cd   : > { %v12560_v50 = vsel %vm12538_vm14, %v12550_v56, %v12503_v13  ;;  %v12559_v24 = vsel %vm12538_vm14, %v12546_v12, %v12502_v14 }
 0x8ce   : > { %v14874_v59 = vpop.eup %14873 }
 0x8cf   : > { %12531 = vperm.xlu1 %14808, %v14874_v59  }
 0x8d2   : > { %v14876_v22 = vpop.eup %14875 }
 0x8d3   : > { %12580 = vperm.xlu1 %14808, %v12562_v15   ;;  %12526 = vperm.xlu0 %14807, %v14876_v22  }
 0x8d6   : > { %v14878_v35 = vpop.eup %14877 }
 0x8d7   : > { %12575 = vperm.xlu0 %14807, %v12561_v53   ;;  %12521 = vperm.xlu1 %14808, %v14878_v35   ;;  %v14880_v46 = vpop.eup %14879 }
 0x8db   : > { %12570 = vperm.xlu0 %14807, %v12560_v50   ;;  %12516 = vperm.xlu1 %14808, %v14880_v46  }
 0x8df   : > { %12565 = vperm.xlu1 %14808, %v12559_v24   ;;  %14809 = vset.pattern.permute.xlu0 %v14930_v55 }
 0x8e3   : > { %14810 = vset.pattern.permute.xlu1 %v14930_v55 }
 0x94a   : > { %v12532_v42 = vpop.permute.xlu1 %12531 }
 0x94b   : > { %v12537_v32 = vmul.f32 %v12532_v42, %v12505_v47  ;;  %v14931_v42 = vmov 5  }
 0x94d   : > { %v12598_v37 = vrot.slane %v12537_v32, %v15158_v19 }
 0x94e   : > { %v12527_v58 = vpop.permute.xlu0 %12526  ;;  %v12581_v54 = vpop.permute.xlu1 %12580 }
 0x94f   : > { %v12536_v6 = vmul.f32 %v12527_v58, %v12504_v63  ;;  %v12602_v28 = vmul.f32 %v12598_v37, %v12581_v54 }
 0x951   : > { %v12606_v43 = vsub.f32 %v12505_v47, %v12602_v28  ;;  %v12594_v52 = vrot.slane %v12536_v6, %v15158_v19 }
 0x952   : > { %v12576_v33 = vpop.permute.xlu0 %12575  ;;  %v12522_v11 = vpop.permute.xlu1 %12521 }
 0x953   : > { %14881 = vrcp.f32 %v12606_v43  ;;  %v12601_v31 = vmul.f32 %v12594_v52, %v12576_v33  ;;  %v12535_v17 = vmul.f32 %v12522_v11, %v12503_v13  ;;  %v14495_v7 = vadd.f32 -1.0, %v12606_v43 }
 0x955   : > { %v12605_v3 = vsub.f32 %v12504_v63, %v12601_v31  ;;  %v12590_v40 = vrot.slane %v12535_v17, %v15158_v19  ;;  %v12659_v63 = vrot.slane %v14495_v7, %v15118_v45 }
 0x956   : > { %v12571_v18 = vpop.permute.xlu0 %12570  ;;  %v12517_v51 = vpop.permute.xlu1 %12516 }
 0x957   : > { %14883 = vrcp.f32 %v12605_v3  ;;  %v12600_v49 = vmul.f32 %v12590_v40, %v12571_v18  ;;  %v12534_v8 = vmul.f32 %v12517_v51, %v12502_v14  ;;  %v14494_v53 = vadd.f32 -1.0, %v12605_v3 }
 0x959   : > { %v12604_v59 = vsub.f32 %v12503_v13, %v12600_v49  ;;  %v12586_v61 = vrot.slane %v12534_v8, %v15158_v19  ;;  %v12663_v13 = vsel %vm12639_vm15, %v12659_v63, %v12606_v43  ;;  %v12655_v19 = vrot.slane %v14494_v53, %v15118_v45 }
 0x95a   : > { %v12566_v20 = vpop.permute.xlu1 %12565 }
 0x95b   : > { %14885 = vrcp.f32 %v12604_v59  ;;  %v12599_v47 = vmul.f32 %v12586_v61, %v12566_v20  ;;  %v14493_v56 = vadd.f32 -1.0, %v12604_v59  ;;  %v12662_v2 = vsel %vm12639_vm15, %v12655_v19, %v12605_v3 }
 0x95d   : > { %v12603_v22 = vsub.f32 %v12502_v14, %v12599_v47  ;;  %v12651_v50 = vrot.slane %v14493_v56, %v15118_v45 }
 0x95f   : > { %14887 = vrcp.f32 %v12603_v22  ;;  %v14492_v14 = vadd.f32 -1.0, %v12603_v22  ;;  %v12661_v24 = vsel %vm12639_vm15, %v12651_v50, %v12604_v59 }
 0x960   : > { %v14882_v15 = vpop.eup %14881 }
 0x961   : > { %12632 = vperm.xlu0 %14809, %v14882_v15   ;;  %v12647_v12 = vrot.slane %v14492_v14, %v15118_v45 }
 0x963   : > { %v12660_v55 = vsel %vm12639_vm15, %v12647_v12, %v12603_v22 }
 0x964   : > { %v14884_v9 = vpop.eup %14883 }
 0x965   : > { %12627 = vperm.xlu1 %14810, %v14884_v9  }
 0x968   : > { %v14886_v35 = vpop.eup %14885 }
 0x969   : > { %12681 = vperm.xlu1 %14810, %v12663_v13   ;;  %12622 = vperm.xlu0 %14809, %v14886_v35  }
 0x96c   : > { %v14888_v46 = vpop.eup %14887 }
 0x96d   : > { %12676 = vperm.xlu1 %14810, %v12662_v2   ;;  %12617 = vperm.xlu0 %14809, %v14888_v46  }
 0x971   : > { %12671 = vperm.xlu1 %14810, %v12661_v24   ;;  %12666 = vperm.xlu0 %14809, %v12660_v55  }
 0x975   : > { %14812 = vset.pattern.permute.xlu1 %v14931_v42  ;;  %14811 = vset.pattern.permute.xlu0 %v14931_v42  ;;  %v14932_v42 = vmov 6  }
 0x9dc   : > { %v12633_v32 = vpop.permute.xlu0 %12632 }
 0x9dd   : > { %v12638_v37 = vmul.f32 %v12633_v32, %v12606_v43 }
 0x9df   : > { %v12699_v6 = vrot.slane %v12638_v37, %v15118_v45 }
 0x9e0   : > { %v12628_v58 = vpop.permute.xlu1 %12627 }
 0x9e1   : > { %v12637_v54 = vmul.f32 %v12628_v58, %v12605_v3 }
 0x9e3   : > { %v12695_v17 = vrot.slane %v12637_v54, %v15118_v45 }
 0x9e4   : > { %v12682_v28 = vpop.permute.xlu1 %12681  ;;  %v12623_v52 = vpop.permute.xlu0 %12622 }
 0x9e5   : > { %v12703_v33 = vmul.f32 %v12699_v6, %v12682_v28  ;;  %v12636_v31 = vmul.f32 %v12623_v52, %v12604_v59 }
 0x9e7   : > { %v12707_v11 = vsub.f32 %v12606_v43, %v12703_v33  ;;  %v12691_v61 = vrot.slane %v12636_v31, %v15118_v45 }
 0x9e8   : > { %v12677_v18 = vpop.permute.xlu1 %12676  ;;  %v12618_v40 = vpop.permute.xlu0 %12617 }
 0x9e9   : > { %14889 = vrcp.f32 %v12707_v11  ;;  %v12702_v51 = vmul.f32 %v12695_v17, %v12677_v18  ;;  %v12635_v49 = vmul.f32 %v12618_v40, %v12603_v22  ;;  %v14499_v43 = vadd.f32 -1.0, %v12707_v11 }
 0x9eb   : > { %v12706_v8 = vsub.f32 %v12605_v3, %v12702_v51  ;;  %v12687_v20 = vrot.slane %v12635_v49, %v15118_v45  ;;  %v12760_v19 = vrot.slane %v14499_v43, %v15413_v1 }
 0x9ec   : > { %v12672_v47 = vpop.permute.xlu1 %12671  ;;  %v12667_v15 = vpop.permute.xlu0 %12666 }
 0x9ed   : > { %14891 = vrcp.f32 %v12706_v8  ;;  %v12701_v7 = vmul.f32 %v12691_v61, %v12672_v47  ;;  %v12700_v9 = vmul.f32 %v12687_v20, %v12667_v15  ;;  %v14498_v56 = vadd.f32 -1.0, %v12706_v8 }
 0x9ee   : > { %v12764_v45 = vsel %vm12740_vm0, %v12760_v19, %v12707_v11 }
 0x9ef   : > { %v12705_v63 = vsub.f32 %v12604_v59, %v12701_v7  ;;  %v12704_v53 = vsub.f32 %v12603_v22, %v12700_v9  ;;  %v12756_v35 = vrot.slane %v14498_v56, %v15413_v1 }
 0x9f1   : > { %14893 = vrcp.f32 %v12705_v63  ;;  %v14497_v14 = vadd.f32 -1.0, %v12705_v63  ;;  %v12763_v22 = vsel %vm12740_vm0, %v12756_v35, %v12706_v8  ;;  %v14496_v50 = vadd.f32 -1.0, %v12704_v53 }
 0x9f2   : > { %14895 = vrcp.f32 %v12704_v53 }
 0x9f3   : > { %v12752_v2 = vrot.slane %v14497_v14, %v15413_v1  ;;  %v12748_v24 = vrot.slane %v14496_v50, %v15413_v1 }
 0x9f5   : > { %v12762_v12 = vsel %vm12740_vm0, %v12752_v2, %v12705_v63  ;;  %v12761_v55 = vsel %vm12740_vm0, %v12748_v24, %v12704_v53 }
 0x9f6   : > { %v14890_v13 = vpop.eup %14889 }
 0x9f7   : > { %12733 = vperm.xlu1 %14812, %v14890_v13  }
 0x9fa   : > { %v14892_v3 = vpop.eup %14891 }
 0x9fb   : > { %12782 = vperm.xlu1 %14812, %v12764_v45   ;;  %12728 = vperm.xlu0 %14811, %v14892_v3  }
 0x9fe   : > { %v14894_v59 = vpop.eup %14893 }
 0x9ff   : > { %12777 = vperm.xlu0 %14811, %v12763_v22   ;;  %12723 = vperm.xlu1 %14812, %v14894_v59   ;;  %v14896_v46 = vpop.eup %14895 }
 0xa03   : > { %12772 = vperm.xlu0 %14811, %v12762_v12   ;;  %12718 = vperm.xlu1 %14812, %v14896_v46  }
 0xa07   : > { %12767 = vperm.xlu1 %14812, %v12761_v55   ;;  %14813 = vset.pattern.permute.xlu0 %v14932_v42  ;;  %v14933_v55 = vmov 7  }
 0xa0b   : > { %14814 = vset.pattern.permute.xlu1 %v14932_v42 }
 0xa72   : > { %v12734_v32 = vpop.permute.xlu1 %12733 }
 0xa73   : > { %v12739_v37 = vmul.f32 %v12734_v32, %v12707_v11 }
 0xa75   : > { %v12800_v58 = vrot.slane %v12739_v37, %v15413_v1 }
 0xa76   : > { %v12729_v54 = vpop.permute.xlu0 %12728  ;;  %v12783_v6 = vpop.permute.xlu1 %12782 }
 0xa77   : > { %v12738_v28 = vmul.f32 %v12729_v54, %v12706_v8  ;;  %v12804_v52 = vmul.f32 %v12800_v58, %v12783_v6 }
 0xa79   : > { %v12808_v33 = vsub.f32 %v12707_v11, %v12804_v52  ;;  %v12796_v31 = vrot.slane %v12738_v28, %v15413_v1 }
 0xa7a   : > { %v12778_v17 = vpop.permute.xlu0 %12777  ;;  %v12724_v18 = vpop.permute.xlu1 %12723 }
 0xa7b   : > { %14897 = vrcp.f32 %v12808_v33  ;;  %v12803_v40 = vmul.f32 %v12796_v31, %v12778_v17  ;;  %v12737_v51 = vmul.f32 %v12724_v18, %v12705_v63  ;;  %v14503_v3 = vadd.f32 -1.0, %v12808_v33 }
 0xa7d   : > { %v12807_v49 = vsub.f32 %v12706_v8, %v12803_v40  ;;  %v12792_v61 = vrot.slane %v12737_v51, %v15413_v1  ;;  %v12861_v8 = vrot.slane %v14503_v3, %v15716_v30 }
 0xa7e   : > { %v12773_v20 = vpop.permute.xlu0 %12772  ;;  %v12719_v47 = vpop.permute.xlu1 %12718 }
 0xa7f   : > { %14899 = vrcp.f32 %v12807_v49  ;;  %v12802_v15 = vmul.f32 %v12792_v61, %v12773_v20  ;;  %v12736_v7 = vmul.f32 %v12719_v47, %v12704_v53  ;;  %v14502_v35 = vadd.f32 -1.0, %v12807_v49 }
 0xa80   : > { %v12865_v59 = vsel %vm12841_vm1, %v12861_v8, %v12808_v33 }
 0xa81   : > { %v12806_v9 = vsub.f32 %v12705_v63, %v12802_v15  ;;  %v12788_v43 = vrot.slane %v12736_v7, %v15413_v1  ;;  %v12857_v63 = vrot.slane %v14502_v35, %v15716_v30 }
 0xa82   : > { %v12768_v13 = vpop.permute.xlu1 %12767 }
 0xa83   : > { %14901 = vrcp.f32 %v12806_v9  ;;  %v12801_v11 = vmul.f32 %v12788_v43, %v12768_v13  ;;  %v14501_v1 = vadd.f32 -1.0, %v12806_v9  ;;  %v12864_v2 = vsel %vm12841_vm1, %v12857_v63, %v12807_v49 }
 0xa85   : > { %v12805_v19 = vsub.f32 %v12704_v53, %v12801_v11  ;;  %v12853_v50 = vrot.slane %v14501_v1, %v15716_v30 }
 0xa87   : > { %14903 = vrcp.f32 %v12805_v19  ;;  %v14500_v22 = vadd.f32 -1.0, %v12805_v19  ;;  %v12863_v12 = vsel %vm12841_vm1, %v12853_v50, %v12806_v9 }
 0xa88   : > { %v14898_v56 = vpop.eup %14897 }
 0xa89   : > { %12834 = vperm.xlu0 %14813, %v14898_v56   ;;  %v12849_v46 = vrot.slane %v14500_v22, %v15716_v30 }
 0xa8b   : > { %v12862_v24 = vsel %vm12841_vm1, %v12849_v46, %v12805_v19 }
 0xa8c   : > { %v14900_v45 = vpop.eup %14899 }
 0xa8d   : > { %12829 = vperm.xlu1 %14814, %v14900_v45  }
 0xa90   : > { %v14902_v14 = vpop.eup %14901 }
 0xa91   : > { %12883 = vperm.xlu1 %14814, %v12865_v59   ;;  %12824 = vperm.xlu0 %14813, %v14902_v14  }
 0xa94   : > { %v14904_v53 = vpop.eup %14903 }
 0xa95   : > { %12878 = vperm.xlu1 %14814, %v12864_v2   ;;  %12819 = vperm.xlu0 %14813, %v14904_v53  }
 0xa99   : > { %12873 = vperm.xlu1 %14814, %v12863_v12   ;;  %12868 = vperm.xlu0 %14813, %v12862_v24  }
 0xa9d   : > { %14816 = vset.pattern.permute.xlu1 %v14933_v55  ;;  %14815 = vset.pattern.permute.xlu0 %v14933_v55 }
 0xb04   : > { %v12835_v42 = vpop.permute.xlu0 %12834 }
 0xb05   : > { %v12840_v32 = vmul.f32 %v12835_v42, %v12808_v33 }
 0xb07   : > { %v12901_v54 = vrot.slane %v12840_v32, %v15716_v30 }
 0xb08   : > { %v12830_v37 = vpop.permute.xlu1 %12829 }
 0xb09   : > { %v12839_v58 = vmul.f32 %v12830_v37, %v12807_v49 }
 0xb0b   : > { %v12897_v18 = vrot.slane %v12839_v58, %v15716_v30 }
 0xb0c   : > { %v12825_v6 = vpop.permute.xlu0 %12824  ;;  %v12884_v28 = vpop.permute.xlu1 %12883 }
 0xb0d   : > { %v12905_v52 = vmul.f32 %v12901_v54, %v12884_v28  ;;  %v12838_v31 = vmul.f32 %v12825_v6, %v12806_v9 }
 0xb0f   : > { %v12909_v17 = vsub.f32 %v12808_v33, %v12905_v52  ;;  %v12893_v7 = vrot.slane %v12838_v31, %v15716_v30 }
 0xb10   : > { %v12820_v40 = vpop.permute.xlu0 %12819  ;;  %v12879_v51 = vpop.permute.xlu1 %12878 }
 0xb11   : > { %14905 = vrcp.f32 %v12909_v17  ;;  %v12837_v61 = vmul.f32 %v12820_v40, %v12805_v19  ;;  %v12904_v20 = vmul.f32 %v12897_v18, %v12879_v51  ;;  %v14507_v33 = vadd.f32 -1.0, %v12909_v17 }
 0xb13   : > { %v12908_v47 = vsub.f32 %v12807_v49, %v12904_v20  ;;  %v12889_v15 = vrot.slane %v12837_v61, %v15716_v30  ;;  %v12962_v35 = vrot.slane %v14507_v33, %v16013_v39 }
 0xb14   : > { %v12869_v43 = vpop.permute.xlu0 %12868  ;;  %v12874_v13 = vpop.permute.xlu1 %12873 }
 0xb15   : > { %14907 = vrcp.f32 %v12908_v47  ;;  %v12903_v11 = vmul.f32 %v12893_v7, %v12874_v13  ;;  %v12902_v56 = vmul.f32 %v12889_v15, %v12869_v43  ;;  %v14506_v14 = vadd.f32 -1.0, %v12908_v47 }
 0xb16   : > { %v12966_v30 = vsel %vm12942_vm2, %v12962_v35, %v12909_v17 }
 0xb17   : > { %v12907_v3 = vsub.f32 %v12806_v9, %v12903_v11  ;;  %v12906_v45 = vsub.f32 %v12805_v19, %v12902_v56  ;;  %v12958_v59 = vrot.slane %v14506_v14, %v16013_v39 }
 0xb19   : > { %14909 = vrcp.f32 %v12907_v3  ;;  %v14505_v63 = vadd.f32 -1.0, %v12907_v3  ;;  %v12965_v9 = vsel %vm12942_vm2, %v12958_v59, %v12908_v47  ;;  %v14504_v22 = vadd.f32 -1.0, %v12906_v45 }
 0xb1a   : > { %14911 = vrcp.f32 %v12906_v45 }
 0xb1b   : > { %v12954_v19 = vrot.slane %v14505_v63, %v16013_v39  ;;  %v12950_v50 = vrot.slane %v14504_v22, %v16013_v39 }
 0xb1d   : > { %v12964_v53 = vsel %vm12942_vm2, %v12954_v19, %v12907_v3  ;;  %v12963_v46 = vsel %vm12942_vm2, %v12950_v50, %v12906_v45 }
 0xb1e   : > { %v14906_v8 = vpop.eup %14905 }
 0xb1f   : > { %12935 = vperm.xlu1 %14816, %v14906_v8  }
 0xb22   : > { %v14908_v49 = vpop.eup %14907 }
 0xb23   : > { %12984 = vperm.xlu1 %14816, %v12966_v30   ;;  %12930 = vperm.xlu0 %14815, %v14908_v49  }
 0xb26   : > { %v14910_v1 = vpop.eup %14909 }
 0xb27   : > { %12979 = vperm.xlu0 %14815, %v12965_v9   ;;  %12925 = vperm.xlu1 %14816, %v14910_v1   ;;  %v14912_v2 = vpop.eup %14911 }
 0xb2b   : > { %12974 = vperm.xlu0 %14815, %v12964_v53   ;;  %12920 = vperm.xlu1 %14816, %v14912_v2  }
 0xb2f   : > { %12969 = vperm.xlu1 %14816, %v12963_v46  }
 0xb9a   : > { %v12936_v12 = vpop.permute.xlu1 %12935 }
 0xb9b   : > { %v12941_v24 = vmul.f32 %v12936_v12, %v12909_v17 }
 0xb9d   : > { %v13002_v55 = vrot.slane %v12941_v24, %v16013_v39 }
 0xb9e   : > { %v12931_v42 = vpop.permute.xlu0 %12930  ;;  %v12985_v32 = vpop.permute.xlu1 %12984 }
 0xb9f   : > { %v12940_v37 = vmul.f32 %v12931_v42, %v12908_v47  ;;  %v13006_v58 = vmul.f32 %v13002_v55, %v12985_v32 }
 0xba1   : > { %v13010_v54 = vsub.f32 %v12909_v17, %v13006_v58  ;;  %v12998_v6 = vrot.slane %v12940_v37, %v16013_v39 }
 0xba2   : > { %v12980_v28 = vpop.permute.xlu0 %12979  ;;  %v12926_v18 = vpop.permute.xlu1 %12925 }
 0xba3   : > { %v13014_v52 = vmul.f32 0.9, %v13010_v54  ;;  %v13005_v31 = vmul.f32 %v12998_v6, %v12980_v28  ;;  %v12939_v40 = vmul.f32 %v12926_v18, %v12907_v3 }
 0xba5   : > { %v13009_v51 = vsub.f32 %v12908_v47, %v13005_v31  ;;  %13663 = vrot.lane.b32.xlu0 %v13014_v52, %s14934_s27  ;;  %v12994_v61 = vrot.slane %v12939_v40, %v16013_v39  ;;  %v16648_v47 = vpop.f32.mrf.mxu1 }
 0xba6   : > { %v12975_v57 = vpop.permute.xlu0 %12974  ;;  %v12921_v15 = vpop.permute.xlu1 %12920 }
 0xba7   : > { %v13013_v20 = vmul.f32 0.9, %v13009_v51  ;;  %v13004_v7 = vmul.f32 %v12994_v61, %v12975_v57  ;;  %v12938_v43 = vmul.f32 %v12921_v15, %v12906_v45 }
 0xba9   : > { %13661 = vrot.lane.b32.xlu1 %v13013_v20, %s14934_s27  ;;  %v13008_v13 = vsub.f32 %v12907_v3, %v13004_v7  ;;  %v12990_v17 = vrot.slane %v12938_v43, %v16013_v39  ;;  %v16646_v39 = vpop.f32.mrf.mxu0 }
 0xbaa   : > { %v12970_v11 = vpop.permute.xlu1 %12969 }
 0xbab   : > { %v13012_v56 = vmul.f32 0.9, %v13008_v13  ;;  %v13003_v33 = vmul.f32 %v12990_v17, %v12970_v11  ;;  %v13114_v3 = vpop.f32.mrf.mxu0 }
 0xbad   : > { %v13007_v8 = vsub.f32 %v12906_v45, %v13003_v33  ;;  %13659 = vrot.lane.b32.xlu0 %v13012_v56, %s14934_s27  ;;  %v13235_v45 = vpop.f32.mrf.mxu1  ;;  %v16650_v14 = vpop.f32.mrf.mxu0 }
 0xbaf   : > { %v13011_v35 = vmul.f32 0.9, %v13007_v8  ;;  %v16652_v49 = vpop.f32.mrf.mxu1  ;;  %v16654_v30 = vpop.f32.mrf.mxu0 }
 0xbb1   : > { %14287 = vrot.lane.b32.xlu0 %v16187_v10, %s14929_s26  ;;  %13657 = vrot.lane.b32.xlu1 %v13011_v35, %s14934_s27  ;;  %v16656_v59 = vpop.f32.mrf.mxu1  ;;  %v16658_v63 = vpop.f32.mrf.mxu0 }
 0xbb3   : > { %v16661_v1 = vpop.f32.mrf.mxu1  ;;  %v13333_v53 = vpop.f32.mrf.mxu0 }
 0xbb5   : > { %14291 = vrot.lane.b32.xlu0 %v16272_v41, %s14929_s26  ;;  %14289 = vrot.lane.b32.xlu1 %v16293_v62, %s14929_s26  ;;  %v13431_v12 = vpop.f32.mrf.mxu1  ;;  %v16673_v42 = vpop.f32.mrf.mxu0 }
 0xbb7   : > { %v16681_v54 = vpop.f32.mrf.mxu1  ;;  %v13347_v18 = vpop.f32.mrf.mxu0 }
 0xbb9   : > { %14299 = vrot.lane.b32.xlu0 %v16187_v10, %s14935_s28  ;;  %14293 = vrot.lane.b32.xlu1 %v16296_v29, %s14929_s26  ;;  %v13447_v20 = vpop.f32.mrf.mxu1  ;;  %v14675_v15 = vpop.f32.mrf.mxu0 }
 0xbbb   : > { %v14689_v11 = vpop.f32.mrf.mxu1 }
 0xbbd   : > { %14303 = vrot.lane.b32.xlu0 %v16272_v41, %s14935_s28  ;;  %14301 = vrot.lane.b32.xlu1 %v16293_v62, %s14935_s28 }
 0xbc1   : > { %14311 = vrot.lane.b32.xlu0 %v16187_v10, %s14936_s29  ;;  %14305 = vrot.lane.b32.xlu1 %v16296_v29, %s14935_s28 }
 0xbc5   : > { %14315 = vrot.lane.b32.xlu0 %v16272_v41, %s14936_s29  ;;  %14313 = vrot.lane.b32.xlu1 %v16293_v62, %s14936_s29 }
 0xbc9   : > { %14317 = vrot.lane.b32.xlu1 %v16296_v29, %s14936_s29 }
 0xc17   : > { %v13664_v9 = vpop.permute.xlu0 %13663 }
 0xc18   : > { %v13671_v19 = vsel %vm12137_vm9, %v13664_v9, 0  ;;  %v13538_v9 = vpop.f32.mrf.mxu0 }
 0xc19   : > { %v16663_v22 = vand.u32 4294901760, %v13671_v19 }
 0xc1b   : > { %v13808_v2 = vsub.f32 %v13671_v19, %v16663_v22  ;;  %14693 = vmatprep.subr.mxu0 %v16663_v22  ;;  %v13662_v50 = vpop.permute.xlu1 %13661  ;;  %v13236_v19 = vadd.f32 %v13235_v45, %v13114_v3  ;;  %v14678_v3 = vpop.f32.mrf.mxu0  ;;  %v13248_v45 = vadd.f32 %v16656_v59, %v16654_v30  ;;  %v13254_v30 = vadd.f32 %v16652_v49, %v16650_v14 }
 0xc1c   : > { %v13669_v46 = vsel %vm12137_vm9, %v13662_v50, 0  ;;  %14694 = vmatpush3.xpose.msra.mxu0 %v16663_v22 }
 0xc1d   : > { %v16669_v24 = vand.u32 4294901760, %v13669_v46  ;;  %v16671_v55 = vand.u32 4294901760, %v13808_v2 }
 0xc1f   : > { %v16676_v32 = vsub.f32 %v13669_v46, %v16669_v24  ;;  %14695 = vmatprep.subr.mxu0 %v16669_v24  ;;  %v13810_v37 = vsub.f32 %v13808_v2, %v16671_v55  ;;  %v13660_v58 = vpop.permute.xlu0 %13659 }
 0xc20   : > { %14696 = vmatpush3.xpose.msra.mxu0 %v16669_v24  ;;  %v13667_v6 = vsel %vm12137_vm9, %v13660_v58, 0  ;;  %v13334_v58 = vadd.f32 %v13333_v53, %v13236_v19 }
 0xc21   : > { %v13811_v28 = vand.u32 4294901760, %v13810_v37  ;;  %v16685_v52 = vand.u32 4294901760, %v16676_v32  ;;  %v16687_v31 = vand.u32 4294901760, %v13667_v6  ;;  %v13631_v37 = vpop.f32.mrf.mxu1 }
 0xc22   : > { %v13432_v53 = vadd.f32 %v13431_v12, %v13334_v58 }
 0xc23   : > { %14707 = vmatprep.subr.mxu1 %v13811_v28  ;;  %v13817_v40 = vsub.f32 %v16676_v32, %v16685_v52  ;;  %v16692_v51 = vsub.f32 %v13667_v6, %v16687_v31  ;;  %v16694_v57 = vpop.permute.xlu0 %14287  ;;  %14697 = vmatprep.subr.mxu0 %v16687_v31  ;;  %v13658_v61 = vpop.permute.xlu1 %13657 }
 0xc24   : > { %14708 = vmatpush3.xpose.msra.mxu1 %v13811_v28  ;;  %v13665_v7 = vsel %vm12137_vm9, %v13658_v61, 0  ;;  %14698 = vmatpush3.xpose.msra.mxu0 %v16687_v31  ;;  %v13242_v61 = vadd.f32 %v16648_v47, %v16646_v39  ;;  %v13539_v19 = vadd.f32 %v13538_v9, %v13432_v53  ;;  %v13550_v47 = vpop.f32.mrf.mxu0 }
 0xc25   : > { %v13818_v43 = vand.u32 4294901760, %v13817_v40  ;;  %v16699_v13 = vand.u32 4294901760, %v13665_v7  ;;  %v16702_v17 = vand.u32 4294901760, %v16692_v51 }
 0xc27   : > { %14709 = vmatprep.subr.mxu1 %v13818_v43  ;;  %v16705_v56 = vsub.f32 %v13665_v7, %v16699_v13  ;;  %v16707_v33 = vpop.permute.xlu0 %14291  ;;  %14699 = vmatprep.subr.mxu0 %v16699_v13  ;;  %v16710_v8 = vpop.permute.xlu1 %14289  ;;  %v13824_v35 = vsub.f32 %v16692_v51, %v16702_v17 }
 0xc28   : > { %14710 = vmatpush3.xpose.msra.mxu1 %v13818_v43  ;;  %14700 = vmatpush3.xpose.msra.mxu0 %v16699_v13  ;;  %v14692_v43 = vpop.f32.mrf.mxu1  ;;  %v14325_v9 = vsel %vm12137_vm9, %v16272_v41, %v16707_v33 }
 0xc29   : > { %14721 = vmatprep.subr.mxu0 %v13808_v2  ;;  %v13825_v50 = vand.u32 4294901760, %v13824_v35  ;;  %v16716_v46 = vand.u32 4294901760, %v16705_v56  ;;  %v13348_v35 = vadd.f32 %v13347_v18, %v13248_v45 }
 0xc2b   : > { %v14300_v6 = vpop.permute.xlu0 %14299  ;;  %14702 = vmatmul.mubr.f32.vlgmr.msra.gmra.mxu0 %v16432_v23  ;;  %14711 = vmatprep.subr.mxu1 %v13825_v50  ;;  %v16719_v28 = vpop.permute.xlu1 %14293  ;;  %v13831_v40 = vsub.f32 %v16705_v56, %v16716_v46  ;;  %v13341_v23 = vadd.f32 %v16658_v63, %v13242_v61  ;;  %v13448_v59 = vadd.f32 %v13447_v20, %v13348_v35 }
 0xc2c   : > { %14704 = vmatprep.mubr.f32.mxu0 %v16440_v16  ;;  %14712 = vmatpush3.xpose.msra.mxu1 %v13825_v50  ;;  %v13632_v63 = vadd.f32 %v13631_v37, %v13539_v19 }
 0xc2d   : > { %14722 = vmatpush3.xpose.msra.mxu0 %v13808_v2  ;;  %v13832_v7 = vand.u32 4294901760, %v13831_v40  ;;  %v13440_v16 = vadd.f32 %v16661_v1, %v13341_v23  ;;  %v13643_v2 = vpop.f32.mrf.mxu1  ;;  %v14323_v1 = vsel %vm12137_vm9, %v16187_v10, %v16694_v57  ;;  %v13551_v12 = vadd.f32 %v13550_v47, %v13448_v59 }
 0xc2e   : > { %14723 = vmatprep.subr.mxu0 %v16676_v32  ;;  %v14328_v14 = vsel %vm14327_vm3, %v14323_v1, %v14300_v6  ;;  %v14337_v57 = vmul.f32 0.1, %v13632_v63 }
 0xc2f   : > { %v14304_v5 = vpop.permute.xlu0 %14303  ;;  %14705 = vmatmul.mubr.f32.gmra.mxu0 %v16446_v38  ;;  %14713 = vmatprep.subr.mxu1 %v13832_v7  ;;  %v14302_v39 = vpop.permute.xlu1 %14301  ;;  %v13545_v38 = vadd.f32 %v14675_v15, %v13440_v16 }
 0xc30   : > { %14714 = vmatpush3.xpose.msra.mxu1 %v13832_v7  ;;  %14729 = vmatprep.mubr.f32.mxu0 %v16232_v25  ;;  %v13355_v25 = vadd.f32 %v16673_v42, %v13254_v30  ;;  %v13644_v42 = vadd.f32 %v13643_v2, %v13551_v12 }
 0xc31   : > { %14724 = vmatpush3.xpose.msra.mxu0 %v16676_v32  ;;  %14735 = vmatprep.subr.mxu1 %v16663_v22  ;;  %v13638_v18 = vadd.f32 %v14689_v11, %v13545_v38  ;;  %v14324_v11 = vsel %vm12137_vm9, %v16293_v62, %v16710_v8 }
 0xc32   : > { %14725 = vmatprep.subr.mxu0 %v16692_v51  ;;  %v13456_v10 = vadd.f32 %v16681_v54, %v13355_v25  ;;  %v14329_v50 = vsel %vm14327_vm3, %v14324_v11, %v14302_v39  ;;  %v14339_v40 = vmul.f32 0.1, %v13644_v42 }
 0xc33   : > { %v14312_v49 = vpop.permute.xlu0 %14311  ;;  %14716 = vmatmul.mubr.f32.vlgmr.msra.gmra.mxu1 %v16332_v27  ;;  %v14306_v32 = vpop.permute.xlu1 %14305  ;;  %v14338_v8 = vmul.f32 0.1, %v13638_v18 }
 0xc34   : > { %v14333_v20 = vsel %vm14332_vm4, %v14328_v14, %v14312_v49  ;;  %14718 = vmatprep.mubr.f32.mxu1 %v16344_v26  ;;  %14736 = vmatpush3.xpose.msra.mxu1 %v16663_v22  ;;  %v13557_v54 = vadd.f32 %v14678_v3, %v13456_v10  ;;  %v14326_v3 = vsel %vm12137_vm9, %v16296_v29, %v16719_v28 }
 0xc35   : > { %v14341_v15 = vmul.f32 0.9, %v14333_v20  ;;  %14726 = vmatpush3.xpose.msra.mxu0 %v16692_v51  ;;  %14737 = vmatprep.subr.mxu1 %v16669_v24  ;;  %v14330_v51 = vsel %vm14327_vm3, %v14325_v9, %v14304_v5 }
 0xc36   : > { %14727 = vmatprep.subr.mxu0 %v16705_v56  ;;  %v13650_v6 = vadd.f32 %v14692_v43, %v13557_v54 }
 0xc37   : > { %v14345_v41 = vadd.f32 %v14341_v15, %v14337_v57  ;;  %v14316_v33 = vpop.permute.xlu0 %14315  ;;  %14719 = vmatmul.mubr.f32.gmra.mxu1 %v16359_v48  ;;  %v14314_v62 = vpop.permute.xlu1 %14313 }
 0xc38   : > { %v14335_v37 = vsel %vm14332_vm4, %v14330_v51, %v14316_v33  ;;  %v14334_v58 = vsel %vm14332_vm4, %v14329_v50, %v14314_v62  ;;  %14738 = vmatpush3.xpose.msra.mxu1 %v16669_v24  ;;  %14743 = vmatprep.mubr.f32.mxu1 %v16243_v4  ;;  %v14331_v4 = vsel %vm14327_vm3, %v14326_v3, %v14306_v32 }
 0xc39   : > { %14350 = vst.msk [vmem:[%s16762_s9] sm:$0xff] %vm14349_vm5, %v14345_v41  ;;  %v14343_v5 = vmul.f32 0.9, %v14335_v37  ;;  %v14342_v61 = vmul.f32 0.9, %v14334_v58  ;;  %14728 = vmatpush3.xpose.msra.mxu0 %v16705_v56  ;;  %14739 = vmatprep.subr.mxu1 %v16687_v31 }
 0xc3a   : > { %14749 = vmatprep.subr.mxu0 %v16671_v55  ;;  %v14340_v56 = vmul.f32 0.1, %v13650_v6 }
 0xc3b   : > { %v14347_v45 = vadd.f32 %v14343_v5, %v14339_v40  ;;  %v14346_v53 = vadd.f32 %v14342_v61, %v14338_v8  ;;  %v14318_v7 = vpop.permute.xlu1 %14317 }
 0xc3c   : > { %14730 = vmatmul.mubr.f32.vlgmr.msra.gmra.mxu0 %v16351_v44  ;;  %v14336_v23 = vsel %vm14332_vm4, %v14331_v4, %v14318_v7  ;;  %14740 = vmatpush3.xpose.msra.mxu1 %v16687_v31  ;;  %v16849_v44 = vld [vmem:[#allocation2_spill] sm:$0xff] }
 0xc3d   : > { %14352 = vst.msk [vmem:[%s16762_s9 + $0x10] sm:$0xff] %vm14349_vm5, %v14347_v45  ;;  %14351 = vst.msk [vmem:[%s16762_s9 + $0x8] sm:$0xff] %vm14349_vm5, %v14346_v53  ;;  %v14344_v29 = vmul.f32 0.9, %v14336_v23  ;;  %14732 = vmatprep.mubr.f32.mxu0 %v16370_v0  ;;  %14750 = vmatpush3.xpose.msra.mxu0 %v16671_v55 }
 0xc3e   : > { %14741 = vmatprep.subr.mxu1 %v16699_v13  ;;  %14751 = vmatprep.subr.mxu0 %v16685_v52 }
 0xc3f   : > { %v14348_v28 = vadd.f32 %v14344_v29, %v14340_v56 }
 0xc40   : > { %14733 = vmatmul.mubr.f32.gmra.mxu0 %v16387_v36  ;;  %14742 = vmatpush3.xpose.msra.mxu1 %v16699_v13 }
 0xc41   : > { %14353 = vst.msk [vmem:[%s16762_s9 + $0x18] sm:$0xff] %vm14349_vm5, %v14348_v28  ;;  %14752 = vmatpush3.xpose.msra.mxu0 %v16685_v52  ;;  %14757 = vmatprep.mubr.f32.mxu0 %v16221_v60 }
 0xc42   : > { %14753 = vmatprep.subr.mxu0 %v16702_v17  ;;  %14763 = vmatprep.subr.mxu1 %v16663_v22 }
 0xc43   : > { %14744 = vmatmul.mubr.f32.vlgmr.msra.gmra.mxu1 %v16378_v34 }
 0xc44   : > { %14746 = vmatprep.mubr.f32.mxu1 %v16399_v21  ;;  %14764 = vmatpush3.xpose.msra.mxu1 %v16663_v22 }
 0xc45   : > { %14754 = vmatpush3.xpose.msra.mxu0 %v16702_v17  ;;  %14765 = vmatprep.subr.mxu1 %v16669_v24 }
 0xc46   : > { %14755 = vmatprep.subr.mxu0 %v16716_v46 }
 0xc47   : > { %14747 = vmatmul.mubr.f32.gmra.mxu1 %v16849_v44 }
 0xc48   : > { %14766 = vmatpush3.xpose.msra.mxu1 %v16669_v24  ;;  %14771 = vmatprep.mubr.f32.mxu1 %v16221_v60 }
 0xc49   : > { %14756 = vmatpush3.xpose.msra.mxu0 %v16716_v46  ;;  %14767 = vmatprep.subr.mxu1 %v16687_v31 }
 0xc4c   : > { %14758 = vmatmul.mubr.f32.vlgmr.msra.gmra.mxu0 %v16332_v27  ;;  %14768 = vmatpush3.xpose.msra.mxu1 %v16687_v31 }
 0xc4d   : > { %14760 = vmatprep.mubr.f32.mxu0 %v16344_v26  ;;  %14769 = vmatprep.subr.mxu1 %v16699_v13 }
 0xc50   : > { %14761 = vmatmul.mubr.f32.gmra.mxu0 %v16359_v48  ;;  %14770 = vmatpush3.xpose.msra.mxu1 %v16699_v13 }
 0xc53   : > { %14772 = vmatmul.mubr.f32.vlgmr.msra.gmra.mxu1 %v16332_v27 }
 0xc54   : > { %14774 = vmatprep.mubr.f32.mxu1 %v16344_v26 }
 0xc57   : > { %14775 = vmatmul.mubr.f32.gmra.mxu1 %v16359_v48 }
 0xceb   : > { %v14703_v60 = vpop.f32.mrf.mxu0 }
 0xced   : > { %v13748_v0 = vpop.f32.mrf.mxu0 }
 0xcef   : > { %v14706_v36 = vpop.f32.mrf.mxu0 }
 0xcf1   : > { %v13768_v22 = vpop.f32.mrf.mxu0 }
 0xcf3   : > { %v14717_v34 = vpop.f32.mrf.mxu1 }
 0xcf4   : > { %v13876_v27 = vadd.f32 %v14717_v34, %v14703_v60 }
 0xcf5   : > { %v13869_v21 = vpop.f32.mrf.mxu1 }
 0xcf6   : > { %v13870_v19 = vadd.f32 %v13869_v21, %v13748_v0 }
 0xcf7   : > { %v14720_v55 = vpop.f32.mrf.mxu1 }
 0xcf8   : > { %v13888_v16 = vadd.f32 %v14720_v55, %v14706_v36 }
 0xcf9   : > { %v13881_v31 = vpop.f32.mrf.mxu1 }
 0xcfa   : > { %v13882_v38 = vadd.f32 %v13881_v31, %v13768_v22 }
 0xcfc   : > { %v14731_v24 = vpop.f32.mrf.mxu0 }
 0xcfd   : > { %v13975_v48 = vadd.f32 %v14731_v24, %v13876_v27 }
 0xcfe   : > { %v13967_v52 = vpop.f32.mrf.mxu0 }
 0xcff   : > { %v13968_v47 = vadd.f32 %v13967_v52, %v13870_v19 }
 0xd00   : > { %v14734_v46 = vpop.f32.mrf.mxu0 }
 0xd01   : > { %v13989_v2 = vadd.f32 %v14734_v46, %v13888_v16 }
 0xd02   : > { %v13981_v13 = vpop.f32.mrf.mxu0 }
 0xd03   : > { %v14745_v17 = vpop.f32.mrf.mxu1  ;;  %v13982_v14 = vadd.f32 %v13981_v13, %v13882_v38 }
 0xd04   : > { %v14074_v30 = vadd.f32 %v14745_v17, %v13975_v48 }
 0xd05   : > { %v14065_v43 = vpop.f32.mrf.mxu1 }
 0xd06   : > { %v14066_v1 = vadd.f32 %v14065_v43, %v13968_v47 }
 0xd07   : > { %v14748_v26 = vpop.f32.mrf.mxu1 }
 0xd08   : > { %v14090_v49 = vadd.f32 %v14748_v26, %v13989_v2 }
 0xd09   : > { %v14081_v59 = vpop.f32.mrf.mxu1 }
 0xd0a   : > { %v14082_v57 = vadd.f32 %v14081_v59, %v13982_v14 }
 0xd0c   : > { %v14759_v35 = vpop.f32.mrf.mxu0 }
 0xd0d   : > { %v14179_v25 = vadd.f32 %v14759_v35, %v14074_v30 }
 0xd0e   : > { %v14172_v39 = vpop.f32.mrf.mxu0 }
 0xd0f   : > { %v14173_v32 = vadd.f32 %v14172_v39, %v14066_v1 }
 0xd10   : > { %v14762_v63 = vpop.f32.mrf.mxu0 }
 0xd11   : > { %v14191_v42 = vadd.f32 %v14762_v63, %v14090_v49 }
 0xd12   : > { %v14184_v20 = vpop.f32.mrf.mxu0 }
 0xd13   : > { %v14773_v12 = vpop.f32.mrf.mxu1  ;;  %v14185_v11 = vadd.f32 %v14184_v20, %v14082_v57 }
 0xd14   : > { %v14272_v18 = vadd.f32 %v14773_v12, %v14179_v25 }
 0xd15   : > { %v14265_v10 = vpop.f32.mrf.mxu1 }
 0xd16   : > { %14355 = vst.msk [vmem:[%s278_s12 + $0x8] sm:$0xff] %vm14349_vm5, %v14272_v18  ;;  %v14266_v15 = vadd.f32 %v14265_v10, %v14173_v32 }
 0xd17   : > { %v14776_v9 = vpop.f32.mrf.mxu1 }
 0xd18   : > { %14354 = vst.msk [vmem:[%s278_s12] sm:$0xff] %vm14349_vm5, %v14266_v15  ;;  %v14284_v54 = vadd.f32 %v14776_v9, %v14191_v42 }
 0xd19   : > { %v14277_v51 = vpop.f32.mrf.mxu1 }
 0xd1a   : > { %14357 = vst.msk [vmem:[%s278_s12 + $0x18] sm:$0xff] %vm14349_vm5, %v14284_v54  ;;  %v14278_v50 = vadd.f32 %v14277_v51, %v14185_v11 }
 0xd1c   : > { %14356 = vst.msk [vmem:[%s278_s12 + $0x10] sm:$0xff] %vm14349_vm5, %v14278_v50 }
 0xd1d PF: > { %s17_s21 = sadd.s32 1, %s14922_s21  }
 0xd1e   : > { %p14_p4 = scmp.ge.s32.totalorder %s17_s21, 4  }
 0xd20   :  { %16 = sbr.rel (!%p14_p4) target bundleno = 1 (0x1), region = 91 }

</bundles_post_ra>
